<compile_context>
chip_gen: v7x
topology: tpu7x:2x2x1
jax: 0.10.0
libtpu: 0.0.40
codegen_flags: <defaults>
</compile_context>

<pallas_src>
import jax
import jax.numpy as jnp
import numpy as np
from jax import lax
from jax.experimental import pallas as pl
from jax.experimental.pallas import tpu as pltpu


def _round_up(x, m):
    return ((x + m - 1) // m) * m


def _choose_t_block(T, Bp, D, G3, AW, Pp, budget_bytes):
    """Largest divisor of T whose per-chunk VMEM working set fits the budget."""
    bytes_per_t = Bp * (2 * 4 * D + 2 * 4 * Pp + 4 * 2 * G3 + 4 * AW)
    cand = int(max(1, min(T, budget_bytes // max(bytes_per_t, 1))))
    for d in range(cand, 0, -1):
        if T % d == 0:
            return d
    return 1


def synthesis_kernel(
    # inputs
    x_ref, cemb_ref, wx_ref, bih_ref,
    w0f_ref, bhh0_ref, wsw_ref, bsw_ref,
    w1f_ref, bhh1_ref, whd_ref, bhd_ref,
    # outputs
    head_ref, hfin_ref, kappa_out_ref, wlast_ref, phi_ref,
    # scratch
    xp_scr, act_scr, h0_scr, h1_scr, kappa_scr, w0_scr,
):
    Bp, K = kappa_scr.shape
    H = h0_scr.shape[1]
    V = w0_scr.shape[1]
    U = cemb_ref.shape[1]
    G3 = xp_scr.shape[1] // 2        # padded per-layer gate stride (>= 3H, 128-mult)
    G_ow = act_scr.shape[1] - H      # padded [out0|w] stride (>= H+V, 128-mult)
    tb = x_ref.shape[0] // Bp        # timesteps in this chunk

    # ---- carried recurrent state / pad columns: zero-init on grid step 0 ----
    @pl.when(pl.program_id(0) == 0)
    def _init():
        h0_scr[...] = jnp.zeros_like(h0_scr)
        h1_scr[...] = jnp.zeros_like(h1_scr)
        kappa_scr[...] = jnp.zeros_like(kappa_scr)
        w0_scr[...] = jnp.zeros_like(w0_scr)
        act_scr[...] = jnp.zeros_like(act_scr)   # pad cols stay 0 for the head dot

    # ---- hoisted time-parallel x-projection of BOTH layers: one bf16 matmul ----
    xp_scr[...] = jnp.dot(x_ref[...].astype(jnp.bfloat16), wx_ref[...],
                          preferred_element_type=jnp.float32) + bih_ref[...]

    cemb = cemb_ref[...]
    w0f = w0f_ref[...]
    bhh0 = bhh0_ref[...]
    wsw = wsw_ref[...]
    bsw = bsw_ref[...]
    w1f = w1f_ref[...]
    bhh1 = bhh1_ref[...]
    u_idx = lax.broadcasted_iota(jnp.int32, (1, 1, U + 1), 2).astype(jnp.float32)

    def _row(t):
        r = t * Bp
        return r if isinstance(t, int) else pl.multiple_of(r, Bp)

    def gru_update(gi, gh, h_prev):
        r = jax.nn.sigmoid(gi[:, :H] + gh[:, :H])
        z = jax.nn.sigmoid(gi[:, H:2 * H] + gh[:, H:2 * H])
        n = jnp.tanh(gi[:, 2 * H:3 * H] + r * gh[:, 2 * H:3 * H])
        return (1.0 - z) * n + z * h_prev

    def layer0_step(t):
        row = _row(t)
        h_prev = h0_scr[...]
        # ONE fused per-step matmul: [h_prev | w_prev] @ blockdiag(Whh0, Ww0)
        z0 = jnp.concatenate([h_prev, w0_scr[...]], axis=1)
        f0 = jnp.dot(z0, w0f, preferred_element_type=jnp.float32)
        gh = f0[:, :3 * H] + bhh0
        gi = xp_scr[pl.ds(row, Bp), :3 * H] + f0[:, G3:G3 + 3 * H]
        h_new = gru_update(gi, gh, h_prev)

        # Graves soft attention window over the one-hot character sequence.
        sw = jnp.dot(h_new, wsw, preferred_element_type=jnp.float32) + bsw   # (Bp,3K)
        alpha = jnp.exp(sw[:, :K])
        beta = jnp.exp(sw[:, K:2 * K])
        kappa = kappa_scr[...] + jnp.exp(sw[:, 2 * K:3 * K])
        diff = kappa[:, :, None] - u_idx                                     # (Bp,K,U+1)
        phi = jnp.sum(alpha[:, :, None] * jnp.exp(-beta[:, :, None] * diff * diff),
                      axis=1)                                                # (Bp,U+1)
        # Small U/V: VPU multiply+reduce keeps the MXU free for the GRU matmuls.
        w_new = jnp.sum(phi[:, :U, None] * cemb, axis=1)                     # (Bp,V)

        h0_scr[...] = h_new
        kappa_scr[...] = kappa
        w0_scr[...] = w_new
        act_scr[pl.ds(row, Bp), :H + V] = jnp.concatenate([h_new, w_new], axis=1)
        phi_ref[...] = phi      # overwritten each step; final timestep survives

    def layer1_step(t):
        row = _row(t)
        h_prev = h1_scr[...]
        # ONE fused per-step matmul: [h1 | out0 | w] @ blockdiag(Whh1, [Wo1;Ww1])
        z1 = jnp.concatenate([h_prev, act_scr[pl.ds(row, Bp), :H + V]], axis=1)
        f1 = jnp.dot(z1, w1f, preferred_element_type=jnp.float32)
        gh = f1[:, :3 * H] + bhh1
        gi = xp_scr[pl.ds(row, Bp), G3:G3 + 3 * H] + f1[:, G3:G3 + 3 * H]
        h_new = gru_update(gi, gh, h_prev)
        h1_scr[...] = h_new
        act_scr[pl.ds(row, Bp), G_ow:G_ow + H] = h_new

    # ---- interleaved recurrences: layer0(t) + layer1(t-1) per iteration ----
    layer0_step(0)
    if tb <= 8:
        # full unroll for small chunks: gives the scheduler cross-step visibility
        for t in range(1, tb):
            layer0_step(t)
            layer1_step(t - 1)
    else:
        @pl.loop(1, tb)
        def _main(t):
            layer0_step(t)
            layer1_step(t - 1)
    layer1_step(tb - 1)

    # ---- deferred mixture head: one lane-dense bf16 matmul over the chunk ----
    head_ref[...] = (
        jnp.dot(act_scr[...].astype(jnp.bfloat16), whd_ref[...],
                preferred_element_type=jnp.float32) + bhd_ref[...])

    # ---- final recurrent state (cheap; written every chunk, last chunk wins) ----
    hfin_ref[0] = h0_scr[...]
    hfin_ref[1] = h1_scr[...]
    kappa_out_ref[...] = kappa_scr[...]
    wlast_ref[...] = w0_scr[...]


def synthesis_forward(x, c, params, cfg, t_block=None):
    """Pallas equivalent of SynthesisModel.forward(x, c, hidden=None)."""
    B, T, D = x.shape
    H = cfg["hidden_dim"]; V = cfg["vocab_size"]; K = cfg["n_heads"]
    M = cfg["n_components"]; L = cfg["num_layers"]
    assert L == 2, "Pallas kernel is specialized to num_layers == 2"
    U = c.shape[1]
    P = 6 * M + 1
    f32 = jnp.float32
    bf16 = jnp.bfloat16

    # Lane/sublane padding.
    Bp = max(8, _round_up(B, 8))       # sublane-padded batch
    G3 = _round_up(3 * H, 128)         # per-layer gate stride in packed slabs
    G_ow = _round_up(H + V, 128)       # [out0|w] stride in the activation slab
    AW = G_ow + H                      # activation slab width [out0|w|pad|out1]
    Pp = _round_up(P, 128)             # lane-padded head width

    # Generation-aware chunking / VMEM budget.
    try:
        vmem_cap = int(pltpu.get_tpu_info().vmem_capacity_bytes)
    except Exception:
        vmem_cap = 64 << 20
    if t_block is None:
        t_block = _choose_t_block(T, Bp, D, G3, AW, Pp, budget_bytes=vmem_cap // 4)
    assert T % t_block == 0
    n_chunks = T // t_block

    chunk_bytes = t_block * Bp * (2 * 4 * D + 2 * 4 * Pp + 4 * 2 * G3 + 4 * AW)
    vmem_limit = None
    if chunk_bytes > (24 << 20):
        vmem_limit = int(min(vmem_cap * 3 // 4, chunk_bytes + (8 << 20)))

    # Inputs: time-major lane-dense slab, batch padded to Bp.
    x_pad = jnp.zeros((Bp, T, D), f32).at[:B].set(x.astype(f32))
    x2d = jnp.transpose(x_pad, (1, 0, 2)).reshape(T * Bp, D)
    c_pad = jnp.zeros((Bp, U), c.dtype).at[:B].set(c)
    c_emb = jax.nn.one_hot(c_pad, V, dtype=f32)                 # (Bp, U, V)

    # Weights, repacked into fused / lane-padded layouts.
    wih0_t = jnp.asarray(params["w_ih0"], f32).T                # (D+V, 3H)
    wih1_t = jnp.asarray(params["w_ih1"], f32).T                # (D+H+V, 3H)
    whh0_t = jnp.asarray(params["w_hh0"], f32).T                # (H, 3H)
    whh1_t = jnp.asarray(params["w_hh1"], f32).T                # (H, 3H)
    whead_t = jnp.asarray(params["w_head"], f32).T              # (2H, P)

    wx_cat = jnp.zeros((D, 2 * G3), f32)
    wx_cat = wx_cat.at[:, :3 * H].set(wih0_t[:D])
    wx_cat = wx_cat.at[:, G3:G3 + 3 * H].set(wih1_t[:D])
    bih_cat = jnp.zeros((1, 2 * G3), f32)
    bih_cat = bih_cat.at[:, :3 * H].set(jnp.asarray(params["b_ih0"], f32)[None])
    bih_cat = bih_cat.at[:, G3:G3 + 3 * H].set(jnp.asarray(params["b_ih1"], f32)[None])

    w0f = jnp.zeros((H + V, 2 * G3), f32)                       # [h|w0] -> [gh|gi_state]
    w0f = w0f.at[:H, :3 * H].set(whh0_t)
    w0f = w0f.at[H:, G3:G3 + 3 * H].set(wih0_t[D:])
    w1f = jnp.zeros((2 * H + V, 2 * G3), f32)                   # [h1|out0|w] -> [gh|gi_state]
    w1f = w1f.at[:H, :3 * H].set(whh1_t)
    w1f = w1f.at[H:2 * H, G3:G3 + 3 * H].set(wih1_t[D:D + H])
    w1f = w1f.at[2 * H:, G3:G3 + 3 * H].set(wih1_t[D + H:])

    bhh0 = jnp.asarray(params["b_hh0"], f32).reshape(1, -1)
    bhh1 = jnp.asarray(params["b_hh1"], f32).reshape(1, -1)
    wsw_t = jnp.asarray(params["w_sw"], f32).T                  # (H, 3K)
    bsw = jnp.asarray(params["b_sw"], f32).reshape(1, -1)

    whd_full = jnp.zeros((AW, Pp), f32)
    whd_full = whd_full.at[:H, :P].set(whead_t[:H])
    whd_full = whd_full.at[G_ow:G_ow + H, :P].set(whead_t[H:])
    bhd_p = jnp.zeros((1, Pp), f32).at[:, :P].set(jnp.asarray(params["b_head"], f32)[None])

    weights = (wx_cat.astype(bf16), bih_cat, w0f, bhh0, wsw_t, bsw,
               w1f, bhh1, whd_full.astype(bf16), bhd_p)

    def full_spec(a):
        n = a.ndim
        return pl.BlockSpec(tuple(a.shape), lambda t, _n=n: (0,) * _n)

    in_specs = ([pl.BlockSpec((t_block * Bp, D), lambda t: (t, 0)),
                 pl.BlockSpec((Bp, U, V), lambda t: (0, 0, 0))]
                + [full_spec(w) for w in weights])

    out_shape = (
        jax.ShapeDtypeStruct((T * Bp, Pp), f32),   # packed, lane-padded head params
        jax.ShapeDtypeStruct((L, Bp, H), f32),     # final GRU hidden per layer
        jax.ShapeDtypeStruct((Bp, K), f32),        # kappa
        jax.ShapeDtypeStruct((Bp, V), f32),        # last attention window w0
        jax.ShapeDtypeStruct((Bp, U + 1), f32),    # phi_termination
    )
    out_specs = (
        pl.BlockSpec((t_block * Bp, Pp), lambda t: (t, 0)),
        pl.BlockSpec((L, Bp, H), lambda t: (0, 0, 0)),
        pl.BlockSpec((Bp, K), lambda t: (0, 0)),
        pl.BlockSpec((Bp, V), lambda t: (0, 0)),
        pl.BlockSpec((Bp, U + 1), lambda t: (0, 0)),
    )
    scratch_shapes = [
        pltpu.VMEM((t_block * Bp, 2 * G3), f32),   # hoisted x preactivations (both layers)
        pltpu.VMEM((t_block * Bp, AW), f32),       # [out0|w|pad|out1] activation slab
        pltpu.VMEM((Bp, H), f32),                  # carried h, layer 0
        pltpu.VMEM((Bp, H), f32),                  # carried h, layer 1
        pltpu.VMEM((Bp, K), f32),                  # carried kappa
        pltpu.VMEM((Bp, V), f32),                  # carried w0
    ]

    head2d, hfin, kappa, wlast, phi = pl.pallas_call(
        synthesis_kernel,
        out_shape=out_shape,
        grid_spec=pltpu.PrefetchScalarGridSpec(
            num_scalar_prefetch=0,
            grid=(n_chunks,),
            in_specs=in_specs,
            out_specs=out_specs,
            scratch_shapes=scratch_shapes),
        compiler_params=pltpu.CompilerParams(
            dimension_semantics=("arbitrary",),
            vmem_limit_bytes=vmem_limit),
    )(x2d, c_emb, *weights)

    # Slice / activate the packed head slab on the XLA side.
    head = jnp.transpose(head2d.reshape(T, Bp, Pp), (1, 0, 2))[:B, :, :P]    # (B,T,P)
    means = head[..., :2 * M].reshape(B, T, M, 2)
    stdevs = jnp.exp(head[..., 2 * M:4 * M]).reshape(B, T, M, 2)
    log_weights = jax.nn.log_softmax(head[..., 4 * M:5 * M], axis=-1)
    correlations = jnp.tanh(head[..., 5 * M:6 * M])
    last_logit = head[..., 6 * M:6 * M + 1]
    hidden = ([hfin[0][None, :B], hfin[1][None, :B]], kappa[:B], wlast[:B, None, :])
    phi_termination = phi[:B, None, :]
    return means, stdevs, log_weights, correlations, last_logit, hidden, phi_termination


def reference_forward(x, c, p, cfg):
    """Pure-JAX mirror of the PyTorch module semantics (for validation)."""
    B, T, D = x.shape
    H = cfg["hidden_dim"]; V = cfg["vocab_size"]; K = cfg["n_heads"]; M = cfg["n_components"]
    U = c.shape[1]
    f32 = jnp.float32
    c_emb = jax.nn.one_hot(c, V, dtype=f32)

    def gru(x_t, h, w_ih, w_hh, b_ih, b_hh):
        gi = x_t @ w_ih.T + b_ih
        gh = h @ w_hh.T + b_hh
        r = jax.nn.sigmoid(gi[:, :H] + gh[:, :H])
        z = jax.nn.sigmoid(gi[:, H:2 * H] + gh[:, H:2 * H])
        n = jnp.tanh(gi[:, 2 * H:] + r * gh[:, 2 * H:])
        return (1.0 - z) * n + z * h

    h0 = jnp.zeros((B, H), f32); h1 = jnp.zeros((B, H), f32)
    kappa = jnp.zeros((B, K), f32); w0 = jnp.zeros((B, V), f32)
    u_idx = jnp.arange(U + 1, dtype=f32)
    out0s, ws = [], []
    phi = None
    for t in range(T):
        h0 = gru(jnp.concatenate([x[:, t], w0], -1), h0,
                 p["w_ih0"], p["w_hh0"], p["b_ih0"], p["b_hh0"])
        sw = h0 @ p["w_sw"].T + p["b_sw"]
        alpha = jnp.exp(sw[:, :K]); beta = jnp.exp(sw[:, K:2 * K])
        kappa = kappa + jnp.exp(sw[:, 2 * K:])
        diff = kappa[:, :, None] - u_idx[None, None, :]
        phi = jnp.sum(alpha[:, :, None] * jnp.exp(-beta[:, :, None] * diff * diff), axis=1)
        w0 = jnp.sum(phi[:, :U, None] * c_emb, axis=1)
        out0s.append(h0); ws.append(w0)
    out0 = jnp.stack(out0s, 1); w = jnp.stack(ws, 1)
    out1s = []
    for t in range(T):
        h1 = gru(jnp.concatenate([x[:, t], out0[:, t], w[:, t]], -1), h1,
                 p["w_ih1"], p["w_hh1"], p["b_ih1"], p["b_hh1"])
        out1s.append(h1)
    out1 = jnp.stack(out1s, 1)
    feat = jnp.concatenate([out0, out1], -1)
    pr = feat @ p["w_head"].T + p["b_head"]
    means = pr[..., :2 * M].reshape(B, T, M, 2)
    stdevs = jnp.exp(pr[..., 2 * M:4 * M]).reshape(B, T, M, 2)
    logw = jax.nn.log_softmax(pr[..., 4 * M:5 * M], axis=-1)
    corr = jnp.tanh(pr[..., 5 * M:6 * M])
    eos = pr[..., 6 * M:]
    hidden = ([h0[None], h1[None]], kappa, w0[:, None, :])
    return means, stdevs, logw, corr, eos, hidden, phi[:, None, :]


if __name__ == "__main__":
    cfg = dict(vocab_size=8, num_layers=2, hidden_dim=32, n_heads=2,
               input_dim=3, n_components=4)
    B, T, U = 2, 8, 6
    D, H, V, K, M = (cfg["input_dim"], cfg["hidden_dim"], cfg["vocab_size"],
                     cfg["n_heads"], cfg["n_components"])
    P = 6 * M + 1

    key = jax.random.PRNGKey(0)
    keys = jax.random.split(key, 14)

    def init(k, shape):
        return 0.1 * jax.random.normal(k, shape, dtype=jnp.float32)

    params = {
        "w_ih0": init(keys[0], (3 * H, D + V)),
        "w_hh0": init(keys[1], (3 * H, H)),
        "b_ih0": init(keys[2], (3 * H,)),
        "b_hh0": init(keys[3], (3 * H,)),
        "w_sw": init(keys[4], (3 * K, H)),
        "b_sw": init(keys[5], (3 * K,)),
        "w_ih1": init(keys[6], (3 * H, D + H + V)),
        "w_hh1": init(keys[7], (3 * H, H)),
        "b_ih1": init(keys[8], (3 * H,)),
        "b_hh1": init(keys[9], (3 * H,)),
        "w_head": init(keys[10], (P, 2 * H)),
        "b_head": init(keys[11], (P,)),
    }
    x = jax.random.normal(keys[12], (B, T, D), dtype=jnp.float32)
    c = jax.random.randint(keys[13], (B, U), 0, V)

    # t_block=4 -> two grid chunks, exercising the carried-state pipeline.
    outs = synthesis_forward(x, c, params, cfg, t_block=4)
    outs = jax.block_until_ready(outs)

    ref = reference_forward(x, c, params, cfg)
    (means, stdevs, logw, corr, eos, hidden, phi) = outs
    (r_means, r_stdevs, r_logw, r_corr, r_eos, r_hidden, r_phi) = ref

    tol = dict(rtol=5e-2, atol=5e-2)   # bf16 MXU operands vs pure-f32 reference
    np.testing.assert_allclose(np.asarray(means), np.asarray(r_means), **tol)
    np.testing.assert_allclose(np.asarray(stdevs), np.asarray(r_stdevs), **tol)
    np.testing.assert_allclose(np.asarray(logw), np.asarray(r_logw), **tol)
    np.testing.assert_allclose(np.asarray(corr), np.asarray(r_corr), **tol)
    np.testing.assert_allclose(np.asarray(eos), np.asarray(r_eos), **tol)
    np.testing.assert_allclose(np.asarray(phi), np.asarray(r_phi), **tol)
    np.testing.assert_allclose(np.asarray(hidden[0][0]), np.asarray(r_hidden[0][0]), **tol)
    np.testing.assert_allclose(np.asarray(hidden[0][1]), np.asarray(r_hidden[0][1]), **tol)
    np.testing.assert_allclose(np.asarray(hidden[1]), np.asarray(r_hidden[1]), **tol)
    np.testing.assert_allclose(np.asarray(hidden[2]), np.asarray(r_hidden[2]), **tol)

    print("KERNEL_OK")
</pallas_src>

<mosaic_0001>
module attributes {stable_mosaic.version = 11 : i64} {
  func.func @synthesis_kernel(%arg0: i32, %arg1: memref<32x3xf32, #tpu.memory_space<vmem>>, %arg2: memref<8x6x8xf32, #tpu.memory_space<vmem>>, %arg3: memref<3x256xbf16, #tpu.memory_space<vmem>>, %arg4: memref<1x256xf32, #tpu.memory_space<vmem>>, %arg5: memref<40x256xf32, #tpu.memory_space<vmem>>, %arg6: memref<1x96xf32, #tpu.memory_space<vmem>>, %arg7: memref<32x6xf32, #tpu.memory_space<vmem>>, %arg8: memref<1x6xf32, #tpu.memory_space<vmem>>, %arg9: memref<72x256xf32, #tpu.memory_space<vmem>>, %arg10: memref<1x96xf32, #tpu.memory_space<vmem>>, %arg11: memref<160x128xbf16, #tpu.memory_space<vmem>>, %arg12: memref<1x128xf32, #tpu.memory_space<vmem>>, %arg13: memref<32x128xf32, #tpu.memory_space<vmem>>, %arg14: memref<2x8x32xf32, #tpu.memory_space<vmem>>, %arg15: memref<8x2xf32, #tpu.memory_space<vmem>>, %arg16: memref<8x8xf32, #tpu.memory_space<vmem>>, %arg17: memref<8x7xf32, #tpu.memory_space<vmem>>, %arg18: memref<32x256xf32, #tpu.memory_space<vmem>>, %arg19: memref<32x160xf32, #tpu.memory_space<vmem>>, %arg20: memref<8x32xf32, #tpu.memory_space<vmem>>, %arg21: memref<8x32xf32, #tpu.memory_space<vmem>>, %arg22: memref<8x2xf32, #tpu.memory_space<vmem>>, %arg23: memref<8x8xf32, #tpu.memory_space<vmem>>) attributes {dimension_semantics = [#tpu.dimension_semantics<arbitrary>], iteration_bounds = array<i64: 2>, scalar_prefetch = 0 : i64, scratch_operands = 6 : i64, tpu.core_type = #tpu.core_type<tc>, window_params = [{transform_indices = @transform_0, window_bounds = array<i64: 32, 3>}, {pipeline_mode = #tpu.pipeline_mode<synchronous>, transform_indices = @transform_1, window_bounds = array<i64: 8, 6, 8>}, {pipeline_mode = #tpu.pipeline_mode<synchronous>, transform_indices = @transform_2, window_bounds = array<i64: 3, 256>}, {pipeline_mode = #tpu.pipeline_mode<synchronous>, transform_indices = @transform_3, window_bounds = array<i64: 1, 256>}, {pipeline_mode = #tpu.pipeline_mode<synchronous>, transform_indices = @transform_4, window_bounds = array<i64: 40, 256>}, {pipeline_mode = #tpu.pipeline_mode<synchronous>, transform_indices = @transform_5, window_bounds = array<i64: 1, 96>}, {pipeline_mode = #tpu.pipeline_mode<synchronous>, transform_indices = @transform_6, window_bounds = array<i64: 32, 6>}, {pipeline_mode = #tpu.pipeline_mode<synchronous>, transform_indices = @transform_7, window_bounds = array<i64: 1, 6>}, {pipeline_mode = #tpu.pipeline_mode<synchronous>, transform_indices = @transform_8, window_bounds = array<i64: 72, 256>}, {pipeline_mode = #tpu.pipeline_mode<synchronous>, transform_indices = @transform_9, window_bounds = array<i64: 1, 96>}, {pipeline_mode = #tpu.pipeline_mode<synchronous>, transform_indices = @transform_10, window_bounds = array<i64: 160, 128>}, {pipeline_mode = #tpu.pipeline_mode<synchronous>, transform_indices = @transform_11, window_bounds = array<i64: 1, 128>}, {transform_indices = @transform_12, window_bounds = array<i64: 32, 128>}, {pipeline_mode = #tpu.pipeline_mode<synchronous>, transform_indices = @transform_13, window_bounds = array<i64: 2, 8, 32>}, {pipeline_mode = #tpu.pipeline_mode<synchronous>, transform_indices = @transform_14, window_bounds = array<i64: 8, 2>}, {pipeline_mode = #tpu.pipeline_mode<synchronous>, transform_indices = @transform_15, window_bounds = array<i64: 8, 8>}, {pipeline_mode = #tpu.pipeline_mode<synchronous>, transform_indices = @transform_16, window_bounds = array<i64: 8, 7>}]} {
    %c0_i32 = arith.constant 0 : i32
    %0 = arith.cmpi eq, %arg0, %c0_i32 : i32
    %1 = arith.extui %0 : i1 to i32
    %c0_i32_0 = arith.constant 0 : i32
    %2 = arith.cmpi ne, %1, %c0_i32_0 : i32
    scf.if %2 {
      %cst_205 = arith.constant 0.000000e+00 : f32
      %484 = vector.broadcast %cst_205 : f32 to vector<8x32xf32>
      %c0_206 = arith.constant 0 : index
      %c0_207 = arith.constant 0 : index
      %485 = vector.load %arg20[%c0_206, %c0_207] : memref<8x32xf32, #tpu.memory_space<vmem>>, vector<8x32xf32>
      tpu.vector_store %arg20[%c0_206, %c0_207], %484 {strides = array<i32>} : memref<8x32xf32, #tpu.memory_space<vmem>>, vector<8x32xf32>,
      %cst_208 = arith.constant 0.000000e+00 : f32
      %486 = vector.broadcast %cst_208 : f32 to vector<8x32xf32>
      %c0_209 = arith.constant 0 : index
      %c0_210 = arith.constant 0 : index
      %487 = vector.load %arg21[%c0_209, %c0_210] : memref<8x32xf32, #tpu.memory_space<vmem>>, vector<8x32xf32>
      tpu.vector_store %arg21[%c0_209, %c0_210], %486 {strides = array<i32>} : memref<8x32xf32, #tpu.memory_space<vmem>>, vector<8x32xf32>,
      %cst_211 = arith.constant 0.000000e+00 : f32
      %488 = vector.broadcast %cst_211 : f32 to vector<8x2xf32>
      %c0_212 = arith.constant 0 : index
      %c0_213 = arith.constant 0 : index
      %489 = vector.load %arg22[%c0_212, %c0_213] : memref<8x2xf32, #tpu.memory_space<vmem>>, vector<8x2xf32>
      tpu.vector_store %arg22[%c0_212, %c0_213], %488 {strides = array<i32>} : memref<8x2xf32, #tpu.memory_space<vmem>>, vector<8x2xf32>,
      %cst_214 = arith.constant 0.000000e+00 : f32
      %490 = vector.broadcast %cst_214 : f32 to vector<8x8xf32>
      %c0_215 = arith.constant 0 : index
      %c0_216 = arith.constant 0 : index
      %491 = vector.load %arg23[%c0_215, %c0_216] : memref<8x8xf32, #tpu.memory_space<vmem>>, vector<8x8xf32>
      tpu.vector_store %arg23[%c0_215, %c0_216], %490 {strides = array<i32>} : memref<8x8xf32, #tpu.memory_space<vmem>>, vector<8x8xf32>,
      %cst_217 = arith.constant 0.000000e+00 : f32
      %492 = vector.broadcast %cst_217 : f32 to vector<32x160xf32>
      %c0_218 = arith.constant 0 : index
      %c0_219 = arith.constant 0 : index
      %493 = vector.load %arg19[%c0_218, %c0_219] : memref<32x160xf32, #tpu.memory_space<vmem>>, vector<32x160xf32>
      tpu.vector_store %arg19[%c0_218, %c0_219], %492 {strides = array<i32>} : memref<32x160xf32, #tpu.memory_space<vmem>>, vector<32x160xf32>,
    } else {
    }
    %c0 = arith.constant 0 : index
    %c0_1 = arith.constant 0 : index
    %3 = vector.load %arg1[%c0, %c0_1] : memref<32x3xf32, #tpu.memory_space<vmem>>, vector<32x3xf32>
    %4 = arith.truncf %3 : vector<32x3xf32> to vector<32x3xbf16>
    %c0_2 = arith.constant 0 : index
    %c0_3 = arith.constant 0 : index
    %5 = vector.load %arg3[%c0_2, %c0_3] : memref<3x256xbf16, #tpu.memory_space<vmem>>, vector<3x256xbf16>
    %cst = arith.constant dense<0.000000e+00> : vector<32x256xf32>
    %6 = tpu.matmul %4, %5, %cst {dimension_numbers = #tpu.dot_dimension_numbers<[1], [0], [0], [1], [0, 0, 1, 1], [], []>} : vector<32x3xbf16>, vector<3x256xbf16>, vector<32x256xf32> -> vector<32x256xf32>
    %c0_4 = arith.constant 0 : index
    %c0_5 = arith.constant 0 : index
    %7 = vector.load %arg4[%c0_4, %c0_5] : memref<1x256xf32, #tpu.memory_space<vmem>>, vector<1x256xf32>
    %8 = vector.broadcast %7 : vector<1x256xf32> to vector<32x256xf32>
    %9 = arith.addf %6, %8 : vector<32x256xf32>
    %c0_6 = arith.constant 0 : index
    %c0_7 = arith.constant 0 : index
    %10 = vector.load %arg18[%c0_6, %c0_7] : memref<32x256xf32, #tpu.memory_space<vmem>>, vector<32x256xf32>
    tpu.vector_store %arg18[%c0_6, %c0_7], %9 {strides = array<i32>} : memref<32x256xf32, #tpu.memory_space<vmem>>, vector<32x256xf32>,
    %c0_8 = arith.constant 0 : index
    %c0_9 = arith.constant 0 : index
    %c0_10 = arith.constant 0 : index
    %11 = vector.load %arg2[%c0_8, %c0_9, %c0_10] : memref<8x6x8xf32, #tpu.memory_space<vmem>>, vector<8x6x8xf32>
    %c0_11 = arith.constant 0 : index
    %c0_12 = arith.constant 0 : index
    %12 = vector.load %arg5[%c0_11, %c0_12] : memref<40x256xf32, #tpu.memory_space<vmem>>, vector<40x256xf32>
    %c0_13 = arith.constant 0 : index
    %c0_14 = arith.constant 0 : index
    %13 = vector.load %arg6[%c0_13, %c0_14] : memref<1x96xf32, #tpu.memory_space<vmem>>, vector<1x96xf32>
    %c0_15 = arith.constant 0 : index
    %c0_16 = arith.constant 0 : index
    %14 = vector.load %arg7[%c0_15, %c0_16] : memref<32x6xf32, #tpu.memory_space<vmem>>, vector<32x6xf32>
    %c0_17 = arith.constant 0 : index
    %c0_18 = arith.constant 0 : index
    %15 = vector.load %arg8[%c0_17, %c0_18] : memref<1x6xf32, #tpu.memory_space<vmem>>, vector<1x6xf32>
    %c0_19 = arith.constant 0 : index
    %c0_20 = arith.constant 0 : index
    %16 = vector.load %arg9[%c0_19, %c0_20] : memref<72x256xf32, #tpu.memory_space<vmem>>, vector<72x256xf32>
    %c0_21 = arith.constant 0 : index
    %c0_22 = arith.constant 0 : index
    %17 = vector.load %arg10[%c0_21, %c0_22] : memref<1x96xf32, #tpu.memory_space<vmem>>, vector<1x96xf32>
    %18 = tpu.iota {dimensions = array<i32: 2>} : vector<1x1x7xi32>
    %19 = arith.sitofp %18 : vector<1x1x7xi32> to vector<1x1x7xf32>
    %c0_23 = arith.constant 0 : index
    %c0_24 = arith.constant 0 : index
    %20 = vector.load %arg20[%c0_23, %c0_24] : memref<8x32xf32, #tpu.memory_space<vmem>>, vector<8x32xf32>
    %c0_25 = arith.constant 0 : index
    %c0_26 = arith.constant 0 : index
    %21 = vector.load %arg23[%c0_25, %c0_26] : memref<8x8xf32, #tpu.memory_space<vmem>>, vector<8x8xf32>
    %22 = tpu.concatenate %20, %21 in 1 : vector<8x32xf32>, vector<8x8xf32> -> vector<8x40xf32>
    %cst_27 = arith.constant dense<0.000000e+00> : vector<8x256xf32>
    %23 = tpu.matmul %22, %12, %cst_27 {dimension_numbers = #tpu.dot_dimension_numbers<[1], [0], [0], [1], [0, 0, 1, 1], [], []>} : vector<8x40xf32>, vector<40x256xf32>, vector<8x256xf32> -> vector<8x256xf32>
    %24 = vector.extract_strided_slice %23 {offsets = [0, 0], sizes = [8, 96], strides = [1, 1]} : vector<8x256xf32> to vector<8x96xf32>
    %25 = vector.broadcast %13 : vector<1x96xf32> to vector<8x96xf32>
    %26 = arith.addf %24, %25 : vector<8x96xf32>
    %c0_28 = arith.constant 0 : index
    %c0_29 = arith.constant 0 : index
    %27 = vector.load %arg18[%c0_28, %c0_29] : memref<32x256xf32, #tpu.memory_space<vmem>>, vector<8x96xf32>
    %28 = vector.extract_strided_slice %23 {offsets = [0, 128], sizes = [8, 96], strides = [1, 1]} : vector<8x256xf32> to vector<8x96xf32>
    %29 = arith.addf %27, %28 : vector<8x96xf32>
    %30 = vector.extract_strided_slice %29 {offsets = [0, 0], sizes = [8, 32], strides = [1, 1]} : vector<8x96xf32> to vector<8x32xf32>
    %31 = vector.extract_strided_slice %26 {offsets = [0, 0], sizes = [8, 32], strides = [1, 1]} : vector<8x96xf32> to vector<8x32xf32>
    %32 = arith.addf %30, %31 : vector<8x32xf32>
    %33 = arith.negf %32 : vector<8x32xf32>
    %34 = math.exp %33 : vector<8x32xf32>
    %cst_30 = arith.constant 1.000000e+00 : f32
    %35 = vector.broadcast %cst_30 : f32 to vector<8x32xf32>
    %36 = arith.addf %35, %34 : vector<8x32xf32>
    %37 = arith.divf %35, %36 : vector<8x32xf32>
    %38 = vector.extract_strided_slice %29 {offsets = [0, 32], sizes = [8, 32], strides = [1, 1]} : vector<8x96xf32> to vector<8x32xf32>
    %39 = vector.extract_strided_slice %26 {offsets = [0, 32], sizes = [8, 32], strides = [1, 1]} : vector<8x96xf32> to vector<8x32xf32>
    %40 = arith.addf %38, %39 : vector<8x32xf32>
    %41 = arith.negf %40 : vector<8x32xf32>
    %42 = math.exp %41 : vector<8x32xf32>
    %cst_31 = arith.constant 1.000000e+00 : f32
    %43 = vector.broadcast %cst_31 : f32 to vector<8x32xf32>
    %44 = arith.addf %43, %42 : vector<8x32xf32>
    %45 = arith.divf %43, %44 : vector<8x32xf32>
    %46 = vector.extract_strided_slice %29 {offsets = [0, 64], sizes = [8, 32], strides = [1, 1]} : vector<8x96xf32> to vector<8x32xf32>
    %47 = vector.extract_strided_slice %26 {offsets = [0, 64], sizes = [8, 32], strides = [1, 1]} : vector<8x96xf32> to vector<8x32xf32>
    %48 = arith.mulf %37, %47 : vector<8x32xf32>
    %49 = arith.addf %46, %48 : vector<8x32xf32>
    %50 = math.tanh %49 : vector<8x32xf32>
    %cst_32 = arith.constant 1.000000e+00 : f32
    %51 = vector.broadcast %cst_32 : f32 to vector<8x32xf32>
    %52 = arith.subf %51, %45 : vector<8x32xf32>
    %53 = arith.mulf %52, %50 : vector<8x32xf32>
    %54 = arith.mulf %45, %20 : vector<8x32xf32>
    %55 = arith.addf %53, %54 : vector<8x32xf32>
    %cst_33 = arith.constant dense<0.000000e+00> : vector<8x6xf32>
    %56 = tpu.matmul %55, %14, %cst_33 {dimension_numbers = #tpu.dot_dimension_numbers<[1], [0], [0], [1], [0, 0, 1, 1], [], []>} : vector<8x32xf32>, vector<32x6xf32>, vector<8x6xf32> -> vector<8x6xf32>
    %57 = vector.broadcast %15 : vector<1x6xf32> to vector<8x6xf32>
    %58 = arith.addf %56, %57 : vector<8x6xf32>
    %59 = vector.extract_strided_slice %58 {offsets = [0, 0], sizes = [8, 2], strides = [1, 1]} : vector<8x6xf32> to vector<8x2xf32>
    %60 = math.exp %59 : vector<8x2xf32>
    %61 = vector.extract_strided_slice %58 {offsets = [0, 2], sizes = [8, 2], strides = [1, 1]} : vector<8x6xf32> to vector<8x2xf32>
    %62 = math.exp %61 : vector<8x2xf32>
    %c0_34 = arith.constant 0 : index
    %c0_35 = arith.constant 0 : index
    %63 = vector.load %arg22[%c0_34, %c0_35] : memref<8x2xf32, #tpu.memory_space<vmem>>, vector<8x2xf32>
    %64 = vector.extract_strided_slice %58 {offsets = [0, 4], sizes = [8, 2], strides = [1, 1]} : vector<8x6xf32> to vector<8x2xf32>
    %65 = math.exp %64 : vector<8x2xf32>
    %66 = arith.addf %63, %65 : vector<8x2xf32>
    %67 = vector.shape_cast %66 : vector<8x2xf32> to vector<8x2x1xf32>
    %68 = vector.broadcast %67 : vector<8x2x1xf32> to vector<8x2x7xf32>
    %69 = vector.broadcast %19 : vector<1x1x7xf32> to vector<8x2x7xf32>
    %70 = arith.subf %68, %69 : vector<8x2x7xf32>
    %71 = vector.shape_cast %60 : vector<8x2xf32> to vector<8x2x1xf32>
    %72 = vector.shape_cast %62 : vector<8x2xf32> to vector<8x2x1xf32>
    %cst_36 = arith.constant 0.000000e+00 : f32
    %73 = vector.broadcast %cst_36 : f32 to vector<8x2x1xf32>
    %74 = arith.subf %73, %72 : vector<8x2x1xf32>
    %75 = vector.broadcast %74 : vector<8x2x1xf32> to vector<8x2x7xf32>
    %76 = arith.mulf %75, %70 : vector<8x2x7xf32>
    %77 = arith.mulf %76, %70 : vector<8x2x7xf32>
    %78 = math.exp %77 : vector<8x2x7xf32>
    %79 = vector.broadcast %71 : vector<8x2x1xf32> to vector<8x2x7xf32>
    %80 = arith.mulf %79, %78 : vector<8x2x7xf32>
    %cst_37 = arith.constant dense<0.000000e+00> : vector<8x7xf32>
    %81 = vector.multi_reduction <add>, %80, %cst_37 [1] : vector<8x2x7xf32> to vector<8x7xf32>
    %82 = vector.extract_strided_slice %81 {offsets = [0, 0], sizes = [8, 6], strides = [1, 1]} : vector<8x7xf32> to vector<8x6xf32>
    %83 = vector.shape_cast %82 : vector<8x6xf32> to vector<8x6x1xf32>
    %84 = vector.broadcast %83 : vector<8x6x1xf32> to vector<8x6x8xf32>
    %85 = arith.mulf %84, %11 : vector<8x6x8xf32>
    %cst_38 = arith.constant dense<0.000000e+00> : vector<8x8xf32>
    %86 = vector.multi_reduction <add>, %85, %cst_38 [1] : vector<8x6x8xf32> to vector<8x8xf32>
    %c0_39 = arith.constant 0 : index
    %c0_40 = arith.constant 0 : index
    %87 = vector.load %arg20[%c0_39, %c0_40] : memref<8x32xf32, #tpu.memory_space<vmem>>, vector<8x32xf32>
    tpu.vector_store %arg20[%c0_39, %c0_40], %55 {strides = array<i32>} : memref<8x32xf32, #tpu.memory_space<vmem>>, vector<8x32xf32>,
    %c0_41 = arith.constant 0 : index
    %c0_42 = arith.constant 0 : index
    %88 = vector.load %arg22[%c0_41, %c0_42] : memref<8x2xf32, #tpu.memory_space<vmem>>, vector<8x2xf32>
    tpu.vector_store %arg22[%c0_41, %c0_42], %66 {strides = array<i32>} : memref<8x2xf32, #tpu.memory_space<vmem>>, vector<8x2xf32>,
    %c0_43 = arith.constant 0 : index
    %c0_44 = arith.constant 0 : index
    %89 = vector.load %arg23[%c0_43, %c0_44] : memref<8x8xf32, #tpu.memory_space<vmem>>, vector<8x8xf32>
    tpu.vector_store %arg23[%c0_43, %c0_44], %86 {strides = array<i32>} : memref<8x8xf32, #tpu.memory_space<vmem>>, vector<8x8xf32>,
    %90 = tpu.concatenate %55, %86 in 1 : vector<8x32xf32>, vector<8x8xf32> -> vector<8x40xf32>
    %c0_45 = arith.constant 0 : index
    %c0_46 = arith.constant 0 : index
    %91 = vector.load %arg19[%c0_45, %c0_46] : memref<32x160xf32, #tpu.memory_space<vmem>>, vector<8x40xf32>
    tpu.vector_store %arg19[%c0_45, %c0_46], %90 {strides = array<i32>} : memref<32x160xf32, #tpu.memory_space<vmem>>, vector<8x40xf32>,
    %c0_47 = arith.constant 0 : index
    %c0_48 = arith.constant 0 : index
    %92 = vector.load %arg17[%c0_47, %c0_48] : memref<8x7xf32, #tpu.memory_space<vmem>>, vector<8x7xf32>
    tpu.vector_store %arg17[%c0_47, %c0_48], %81 {strides = array<i32>} : memref<8x7xf32, #tpu.memory_space<vmem>>, vector<8x7xf32>,
    %c0_49 = arith.constant 0 : index
    %c0_50 = arith.constant 0 : index
    %93 = vector.load %arg20[%c0_49, %c0_50] : memref<8x32xf32, #tpu.memory_space<vmem>>, vector<8x32xf32>
    %c0_51 = arith.constant 0 : index
    %c0_52 = arith.constant 0 : index
    %94 = vector.load %arg23[%c0_51, %c0_52] : memref<8x8xf32, #tpu.memory_space<vmem>>, vector<8x8xf32>
    %95 = tpu.concatenate %93, %94 in 1 : vector<8x32xf32>, vector<8x8xf32> -> vector<8x40xf32>
    %cst_53 = arith.constant dense<0.000000e+00> : vector<8x256xf32>
    %96 = tpu.matmul %95, %12, %cst_53 {dimension_numbers = #tpu.dot_dimension_numbers<[1], [0], [0], [1], [0, 0, 1, 1], [], []>} : vector<8x40xf32>, vector<40x256xf32>, vector<8x256xf32> -> vector<8x256xf32>
    %97 = vector.extract_strided_slice %96 {offsets = [0, 0], sizes = [8, 96], strides = [1, 1]} : vector<8x256xf32> to vector<8x96xf32>
    %98 = vector.broadcast %13 : vector<1x96xf32> to vector<8x96xf32>
    %99 = arith.addf %97, %98 : vector<8x96xf32>
    %c8 = arith.constant 8 : index
    %c0_54 = arith.constant 0 : index
    %100 = vector.load %arg18[%c8, %c0_54] : memref<32x256xf32, #tpu.memory_space<vmem>>, vector<8x96xf32>
    %101 = vector.extract_strided_slice %96 {offsets = [0, 128], sizes = [8, 96], strides = [1, 1]} : vector<8x256xf32> to vector<8x96xf32>
    %102 = arith.addf %100, %101 : vector<8x96xf32>
    %103 = vector.extract_strided_slice %102 {offsets = [0, 0], sizes = [8, 32], strides = [1, 1]} : vector<8x96xf32> to vector<8x32xf32>
    %104 = vector.extract_strided_slice %99 {offsets = [0, 0], sizes = [8, 32], strides = [1, 1]} : vector<8x96xf32> to vector<8x32xf32>
    %105 = arith.addf %103, %104 : vector<8x32xf32>
    %106 = arith.negf %105 : vector<8x32xf32>
    %107 = math.exp %106 : vector<8x32xf32>
    %cst_55 = arith.constant 1.000000e+00 : f32
    %108 = vector.broadcast %cst_55 : f32 to vector<8x32xf32>
    %109 = arith.addf %108, %107 : vector<8x32xf32>
    %110 = arith.divf %108, %109 : vector<8x32xf32>
    %111 = vector.extract_strided_slice %102 {offsets = [0, 32], sizes = [8, 32], strides = [1, 1]} : vector<8x96xf32> to vector<8x32xf32>
    %112 = vector.extract_strided_slice %99 {offsets = [0, 32], sizes = [8, 32], strides = [1, 1]} : vector<8x96xf32> to vector<8x32xf32>
    %113 = arith.addf %111, %112 : vector<8x32xf32>
    %114 = arith.negf %113 : vector<8x32xf32>
    %115 = math.exp %114 : vector<8x32xf32>
    %cst_56 = arith.constant 1.000000e+00 : f32
    %116 = vector.broadcast %cst_56 : f32 to vector<8x32xf32>
    %117 = arith.addf %116, %115 : vector<8x32xf32>
    %118 = arith.divf %116, %117 : vector<8x32xf32>
    %119 = vector.extract_strided_slice %102 {offsets = [0, 64], sizes = [8, 32], strides = [1, 1]} : vector<8x96xf32> to vector<8x32xf32>
    %120 = vector.extract_strided_slice %99 {offsets = [0, 64], sizes = [8, 32], strides = [1, 1]} : vector<8x96xf32> to vector<8x32xf32>
    %121 = arith.mulf %110, %120 : vector<8x32xf32>
    %122 = arith.addf %119, %121 : vector<8x32xf32>
    %123 = math.tanh %122 : vector<8x32xf32>
    %cst_57 = arith.constant 1.000000e+00 : f32
    %124 = vector.broadcast %cst_57 : f32 to vector<8x32xf32>
    %125 = arith.subf %124, %118 : vector<8x32xf32>
    %126 = arith.mulf %125, %123 : vector<8x32xf32>
    %127 = arith.mulf %118, %93 : vector<8x32xf32>
    %128 = arith.addf %126, %127 : vector<8x32xf32>
    %cst_58 = arith.constant dense<0.000000e+00> : vector<8x6xf32>
    %129 = tpu.matmul %128, %14, %cst_58 {dimension_numbers = #tpu.dot_dimension_numbers<[1], [0], [0], [1], [0, 0, 1, 1], [], []>} : vector<8x32xf32>, vector<32x6xf32>, vector<8x6xf32> -> vector<8x6xf32>
    %130 = vector.broadcast %15 : vector<1x6xf32> to vector<8x6xf32>
    %131 = arith.addf %129, %130 : vector<8x6xf32>
    %132 = vector.extract_strided_slice %131 {offsets = [0, 0], sizes = [8, 2], strides = [1, 1]} : vector<8x6xf32> to vector<8x2xf32>
    %133 = math.exp %132 : vector<8x2xf32>
    %134 = vector.extract_strided_slice %131 {offsets = [0, 2], sizes = [8, 2], strides = [1, 1]} : vector<8x6xf32> to vector<8x2xf32>
    %135 = math.exp %134 : vector<8x2xf32>
    %c0_59 = arith.constant 0 : index
    %c0_60 = arith.constant 0 : index
    %136 = vector.load %arg22[%c0_59, %c0_60] : memref<8x2xf32, #tpu.memory_space<vmem>>, vector<8x2xf32>
    %137 = vector.extract_strided_slice %131 {offsets = [0, 4], sizes = [8, 2], strides = [1, 1]} : vector<8x6xf32> to vector<8x2xf32>
    %138 = math.exp %137 : vector<8x2xf32>
    %139 = arith.addf %136, %138 : vector<8x2xf32>
    %140 = vector.shape_cast %139 : vector<8x2xf32> to vector<8x2x1xf32>
    %141 = vector.broadcast %140 : vector<8x2x1xf32> to vector<8x2x7xf32>
    %142 = vector.broadcast %19 : vector<1x1x7xf32> to vector<8x2x7xf32>
    %143 = arith.subf %141, %142 : vector<8x2x7xf32>
    %144 = vector.shape_cast %133 : vector<8x2xf32> to vector<8x2x1xf32>
    %145 = vector.shape_cast %135 : vector<8x2xf32> to vector<8x2x1xf32>
    %cst_61 = arith.constant 0.000000e+00 : f32
    %146 = vector.broadcast %cst_61 : f32 to vector<8x2x1xf32>
    %147 = arith.subf %146, %145 : vector<8x2x1xf32>
    %148 = vector.broadcast %147 : vector<8x2x1xf32> to vector<8x2x7xf32>
    %149 = arith.mulf %148, %143 : vector<8x2x7xf32>
    %150 = arith.mulf %149, %143 : vector<8x2x7xf32>
    %151 = math.exp %150 : vector<8x2x7xf32>
    %152 = vector.broadcast %144 : vector<8x2x1xf32> to vector<8x2x7xf32>
    %153 = arith.mulf %152, %151 : vector<8x2x7xf32>
    %cst_62 = arith.constant dense<0.000000e+00> : vector<8x7xf32>
    %154 = vector.multi_reduction <add>, %153, %cst_62 [1] : vector<8x2x7xf32> to vector<8x7xf32>
    %155 = vector.extract_strided_slice %154 {offsets = [0, 0], sizes = [8, 6], strides = [1, 1]} : vector<8x7xf32> to vector<8x6xf32>
    %156 = vector.shape_cast %155 : vector<8x6xf32> to vector<8x6x1xf32>
    %157 = vector.broadcast %156 : vector<8x6x1xf32> to vector<8x6x8xf32>
    %158 = arith.mulf %157, %11 : vector<8x6x8xf32>
    %cst_63 = arith.constant dense<0.000000e+00> : vector<8x8xf32>
    %159 = vector.multi_reduction <add>, %158, %cst_63 [1] : vector<8x6x8xf32> to vector<8x8xf32>
    %c0_64 = arith.constant 0 : index
    %c0_65 = arith.constant 0 : index
    %160 = vector.load %arg20[%c0_64, %c0_65] : memref<8x32xf32, #tpu.memory_space<vmem>>, vector<8x32xf32>
    tpu.vector_store %arg20[%c0_64, %c0_65], %128 {strides = array<i32>} : memref<8x32xf32, #tpu.memory_space<vmem>>, vector<8x32xf32>,
    %c0_66 = arith.constant 0 : index
    %c0_67 = arith.constant 0 : index
    %161 = vector.load %arg22[%c0_66, %c0_67] : memref<8x2xf32, #tpu.memory_space<vmem>>, vector<8x2xf32>
    tpu.vector_store %arg22[%c0_66, %c0_67], %139 {strides = array<i32>} : memref<8x2xf32, #tpu.memory_space<vmem>>, vector<8x2xf32>,
    %c0_68 = arith.constant 0 : index
    %c0_69 = arith.constant 0 : index
    %162 = vector.load %arg23[%c0_68, %c0_69] : memref<8x8xf32, #tpu.memory_space<vmem>>, vector<8x8xf32>
    tpu.vector_store %arg23[%c0_68, %c0_69], %159 {strides = array<i32>} : memref<8x8xf32, #tpu.memory_space<vmem>>, vector<8x8xf32>,
    %163 = tpu.concatenate %128, %159 in 1 : vector<8x32xf32>, vector<8x8xf32> -> vector<8x40xf32>
    %c8_70 = arith.constant 8 : index
    %c0_71 = arith.constant 0 : index
    %164 = vector.load %arg19[%c8_70, %c0_71] : memref<32x160xf32, #tpu.memory_space<vmem>>, vector<8x40xf32>
    tpu.vector_store %arg19[%c8_70, %c0_71], %163 {strides = array<i32>} : memref<32x160xf32, #tpu.memory_space<vmem>>, vector<8x40xf32>,
    %c0_72 = arith.constant 0 : index
    %c0_73 = arith.constant 0 : index
    %165 = vector.load %arg17[%c0_72, %c0_73] : memref<8x7xf32, #tpu.memory_space<vmem>>, vector<8x7xf32>
    tpu.vector_store %arg17[%c0_72, %c0_73], %154 {strides = array<i32>} : memref<8x7xf32, #tpu.memory_space<vmem>>, vector<8x7xf32>,
    %c0_74 = arith.constant 0 : index
    %c0_75 = arith.constant 0 : index
    %166 = vector.load %arg21[%c0_74, %c0_75] : memref<8x32xf32, #tpu.memory_space<vmem>>, vector<8x32xf32>
    %c0_76 = arith.constant 0 : index
    %c0_77 = arith.constant 0 : index
    %167 = vector.load %arg19[%c0_76, %c0_77] : memref<32x160xf32, #tpu.memory_space<vmem>>, vector<8x40xf32>
    %168 = tpu.concatenate %166, %167 in 1 : vector<8x32xf32>, vector<8x40xf32> -> vector<8x72xf32>
    %cst_78 = arith.constant dense<0.000000e+00> : vector<8x256xf32>
    %169 = tpu.matmul %168, %16, %cst_78 {dimension_numbers = #tpu.dot_dimension_numbers<[1], [0], [0], [1], [0, 0, 1, 1], [], []>} : vector<8x72xf32>, vector<72x256xf32>, vector<8x256xf32> -> vector<8x256xf32>
    %170 = vector.extract_strided_slice %169 {offsets = [0, 0], sizes = [8, 96], strides = [1, 1]} : vector<8x256xf32> to vector<8x96xf32>
    %171 = vector.broadcast %17 : vector<1x96xf32> to vector<8x96xf32>
    %172 = arith.addf %170, %171 : vector<8x96xf32>
    %c0_79 = arith.constant 0 : index
    %c128 = arith.constant 128 : index
    %173 = vector.load %arg18[%c0_79, %c128] : memref<32x256xf32, #tpu.memory_space<vmem>>, vector<8x96xf32>
    %174 = vector.extract_strided_slice %169 {offsets = [0, 128], sizes = [8, 96], strides = [1, 1]} : vector<8x256xf32> to vector<8x96xf32>
    %175 = arith.addf %173, %174 : vector<8x96xf32>
    %176 = vector.extract_strided_slice %175 {offsets = [0, 0], sizes = [8, 32], strides = [1, 1]} : vector<8x96xf32> to vector<8x32xf32>
    %177 = vector.extract_strided_slice %172 {offsets = [0, 0], sizes = [8, 32], strides = [1, 1]} : vector<8x96xf32> to vector<8x32xf32>
    %178 = arith.addf %176, %177 : vector<8x32xf32>
    %179 = arith.negf %178 : vector<8x32xf32>
    %180 = math.exp %179 : vector<8x32xf32>
    %cst_80 = arith.constant 1.000000e+00 : f32
    %181 = vector.broadcast %cst_80 : f32 to vector<8x32xf32>
    %182 = arith.addf %181, %180 : vector<8x32xf32>
    %183 = arith.divf %181, %182 : vector<8x32xf32>
    %184 = vector.extract_strided_slice %175 {offsets = [0, 32], sizes = [8, 32], strides = [1, 1]} : vector<8x96xf32> to vector<8x32xf32>
    %185 = vector.extract_strided_slice %172 {offsets = [0, 32], sizes = [8, 32], strides = [1, 1]} : vector<8x96xf32> to vector<8x32xf32>
    %186 = arith.addf %184, %185 : vector<8x32xf32>
    %187 = arith.negf %186 : vector<8x32xf32>
    %188 = math.exp %187 : vector<8x32xf32>
    %cst_81 = arith.constant 1.000000e+00 : f32
    %189 = vector.broadcast %cst_81 : f32 to vector<8x32xf32>
    %190 = arith.addf %189, %188 : vector<8x32xf32>
    %191 = arith.divf %189, %190 : vector<8x32xf32>
    %192 = vector.extract_strided_slice %175 {offsets = [0, 64], sizes = [8, 32], strides = [1, 1]} : vector<8x96xf32> to vector<8x32xf32>
    %193 = vector.extract_strided_slice %172 {offsets = [0, 64], sizes = [8, 32], strides = [1, 1]} : vector<8x96xf32> to vector<8x32xf32>
    %194 = arith.mulf %183, %193 : vector<8x32xf32>
    %195 = arith.addf %192, %194 : vector<8x32xf32>
    %196 = math.tanh %195 : vector<8x32xf32>
    %cst_82 = arith.constant 1.000000e+00 : f32
    %197 = vector.broadcast %cst_82 : f32 to vector<8x32xf32>
    %198 = arith.subf %197, %191 : vector<8x32xf32>
    %199 = arith.mulf %198, %196 : vector<8x32xf32>
    %200 = arith.mulf %191, %166 : vector<8x32xf32>
    %201 = arith.addf %199, %200 : vector<8x32xf32>
    %c0_83 = arith.constant 0 : index
    %c0_84 = arith.constant 0 : index
    %202 = vector.load %arg21[%c0_83, %c0_84] : memref<8x32xf32, #tpu.memory_space<vmem>>, vector<8x32xf32>
    tpu.vector_store %arg21[%c0_83, %c0_84], %201 {strides = array<i32>} : memref<8x32xf32, #tpu.memory_space<vmem>>, vector<8x32xf32>,
    %c0_85 = arith.constant 0 : index
    %c128_86 = arith.constant 128 : index
    %203 = vector.load %arg19[%c0_85, %c128_86] : memref<32x160xf32, #tpu.memory_space<vmem>>, vector<8x32xf32>
    tpu.vector_store %arg19[%c0_85, %c128_86], %201 {strides = array<i32>} : memref<32x160xf32, #tpu.memory_space<vmem>>, vector<8x32xf32>,
    %c0_87 = arith.constant 0 : index
    %c0_88 = arith.constant 0 : index
    %204 = vector.load %arg20[%c0_87, %c0_88] : memref<8x32xf32, #tpu.memory_space<vmem>>, vector<8x32xf32>
    %c0_89 = arith.constant 0 : index
    %c0_90 = arith.constant 0 : index
    %205 = vector.load %arg23[%c0_89, %c0_90] : memref<8x8xf32, #tpu.memory_space<vmem>>, vector<8x8xf32>
    %206 = tpu.concatenate %204, %205 in 1 : vector<8x32xf32>, vector<8x8xf32> -> vector<8x40xf32>
    %cst_91 = arith.constant dense<0.000000e+00> : vector<8x256xf32>
    %207 = tpu.matmul %206, %12, %cst_91 {dimension_numbers = #tpu.dot_dimension_numbers<[1], [0], [0], [1], [0, 0, 1, 1], [], []>} : vector<8x40xf32>, vector<40x256xf32>, vector<8x256xf32> -> vector<8x256xf32>
    %208 = vector.extract_strided_slice %207 {offsets = [0, 0], sizes = [8, 96], strides = [1, 1]} : vector<8x256xf32> to vector<8x96xf32>
    %209 = vector.broadcast %13 : vector<1x96xf32> to vector<8x96xf32>
    %210 = arith.addf %208, %209 : vector<8x96xf32>
    %c16 = arith.constant 16 : index
    %c0_92 = arith.constant 0 : index
    %211 = vector.load %arg18[%c16, %c0_92] : memref<32x256xf32, #tpu.memory_space<vmem>>, vector<8x96xf32>
    %212 = vector.extract_strided_slice %207 {offsets = [0, 128], sizes = [8, 96], strides = [1, 1]} : vector<8x256xf32> to vector<8x96xf32>
    %213 = arith.addf %211, %212 : vector<8x96xf32>
    %214 = vector.extract_strided_slice %213 {offsets = [0, 0], sizes = [8, 32], strides = [1, 1]} : vector<8x96xf32> to vector<8x32xf32>
    %215 = vector.extract_strided_slice %210 {offsets = [0, 0], sizes = [8, 32], strides = [1, 1]} : vector<8x96xf32> to vector<8x32xf32>
    %216 = arith.addf %214, %215 : vector<8x32xf32>
    %217 = arith.negf %216 : vector<8x32xf32>
    %218 = math.exp %217 : vector<8x32xf32>
    %cst_93 = arith.constant 1.000000e+00 : f32
    %219 = vector.broadcast %cst_93 : f32 to vector<8x32xf32>
    %220 = arith.addf %219, %218 : vector<8x32xf32>
    %221 = arith.divf %219, %220 : vector<8x32xf32>
    %222 = vector.extract_strided_slice %213 {offsets = [0, 32], sizes = [8, 32], strides = [1, 1]} : vector<8x96xf32> to vector<8x32xf32>
    %223 = vector.extract_strided_slice %210 {offsets = [0, 32], sizes = [8, 32], strides = [1, 1]} : vector<8x96xf32> to vector<8x32xf32>
    %224 = arith.addf %222, %223 : vector<8x32xf32>
    %225 = arith.negf %224 : vector<8x32xf32>
    %226 = math.exp %225 : vector<8x32xf32>
    %cst_94 = arith.constant 1.000000e+00 : f32
    %227 = vector.broadcast %cst_94 : f32 to vector<8x32xf32>
    %228 = arith.addf %227, %226 : vector<8x32xf32>
    %229 = arith.divf %227, %228 : vector<8x32xf32>
    %230 = vector.extract_strided_slice %213 {offsets = [0, 64], sizes = [8, 32], strides = [1, 1]} : vector<8x96xf32> to vector<8x32xf32>
    %231 = vector.extract_strided_slice %210 {offsets = [0, 64], sizes = [8, 32], strides = [1, 1]} : vector<8x96xf32> to vector<8x32xf32>
    %232 = arith.mulf %221, %231 : vector<8x32xf32>
    %233 = arith.addf %230, %232 : vector<8x32xf32>
    %234 = math.tanh %233 : vector<8x32xf32>
    %cst_95 = arith.constant 1.000000e+00 : f32
    %235 = vector.broadcast %cst_95 : f32 to vector<8x32xf32>
    %236 = arith.subf %235, %229 : vector<8x32xf32>
    %237 = arith.mulf %236, %234 : vector<8x32xf32>
    %238 = arith.mulf %229, %204 : vector<8x32xf32>
    %239 = arith.addf %237, %238 : vector<8x32xf32>
    %cst_96 = arith.constant dense<0.000000e+00> : vector<8x6xf32>
    %240 = tpu.matmul %239, %14, %cst_96 {dimension_numbers = #tpu.dot_dimension_numbers<[1], [0], [0], [1], [0, 0, 1, 1], [], []>} : vector<8x32xf32>, vector<32x6xf32>, vector<8x6xf32> -> vector<8x6xf32>
    %241 = vector.broadcast %15 : vector<1x6xf32> to vector<8x6xf32>
    %242 = arith.addf %240, %241 : vector<8x6xf32>
    %243 = vector.extract_strided_slice %242 {offsets = [0, 0], sizes = [8, 2], strides = [1, 1]} : vector<8x6xf32> to vector<8x2xf32>
    %244 = math.exp %243 : vector<8x2xf32>
    %245 = vector.extract_strided_slice %242 {offsets = [0, 2], sizes = [8, 2], strides = [1, 1]} : vector<8x6xf32> to vector<8x2xf32>
    %246 = math.exp %245 : vector<8x2xf32>
    %c0_97 = arith.constant 0 : index
    %c0_98 = arith.constant 0 : index
    %247 = vector.load %arg22[%c0_97, %c0_98] : memref<8x2xf32, #tpu.memory_space<vmem>>, vector<8x2xf32>
    %248 = vector.extract_strided_slice %242 {offsets = [0, 4], sizes = [8, 2], strides = [1, 1]} : vector<8x6xf32> to vector<8x2xf32>
    %249 = math.exp %248 : vector<8x2xf32>
    %250 = arith.addf %247, %249 : vector<8x2xf32>
    %251 = vector.shape_cast %250 : vector<8x2xf32> to vector<8x2x1xf32>
    %252 = vector.broadcast %251 : vector<8x2x1xf32> to vector<8x2x7xf32>
    %253 = vector.broadcast %19 : vector<1x1x7xf32> to vector<8x2x7xf32>
    %254 = arith.subf %252, %253 : vector<8x2x7xf32>
    %255 = vector.shape_cast %244 : vector<8x2xf32> to vector<8x2x1xf32>
    %256 = vector.shape_cast %246 : vector<8x2xf32> to vector<8x2x1xf32>
    %cst_99 = arith.constant 0.000000e+00 : f32
    %257 = vector.broadcast %cst_99 : f32 to vector<8x2x1xf32>
    %258 = arith.subf %257, %256 : vector<8x2x1xf32>
    %259 = vector.broadcast %258 : vector<8x2x1xf32> to vector<8x2x7xf32>
    %260 = arith.mulf %259, %254 : vector<8x2x7xf32>
    %261 = arith.mulf %260, %254 : vector<8x2x7xf32>
    %262 = math.exp %261 : vector<8x2x7xf32>
    %263 = vector.broadcast %255 : vector<8x2x1xf32> to vector<8x2x7xf32>
    %264 = arith.mulf %263, %262 : vector<8x2x7xf32>
    %cst_100 = arith.constant dense<0.000000e+00> : vector<8x7xf32>
    %265 = vector.multi_reduction <add>, %264, %cst_100 [1] : vector<8x2x7xf32> to vector<8x7xf32>
    %266 = vector.extract_strided_slice %265 {offsets = [0, 0], sizes = [8, 6], strides = [1, 1]} : vector<8x7xf32> to vector<8x6xf32>
    %267 = vector.shape_cast %266 : vector<8x6xf32> to vector<8x6x1xf32>
    %268 = vector.broadcast %267 : vector<8x6x1xf32> to vector<8x6x8xf32>
    %269 = arith.mulf %268, %11 : vector<8x6x8xf32>
    %cst_101 = arith.constant dense<0.000000e+00> : vector<8x8xf32>
    %270 = vector.multi_reduction <add>, %269, %cst_101 [1] : vector<8x6x8xf32> to vector<8x8xf32>
    %c0_102 = arith.constant 0 : index
    %c0_103 = arith.constant 0 : index
    %271 = vector.load %arg20[%c0_102, %c0_103] : memref<8x32xf32, #tpu.memory_space<vmem>>, vector<8x32xf32>
    tpu.vector_store %arg20[%c0_102, %c0_103], %239 {strides = array<i32>} : memref<8x32xf32, #tpu.memory_space<vmem>>, vector<8x32xf32>,
    %c0_104 = arith.constant 0 : index
    %c0_105 = arith.constant 0 : index
    %272 = vector.load %arg22[%c0_104, %c0_105] : memref<8x2xf32, #tpu.memory_space<vmem>>, vector<8x2xf32>
    tpu.vector_store %arg22[%c0_104, %c0_105], %250 {strides = array<i32>} : memref<8x2xf32, #tpu.memory_space<vmem>>, vector<8x2xf32>,
    %c0_106 = arith.constant 0 : index
    %c0_107 = arith.constant 0 : index
    %273 = vector.load %arg23[%c0_106, %c0_107] : memref<8x8xf32, #tpu.memory_space<vmem>>, vector<8x8xf32>
    tpu.vector_store %arg23[%c0_106, %c0_107], %270 {strides = array<i32>} : memref<8x8xf32, #tpu.memory_space<vmem>>, vector<8x8xf32>,
    %274 = tpu.concatenate %239, %270 in 1 : vector<8x32xf32>, vector<8x8xf32> -> vector<8x40xf32>
    %c16_108 = arith.constant 16 : index
    %c0_109 = arith.constant 0 : index
    %275 = vector.load %arg19[%c16_108, %c0_109] : memref<32x160xf32, #tpu.memory_space<vmem>>, vector<8x40xf32>
    tpu.vector_store %arg19[%c16_108, %c0_109], %274 {strides = array<i32>} : memref<32x160xf32, #tpu.memory_space<vmem>>, vector<8x40xf32>,
    %c0_110 = arith.constant 0 : index
    %c0_111 = arith.constant 0 : index
    %276 = vector.load %arg17[%c0_110, %c0_111] : memref<8x7xf32, #tpu.memory_space<vmem>>, vector<8x7xf32>
    tpu.vector_store %arg17[%c0_110, %c0_111], %265 {strides = array<i32>} : memref<8x7xf32, #tpu.memory_space<vmem>>, vector<8x7xf32>,
    %c0_112 = arith.constant 0 : index
    %c0_113 = arith.constant 0 : index
    %277 = vector.load %arg21[%c0_112, %c0_113] : memref<8x32xf32, #tpu.memory_space<vmem>>, vector<8x32xf32>
    %c8_114 = arith.constant 8 : index
    %c0_115 = arith.constant 0 : index
    %278 = vector.load %arg19[%c8_114, %c0_115] : memref<32x160xf32, #tpu.memory_space<vmem>>, vector<8x40xf32>
    %279 = tpu.concatenate %277, %278 in 1 : vector<8x32xf32>, vector<8x40xf32> -> vector<8x72xf32>
    %cst_116 = arith.constant dense<0.000000e+00> : vector<8x256xf32>
    %280 = tpu.matmul %279, %16, %cst_116 {dimension_numbers = #tpu.dot_dimension_numbers<[1], [0], [0], [1], [0, 0, 1, 1], [], []>} : vector<8x72xf32>, vector<72x256xf32>, vector<8x256xf32> -> vector<8x256xf32>
    %281 = vector.extract_strided_slice %280 {offsets = [0, 0], sizes = [8, 96], strides = [1, 1]} : vector<8x256xf32> to vector<8x96xf32>
    %282 = vector.broadcast %17 : vector<1x96xf32> to vector<8x96xf32>
    %283 = arith.addf %281, %282 : vector<8x96xf32>
    %c8_117 = arith.constant 8 : index
    %c128_118 = arith.constant 128 : index
    %284 = vector.load %arg18[%c8_117, %c128_118] : memref<32x256xf32, #tpu.memory_space<vmem>>, vector<8x96xf32>
    %285 = vector.extract_strided_slice %280 {offsets = [0, 128], sizes = [8, 96], strides = [1, 1]} : vector<8x256xf32> to vector<8x96xf32>
    %286 = arith.addf %284, %285 : vector<8x96xf32>
    %287 = vector.extract_strided_slice %286 {offsets = [0, 0], sizes = [8, 32], strides = [1, 1]} : vector<8x96xf32> to vector<8x32xf32>
    %288 = vector.extract_strided_slice %283 {offsets = [0, 0], sizes = [8, 32], strides = [1, 1]} : vector<8x96xf32> to vector<8x32xf32>
    %289 = arith.addf %287, %288 : vector<8x32xf32>
    %290 = arith.negf %289 : vector<8x32xf32>
    %291 = math.exp %290 : vector<8x32xf32>
    %cst_119 = arith.constant 1.000000e+00 : f32
    %292 = vector.broadcast %cst_119 : f32 to vector<8x32xf32>
    %293 = arith.addf %292, %291 : vector<8x32xf32>
    %294 = arith.divf %292, %293 : vector<8x32xf32>
    %295 = vector.extract_strided_slice %286 {offsets = [0, 32], sizes = [8, 32], strides = [1, 1]} : vector<8x96xf32> to vector<8x32xf32>
    %296 = vector.extract_strided_slice %283 {offsets = [0, 32], sizes = [8, 32], strides = [1, 1]} : vector<8x96xf32> to vector<8x32xf32>
    %297 = arith.addf %295, %296 : vector<8x32xf32>
    %298 = arith.negf %297 : vector<8x32xf32>
    %299 = math.exp %298 : vector<8x32xf32>
    %cst_120 = arith.constant 1.000000e+00 : f32
    %300 = vector.broadcast %cst_120 : f32 to vector<8x32xf32>
    %301 = arith.addf %300, %299 : vector<8x32xf32>
    %302 = arith.divf %300, %301 : vector<8x32xf32>
    %303 = vector.extract_strided_slice %286 {offsets = [0, 64], sizes = [8, 32], strides = [1, 1]} : vector<8x96xf32> to vector<8x32xf32>
    %304 = vector.extract_strided_slice %283 {offsets = [0, 64], sizes = [8, 32], strides = [1, 1]} : vector<8x96xf32> to vector<8x32xf32>
    %305 = arith.mulf %294, %304 : vector<8x32xf32>
    %306 = arith.addf %303, %305 : vector<8x32xf32>
    %307 = math.tanh %306 : vector<8x32xf32>
    %cst_121 = arith.constant 1.000000e+00 : f32
    %308 = vector.broadcast %cst_121 : f32 to vector<8x32xf32>
    %309 = arith.subf %308, %302 : vector<8x32xf32>
    %310 = arith.mulf %309, %307 : vector<8x32xf32>
    %311 = arith.mulf %302, %277 : vector<8x32xf32>
    %312 = arith.addf %310, %311 : vector<8x32xf32>
    %c0_122 = arith.constant 0 : index
    %c0_123 = arith.constant 0 : index
    %313 = vector.load %arg21[%c0_122, %c0_123] : memref<8x32xf32, #tpu.memory_space<vmem>>, vector<8x32xf32>
    tpu.vector_store %arg21[%c0_122, %c0_123], %312 {strides = array<i32>} : memref<8x32xf32, #tpu.memory_space<vmem>>, vector<8x32xf32>,
    %c8_124 = arith.constant 8 : index
    %c128_125 = arith.constant 128 : index
    %314 = vector.load %arg19[%c8_124, %c128_125] : memref<32x160xf32, #tpu.memory_space<vmem>>, vector<8x32xf32>
    tpu.vector_store %arg19[%c8_124, %c128_125], %312 {strides = array<i32>} : memref<32x160xf32, #tpu.memory_space<vmem>>, vector<8x32xf32>,
    %c0_126 = arith.constant 0 : index
    %c0_127 = arith.constant 0 : index
    %315 = vector.load %arg20[%c0_126, %c0_127] : memref<8x32xf32, #tpu.memory_space<vmem>>, vector<8x32xf32>
    %c0_128 = arith.constant 0 : index
    %c0_129 = arith.constant 0 : index
    %316 = vector.load %arg23[%c0_128, %c0_129] : memref<8x8xf32, #tpu.memory_space<vmem>>, vector<8x8xf32>
    %317 = tpu.concatenate %315, %316 in 1 : vector<8x32xf32>, vector<8x8xf32> -> vector<8x40xf32>
    %cst_130 = arith.constant dense<0.000000e+00> : vector<8x256xf32>
    %318 = tpu.matmul %317, %12, %cst_130 {dimension_numbers = #tpu.dot_dimension_numbers<[1], [0], [0], [1], [0, 0, 1, 1], [], []>} : vector<8x40xf32>, vector<40x256xf32>, vector<8x256xf32> -> vector<8x256xf32>
    %319 = vector.extract_strided_slice %318 {offsets = [0, 0], sizes = [8, 96], strides = [1, 1]} : vector<8x256xf32> to vector<8x96xf32>
    %320 = vector.broadcast %13 : vector<1x96xf32> to vector<8x96xf32>
    %321 = arith.addf %319, %320 : vector<8x96xf32>
    %c24 = arith.constant 24 : index
    %c0_131 = arith.constant 0 : index
    %322 = vector.load %arg18[%c24, %c0_131] : memref<32x256xf32, #tpu.memory_space<vmem>>, vector<8x96xf32>
    %323 = vector.extract_strided_slice %318 {offsets = [0, 128], sizes = [8, 96], strides = [1, 1]} : vector<8x256xf32> to vector<8x96xf32>
    %324 = arith.addf %322, %323 : vector<8x96xf32>
    %325 = vector.extract_strided_slice %324 {offsets = [0, 0], sizes = [8, 32], strides = [1, 1]} : vector<8x96xf32> to vector<8x32xf32>
    %326 = vector.extract_strided_slice %321 {offsets = [0, 0], sizes = [8, 32], strides = [1, 1]} : vector<8x96xf32> to vector<8x32xf32>
    %327 = arith.addf %325, %326 : vector<8x32xf32>
    %328 = arith.negf %327 : vector<8x32xf32>
    %329 = math.exp %328 : vector<8x32xf32>
    %cst_132 = arith.constant 1.000000e+00 : f32
    %330 = vector.broadcast %cst_132 : f32 to vector<8x32xf32>
    %331 = arith.addf %330, %329 : vector<8x32xf32>
    %332 = arith.divf %330, %331 : vector<8x32xf32>
    %333 = vector.extract_strided_slice %324 {offsets = [0, 32], sizes = [8, 32], strides = [1, 1]} : vector<8x96xf32> to vector<8x32xf32>
    %334 = vector.extract_strided_slice %321 {offsets = [0, 32], sizes = [8, 32], strides = [1, 1]} : vector<8x96xf32> to vector<8x32xf32>
    %335 = arith.addf %333, %334 : vector<8x32xf32>
    %336 = arith.negf %335 : vector<8x32xf32>
    %337 = math.exp %336 : vector<8x32xf32>
    %cst_133 = arith.constant 1.000000e+00 : f32
    %338 = vector.broadcast %cst_133 : f32 to vector<8x32xf32>
    %339 = arith.addf %338, %337 : vector<8x32xf32>
    %340 = arith.divf %338, %339 : vector<8x32xf32>
    %341 = vector.extract_strided_slice %324 {offsets = [0, 64], sizes = [8, 32], strides = [1, 1]} : vector<8x96xf32> to vector<8x32xf32>
    %342 = vector.extract_strided_slice %321 {offsets = [0, 64], sizes = [8, 32], strides = [1, 1]} : vector<8x96xf32> to vector<8x32xf32>
    %343 = arith.mulf %332, %342 : vector<8x32xf32>
    %344 = arith.addf %341, %343 : vector<8x32xf32>
    %345 = math.tanh %344 : vector<8x32xf32>
    %cst_134 = arith.constant 1.000000e+00 : f32
    %346 = vector.broadcast %cst_134 : f32 to vector<8x32xf32>
    %347 = arith.subf %346, %340 : vector<8x32xf32>
    %348 = arith.mulf %347, %345 : vector<8x32xf32>
    %349 = arith.mulf %340, %315 : vector<8x32xf32>
    %350 = arith.addf %348, %349 : vector<8x32xf32>
    %cst_135 = arith.constant dense<0.000000e+00> : vector<8x6xf32>
    %351 = tpu.matmul %350, %14, %cst_135 {dimension_numbers = #tpu.dot_dimension_numbers<[1], [0], [0], [1], [0, 0, 1, 1], [], []>} : vector<8x32xf32>, vector<32x6xf32>, vector<8x6xf32> -> vector<8x6xf32>
    %352 = vector.broadcast %15 : vector<1x6xf32> to vector<8x6xf32>
    %353 = arith.addf %351, %352 : vector<8x6xf32>
    %354 = vector.extract_strided_slice %353 {offsets = [0, 0], sizes = [8, 2], strides = [1, 1]} : vector<8x6xf32> to vector<8x2xf32>
    %355 = math.exp %354 : vector<8x2xf32>
    %356 = vector.extract_strided_slice %353 {offsets = [0, 2], sizes = [8, 2], strides = [1, 1]} : vector<8x6xf32> to vector<8x2xf32>
    %357 = math.exp %356 : vector<8x2xf32>
    %c0_136 = arith.constant 0 : index
    %c0_137 = arith.constant 0 : index
    %358 = vector.load %arg22[%c0_136, %c0_137] : memref<8x2xf32, #tpu.memory_space<vmem>>, vector<8x2xf32>
    %359 = vector.extract_strided_slice %353 {offsets = [0, 4], sizes = [8, 2], strides = [1, 1]} : vector<8x6xf32> to vector<8x2xf32>
    %360 = math.exp %359 : vector<8x2xf32>
    %361 = arith.addf %358, %360 : vector<8x2xf32>
    %362 = vector.shape_cast %361 : vector<8x2xf32> to vector<8x2x1xf32>
    %363 = vector.broadcast %362 : vector<8x2x1xf32> to vector<8x2x7xf32>
    %364 = vector.broadcast %19 : vector<1x1x7xf32> to vector<8x2x7xf32>
    %365 = arith.subf %363, %364 : vector<8x2x7xf32>
    %366 = vector.shape_cast %355 : vector<8x2xf32> to vector<8x2x1xf32>
    %367 = vector.shape_cast %357 : vector<8x2xf32> to vector<8x2x1xf32>
    %cst_138 = arith.constant 0.000000e+00 : f32
    %368 = vector.broadcast %cst_138 : f32 to vector<8x2x1xf32>
    %369 = arith.subf %368, %367 : vector<8x2x1xf32>
    %370 = vector.broadcast %369 : vector<8x2x1xf32> to vector<8x2x7xf32>
    %371 = arith.mulf %370, %365 : vector<8x2x7xf32>
    %372 = arith.mulf %371, %365 : vector<8x2x7xf32>
    %373 = math.exp %372 : vector<8x2x7xf32>
    %374 = vector.broadcast %366 : vector<8x2x1xf32> to vector<8x2x7xf32>
    %375 = arith.mulf %374, %373 : vector<8x2x7xf32>
    %cst_139 = arith.constant dense<0.000000e+00> : vector<8x7xf32>
    %376 = vector.multi_reduction <add>, %375, %cst_139 [1] : vector<8x2x7xf32> to vector<8x7xf32>
    %377 = vector.extract_strided_slice %376 {offsets = [0, 0], sizes = [8, 6], strides = [1, 1]} : vector<8x7xf32> to vector<8x6xf32>
    %378 = vector.shape_cast %377 : vector<8x6xf32> to vector<8x6x1xf32>
    %379 = vector.broadcast %378 : vector<8x6x1xf32> to vector<8x6x8xf32>
    %380 = arith.mulf %379, %11 : vector<8x6x8xf32>
    %cst_140 = arith.constant dense<0.000000e+00> : vector<8x8xf32>
    %381 = vector.multi_reduction <add>, %380, %cst_140 [1] : vector<8x6x8xf32> to vector<8x8xf32>
    %c0_141 = arith.constant 0 : index
    %c0_142 = arith.constant 0 : index
    %382 = vector.load %arg20[%c0_141, %c0_142] : memref<8x32xf32, #tpu.memory_space<vmem>>, vector<8x32xf32>
    tpu.vector_store %arg20[%c0_141, %c0_142], %350 {strides = array<i32>} : memref<8x32xf32, #tpu.memory_space<vmem>>, vector<8x32xf32>,
    %c0_143 = arith.constant 0 : index
    %c0_144 = arith.constant 0 : index
    %383 = vector.load %arg22[%c0_143, %c0_144] : memref<8x2xf32, #tpu.memory_space<vmem>>, vector<8x2xf32>
    tpu.vector_store %arg22[%c0_143, %c0_144], %361 {strides = array<i32>} : memref<8x2xf32, #tpu.memory_space<vmem>>, vector<8x2xf32>,
    %c0_145 = arith.constant 0 : index
    %c0_146 = arith.constant 0 : index
    %384 = vector.load %arg23[%c0_145, %c0_146] : memref<8x8xf32, #tpu.memory_space<vmem>>, vector<8x8xf32>
    tpu.vector_store %arg23[%c0_145, %c0_146], %381 {strides = array<i32>} : memref<8x8xf32, #tpu.memory_space<vmem>>, vector<8x8xf32>,
    %385 = tpu.concatenate %350, %381 in 1 : vector<8x32xf32>, vector<8x8xf32> -> vector<8x40xf32>
    %c24_147 = arith.constant 24 : index
    %c0_148 = arith.constant 0 : index
    %386 = vector.load %arg19[%c24_147, %c0_148] : memref<32x160xf32, #tpu.memory_space<vmem>>, vector<8x40xf32>
    tpu.vector_store %arg19[%c24_147, %c0_148], %385 {strides = array<i32>} : memref<32x160xf32, #tpu.memory_space<vmem>>, vector<8x40xf32>,
    %c0_149 = arith.constant 0 : index
    %c0_150 = arith.constant 0 : index
    %387 = vector.load %arg17[%c0_149, %c0_150] : memref<8x7xf32, #tpu.memory_space<vmem>>, vector<8x7xf32>
    tpu.vector_store %arg17[%c0_149, %c0_150], %376 {strides = array<i32>} : memref<8x7xf32, #tpu.memory_space<vmem>>, vector<8x7xf32>,
    %c0_151 = arith.constant 0 : index
    %c0_152 = arith.constant 0 : index
    %388 = vector.load %arg21[%c0_151, %c0_152] : memref<8x32xf32, #tpu.memory_space<vmem>>, vector<8x32xf32>
    %c16_153 = arith.constant 16 : index
    %c0_154 = arith.constant 0 : index
    %389 = vector.load %arg19[%c16_153, %c0_154] : memref<32x160xf32, #tpu.memory_space<vmem>>, vector<8x40xf32>
    %390 = tpu.concatenate %388, %389 in 1 : vector<8x32xf32>, vector<8x40xf32> -> vector<8x72xf32>
    %cst_155 = arith.constant dense<0.000000e+00> : vector<8x256xf32>
    %391 = tpu.matmul %390, %16, %cst_155 {dimension_numbers = #tpu.dot_dimension_numbers<[1], [0], [0], [1], [0, 0, 1, 1], [], []>} : vector<8x72xf32>, vector<72x256xf32>, vector<8x256xf32> -> vector<8x256xf32>
    %392 = vector.extract_strided_slice %391 {offsets = [0, 0], sizes = [8, 96], strides = [1, 1]} : vector<8x256xf32> to vector<8x96xf32>
    %393 = vector.broadcast %17 : vector<1x96xf32> to vector<8x96xf32>
    %394 = arith.addf %392, %393 : vector<8x96xf32>
    %c16_156 = arith.constant 16 : index
    %c128_157 = arith.constant 128 : index
    %395 = vector.load %arg18[%c16_156, %c128_157] : memref<32x256xf32, #tpu.memory_space<vmem>>, vector<8x96xf32>
    %396 = vector.extract_strided_slice %391 {offsets = [0, 128], sizes = [8, 96], strides = [1, 1]} : vector<8x256xf32> to vector<8x96xf32>
    %397 = arith.addf %395, %396 : vector<8x96xf32>
    %398 = vector.extract_strided_slice %397 {offsets = [0, 0], sizes = [8, 32], strides = [1, 1]} : vector<8x96xf32> to vector<8x32xf32>
    %399 = vector.extract_strided_slice %394 {offsets = [0, 0], sizes = [8, 32], strides = [1, 1]} : vector<8x96xf32> to vector<8x32xf32>
    %400 = arith.addf %398, %399 : vector<8x32xf32>
    %401 = arith.negf %400 : vector<8x32xf32>
    %402 = math.exp %401 : vector<8x32xf32>
    %cst_158 = arith.constant 1.000000e+00 : f32
    %403 = vector.broadcast %cst_158 : f32 to vector<8x32xf32>
    %404 = arith.addf %403, %402 : vector<8x32xf32>
    %405 = arith.divf %403, %404 : vector<8x32xf32>
    %406 = vector.extract_strided_slice %397 {offsets = [0, 32], sizes = [8, 32], strides = [1, 1]} : vector<8x96xf32> to vector<8x32xf32>
    %407 = vector.extract_strided_slice %394 {offsets = [0, 32], sizes = [8, 32], strides = [1, 1]} : vector<8x96xf32> to vector<8x32xf32>
    %408 = arith.addf %406, %407 : vector<8x32xf32>
    %409 = arith.negf %408 : vector<8x32xf32>
    %410 = math.exp %409 : vector<8x32xf32>
    %cst_159 = arith.constant 1.000000e+00 : f32
    %411 = vector.broadcast %cst_159 : f32 to vector<8x32xf32>
    %412 = arith.addf %411, %410 : vector<8x32xf32>
    %413 = arith.divf %411, %412 : vector<8x32xf32>
    %414 = vector.extract_strided_slice %397 {offsets = [0, 64], sizes = [8, 32], strides = [1, 1]} : vector<8x96xf32> to vector<8x32xf32>
    %415 = vector.extract_strided_slice %394 {offsets = [0, 64], sizes = [8, 32], strides = [1, 1]} : vector<8x96xf32> to vector<8x32xf32>
    %416 = arith.mulf %405, %415 : vector<8x32xf32>
    %417 = arith.addf %414, %416 : vector<8x32xf32>
    %418 = math.tanh %417 : vector<8x32xf32>
    %cst_160 = arith.constant 1.000000e+00 : f32
    %419 = vector.broadcast %cst_160 : f32 to vector<8x32xf32>
    %420 = arith.subf %419, %413 : vector<8x32xf32>
    %421 = arith.mulf %420, %418 : vector<8x32xf32>
    %422 = arith.mulf %413, %388 : vector<8x32xf32>
    %423 = arith.addf %421, %422 : vector<8x32xf32>
    %c0_161 = arith.constant 0 : index
    %c0_162 = arith.constant 0 : index
    %424 = vector.load %arg21[%c0_161, %c0_162] : memref<8x32xf32, #tpu.memory_space<vmem>>, vector<8x32xf32>
    tpu.vector_store %arg21[%c0_161, %c0_162], %423 {strides = array<i32>} : memref<8x32xf32, #tpu.memory_space<vmem>>, vector<8x32xf32>,
    %c16_163 = arith.constant 16 : index
    %c128_164 = arith.constant 128 : index
    %425 = vector.load %arg19[%c16_163, %c128_164] : memref<32x160xf32, #tpu.memory_space<vmem>>, vector<8x32xf32>
    tpu.vector_store %arg19[%c16_163, %c128_164], %423 {strides = array<i32>} : memref<32x160xf32, #tpu.memory_space<vmem>>, vector<8x32xf32>,
    %c0_165 = arith.constant 0 : index
    %c0_166 = arith.constant 0 : index
    %426 = vector.load %arg21[%c0_165, %c0_166] : memref<8x32xf32, #tpu.memory_space<vmem>>, vector<8x32xf32>
    %c24_167 = arith.constant 24 : index
    %c0_168 = arith.constant 0 : index
    %427 = vector.load %arg19[%c24_167, %c0_168] : memref<32x160xf32, #tpu.memory_space<vmem>>, vector<8x40xf32>
    %428 = tpu.concatenate %426, %427 in 1 : vector<8x32xf32>, vector<8x40xf32> -> vector<8x72xf32>
    %cst_169 = arith.constant dense<0.000000e+00> : vector<8x256xf32>
    %429 = tpu.matmul %428, %16, %cst_169 {dimension_numbers = #tpu.dot_dimension_numbers<[1], [0], [0], [1], [0, 0, 1, 1], [], []>} : vector<8x72xf32>, vector<72x256xf32>, vector<8x256xf32> -> vector<8x256xf32>
    %430 = vector.extract_strided_slice %429 {offsets = [0, 0], sizes = [8, 96], strides = [1, 1]} : vector<8x256xf32> to vector<8x96xf32>
    %431 = vector.broadcast %17 : vector<1x96xf32> to vector<8x96xf32>
    %432 = arith.addf %430, %431 : vector<8x96xf32>
    %c24_170 = arith.constant 24 : index
    %c128_171 = arith.constant 128 : index
    %433 = vector.load %arg18[%c24_170, %c128_171] : memref<32x256xf32, #tpu.memory_space<vmem>>, vector<8x96xf32>
    %434 = vector.extract_strided_slice %429 {offsets = [0, 128], sizes = [8, 96], strides = [1, 1]} : vector<8x256xf32> to vector<8x96xf32>
    %435 = arith.addf %433, %434 : vector<8x96xf32>
    %436 = vector.extract_strided_slice %435 {offsets = [0, 0], sizes = [8, 32], strides = [1, 1]} : vector<8x96xf32> to vector<8x32xf32>
    %437 = vector.extract_strided_slice %432 {offsets = [0, 0], sizes = [8, 32], strides = [1, 1]} : vector<8x96xf32> to vector<8x32xf32>
    %438 = arith.addf %436, %437 : vector<8x32xf32>
    %439 = arith.negf %438 : vector<8x32xf32>
    %440 = math.exp %439 : vector<8x32xf32>
    %cst_172 = arith.constant 1.000000e+00 : f32
    %441 = vector.broadcast %cst_172 : f32 to vector<8x32xf32>
    %442 = arith.addf %441, %440 : vector<8x32xf32>
    %443 = arith.divf %441, %442 : vector<8x32xf32>
    %444 = vector.extract_strided_slice %435 {offsets = [0, 32], sizes = [8, 32], strides = [1, 1]} : vector<8x96xf32> to vector<8x32xf32>
    %445 = vector.extract_strided_slice %432 {offsets = [0, 32], sizes = [8, 32], strides = [1, 1]} : vector<8x96xf32> to vector<8x32xf32>
    %446 = arith.addf %444, %445 : vector<8x32xf32>
    %447 = arith.negf %446 : vector<8x32xf32>
    %448 = math.exp %447 : vector<8x32xf32>
    %cst_173 = arith.constant 1.000000e+00 : f32
    %449 = vector.broadcast %cst_173 : f32 to vector<8x32xf32>
    %450 = arith.addf %449, %448 : vector<8x32xf32>
    %451 = arith.divf %449, %450 : vector<8x32xf32>
    %452 = vector.extract_strided_slice %435 {offsets = [0, 64], sizes = [8, 32], strides = [1, 1]} : vector<8x96xf32> to vector<8x32xf32>
    %453 = vector.extract_strided_slice %432 {offsets = [0, 64], sizes = [8, 32], strides = [1, 1]} : vector<8x96xf32> to vector<8x32xf32>
    %454 = arith.mulf %443, %453 : vector<8x32xf32>
    %455 = arith.addf %452, %454 : vector<8x32xf32>
    %456 = math.tanh %455 : vector<8x32xf32>
    %cst_174 = arith.constant 1.000000e+00 : f32
    %457 = vector.broadcast %cst_174 : f32 to vector<8x32xf32>
    %458 = arith.subf %457, %451 : vector<8x32xf32>
    %459 = arith.mulf %458, %456 : vector<8x32xf32>
    %460 = arith.mulf %451, %426 : vector<8x32xf32>
    %461 = arith.addf %459, %460 : vector<8x32xf32>
    %c0_175 = arith.constant 0 : index
    %c0_176 = arith.constant 0 : index
    %462 = vector.load %arg21[%c0_175, %c0_176] : memref<8x32xf32, #tpu.memory_space<vmem>>, vector<8x32xf32>
    tpu.vector_store %arg21[%c0_175, %c0_176], %461 {strides = array<i32>} : memref<8x32xf32, #tpu.memory_space<vmem>>, vector<8x32xf32>,
    %c24_177 = arith.constant 24 : index
    %c128_178 = arith.constant 128 : index
    %463 = vector.load %arg19[%c24_177, %c128_178] : memref<32x160xf32, #tpu.memory_space<vmem>>, vector<8x32xf32>
    tpu.vector_store %arg19[%c24_177, %c128_178], %461 {strides = array<i32>} : memref<32x160xf32, #tpu.memory_space<vmem>>, vector<8x32xf32>,
    %c0_179 = arith.constant 0 : index
    %c0_180 = arith.constant 0 : index
    %464 = vector.load %arg19[%c0_179, %c0_180] : memref<32x160xf32, #tpu.memory_space<vmem>>, vector<32x160xf32>
    %465 = arith.truncf %464 : vector<32x160xf32> to vector<32x160xbf16>
    %c0_181 = arith.constant 0 : index
    %c0_182 = arith.constant 0 : index
    %466 = vector.load %arg11[%c0_181, %c0_182] : memref<160x128xbf16, #tpu.memory_space<vmem>>, vector<160x128xbf16>
    %cst_183 = arith.constant dense<0.000000e+00> : vector<32x128xf32>
    %467 = tpu.matmul %465, %466, %cst_183 {dimension_numbers = #tpu.dot_dimension_numbers<[1], [0], [0], [1], [0, 0, 1, 1], [], []>} : vector<32x160xbf16>, vector<160x128xbf16>, vector<32x128xf32> -> vector<32x128xf32>
    %c0_184 = arith.constant 0 : index
    %c0_185 = arith.constant 0 : index
    %468 = vector.load %arg12[%c0_184, %c0_185] : memref<1x128xf32, #tpu.memory_space<vmem>>, vector<1x128xf32>
    %469 = vector.broadcast %468 : vector<1x128xf32> to vector<32x128xf32>
    %470 = arith.addf %467, %469 : vector<32x128xf32>
    %c0_186 = arith.constant 0 : index
    %c0_187 = arith.constant 0 : index
    %471 = vector.load %arg13[%c0_186, %c0_187] : memref<32x128xf32, #tpu.memory_space<vmem>>, vector<32x128xf32>
    tpu.vector_store %arg13[%c0_186, %c0_187], %470 {strides = array<i32>} : memref<32x128xf32, #tpu.memory_space<vmem>>, vector<32x128xf32>,
    %c0_188 = arith.constant 0 : index
    %c0_189 = arith.constant 0 : index
    %472 = vector.load %arg20[%c0_188, %c0_189] : memref<8x32xf32, #tpu.memory_space<vmem>>, vector<8x32xf32>
    %c0_190 = arith.constant 0 : index
    %c0_191 = arith.constant 0 : index
    %c0_192 = arith.constant 0 : index
    %473 = vector.load %arg14[%c0_190, %c0_191, %c0_192] : memref<2x8x32xf32, #tpu.memory_space<vmem>>, vector<1x8x32xf32>
    %474 = vector.shape_cast %473 : vector<1x8x32xf32> to vector<8x32xf32>
    %475 = vector.shape_cast %472 : vector<8x32xf32> to vector<1x8x32xf32>
    tpu.vector_store %arg14[%c0_190, %c0_191, %c0_192], %475 {strides = array<i32>} : memref<2x8x32xf32, #tpu.memory_space<vmem>>, vector<1x8x32xf32>,
    %c0_193 = arith.constant 0 : index
    %c0_194 = arith.constant 0 : index
    %476 = vector.load %arg21[%c0_193, %c0_194] : memref<8x32xf32, #tpu.memory_space<vmem>>, vector<8x32xf32>
    %c1 = arith.constant 1 : index
    %c0_195 = arith.constant 0 : index
    %c0_196 = arith.constant 0 : index
    %477 = vector.load %arg14[%c1, %c0_195, %c0_196] : memref<2x8x32xf32, #tpu.memory_space<vmem>>, vector<1x8x32xf32>
    %478 = vector.shape_cast %477 : vector<1x8x32xf32> to vector<8x32xf32>
    %479 = vector.shape_cast %476 : vector<8x32xf32> to vector<1x8x32xf32>
    tpu.vector_store %arg14[%c1, %c0_195, %c0_196], %479 {strides = array<i32>} : memref<2x8x32xf32, #tpu.memory_space<vmem>>, vector<1x8x32xf32>,
    %c0_197 = arith.constant 0 : index
    %c0_198 = arith.constant 0 : index
    %480 = vector.load %arg22[%c0_197, %c0_198] : memref<8x2xf32, #tpu.memory_space<vmem>>, vector<8x2xf32>
    %c0_199 = arith.constant 0 : index
    %c0_200 = arith.constant 0 : index
    %481 = vector.load %arg15[%c0_199, %c0_200] : memref<8x2xf32, #tpu.memory_space<vmem>>, vector<8x2xf32>
    tpu.vector_store %arg15[%c0_199, %c0_200], %480 {strides = array<i32>} : memref<8x2xf32, #tpu.memory_space<vmem>>, vector<8x2xf32>,
    %c0_201 = arith.constant 0 : index
    %c0_202 = arith.constant 0 : index
    %482 = vector.load %arg23[%c0_201, %c0_202] : memref<8x8xf32, #tpu.memory_space<vmem>>, vector<8x8xf32>
    %c0_203 = arith.constant 0 : index
    %c0_204 = arith.constant 0 : index
    %483 = vector.load %arg16[%c0_203, %c0_204] : memref<8x8xf32, #tpu.memory_space<vmem>>, vector<8x8xf32>
    tpu.vector_store %arg16[%c0_203, %c0_204], %482 {strides = array<i32>} : memref<8x8xf32, #tpu.memory_space<vmem>>, vector<8x8xf32>,
    return
  }
  func.func @transform_0(%arg0: i32) -> (i32, i32) {
    %c0_i32 = arith.constant 0 : i32
    %c0_i32_0 = arith.constant 0 : i32
    return %arg0, %c0_i32 : i32, i32
  }
  func.func @transform_1(%arg0: i32) -> (i32, i32, i32) {
    %c0_i32 = arith.constant 0 : i32
    %c0_i32_0 = arith.constant 0 : i32
    %c0_i32_1 = arith.constant 0 : i32
    %c0_i32_2 = arith.constant 0 : i32
    return %c0_i32, %c0_i32_0, %c0_i32_1 : i32, i32, i32
  }
  func.func @transform_2(%arg0: i32) -> (i32, i32) {
    %c0_i32 = arith.constant 0 : i32
    %c0_i32_0 = arith.constant 0 : i32
    %c0_i32_1 = arith.constant 0 : i32
    return %c0_i32, %c0_i32_0 : i32, i32
  }
  func.func @transform_3(%arg0: i32) -> (i32, i32) {
    %c0_i32 = arith.constant 0 : i32
    %c0_i32_0 = arith.constant 0 : i32
    %c0_i32_1 = arith.constant 0 : i32
    return %c0_i32, %c0_i32_0 : i32, i32
  }
  func.func @transform_4(%arg0: i32) -> (i32, i32) {
    %c0_i32 = arith.constant 0 : i32
    %c0_i32_0 = arith.constant 0 : i32
    %c0_i32_1 = arith.constant 0 : i32
    return %c0_i32, %c0_i32_0 : i32, i32
  }
  func.func @transform_5(%arg0: i32) -> (i32, i32) {
    %c0_i32 = arith.constant 0 : i32
    %c0_i32_0 = arith.constant 0 : i32
    %c0_i32_1 = arith.constant 0 : i32
    return %c0_i32, %c0_i32_0 : i32, i32
  }
  func.func @transform_6(%arg0: i32) -> (i32, i32) {
    %c0_i32 = arith.constant 0 : i32
    %c0_i32_0 = arith.constant 0 : i32
    %c0_i32_1 = arith.constant 0 : i32
    return %c0_i32, %c0_i32_0 : i32, i32
  }
  func.func @transform_7(%arg0: i32) -> (i32, i32) {
    %c0_i32 = arith.constant 0 : i32
    %c0_i32_0 = arith.constant 0 : i32
    %c0_i32_1 = arith.constant 0 : i32
    return %c0_i32, %c0_i32_0 : i32, i32
  }
  func.func @transform_8(%arg0: i32) -> (i32, i32) {
    %c0_i32 = arith.constant 0 : i32
    %c0_i32_0 = arith.constant 0 : i32
    %c0_i32_1 = arith.constant 0 : i32
    return %c0_i32, %c0_i32_0 : i32, i32
  }
  func.func @transform_9(%arg0: i32) -> (i32, i32) {
    %c0_i32 = arith.constant 0 : i32
    %c0_i32_0 = arith.constant 0 : i32
    %c0_i32_1 = arith.constant 0 : i32
    return %c0_i32, %c0_i32_0 : i32, i32
  }
  func.func @transform_10(%arg0: i32) -> (i32, i32) {
    %c0_i32 = arith.constant 0 : i32
    %c0_i32_0 = arith.constant 0 : i32
    %c0_i32_1 = arith.constant 0 : i32
    return %c0_i32, %c0_i32_0 : i32, i32
  }
  func.func @transform_11(%arg0: i32) -> (i32, i32) {
    %c0_i32 = arith.constant 0 : i32
    %c0_i32_0 = arith.constant 0 : i32
    %c0_i32_1 = arith.constant 0 : i32
    return %c0_i32, %c0_i32_0 : i32, i32
  }
  func.func @transform_12(%arg0: i32) -> (i32, i32) {
    %c0_i32 = arith.constant 0 : i32
    %c0_i32_0 = arith.constant 0 : i32
    return %arg0, %c0_i32 : i32, i32
  }
  func.func @transform_13(%arg0: i32) -> (i32, i32, i32) {
    %c0_i32 = arith.constant 0 : i32
    %c0_i32_0 = arith.constant 0 : i32
    %c0_i32_1 = arith.constant 0 : i32
    %c0_i32_2 = arith.constant 0 : i32
    return %c0_i32, %c0_i32_0, %c0_i32_1 : i32, i32, i32
  }
  func.func @transform_14(%arg0: i32) -> (i32, i32) {
    %c0_i32 = arith.constant 0 : i32
    %c0_i32_0 = arith.constant 0 : i32
    %c0_i32_1 = arith.constant 0 : i32
    return %c0_i32, %c0_i32_0 : i32, i32
  }
  func.func @transform_15(%arg0: i32) -> (i32, i32) {
    %c0_i32 = arith.constant 0 : i32
    %c0_i32_0 = arith.constant 0 : i32
    %c0_i32_1 = arith.constant 0 : i32
    return %c0_i32, %c0_i32_0 : i32, i32
  }
  func.func @transform_16(%arg0: i32) -> (i32, i32) {
    %c0_i32 = arith.constant 0 : i32
    %c0_i32_0 = arith.constant 0 : i32
    %c0_i32_1 = arith.constant 0 : i32
    return %c0_i32, %c0_i32_0 : i32, i32
  }
}

</mosaic_0001>

<bundles_post_ra>
// kernel: tpu_custom_call.1
= control target key start
LH: loop header
LB: loop body
LE: loop exit
PB: predicated region body
PF: predicated region fallthrough
CT: control target
= control target key end

     0   :  { %s5740_s0 = inlined_call_operand.vmem [shape: f32[64,3], index: 0, kind: input, shape index: {}]   ;;  %s5741_s1 = inlined_call_operand.vmem [shape: f32[8,6,8], index: 1, kind: input, shape index: {}]   ;;  %s5742_s2 = inlined_call_operand.vmem [shape: bf16[3,256], index: 2, kind: input, shape index: {}]   ;;  %s5743_s3 = inlined_call_operand.vmem [shape: f32[1,256], index: 3, kind: input, shape index: {}]   ;;  %s5744_s4 = inlined_call_operand.vmem [shape: f32[40,256], index: 4, kind: input, shape index: {}]   ;;  %s5745_s5 = inlined_call_operand.vmem [shape: f32[1,96], index: 5, kind: input, shape index: {}]   ;;  %s5746_s6 = inlined_call_operand.vmem [shape: f32[32,6], index: 6, kind: input, shape index: {}]   ;;  %s5747_s7 = inlined_call_operand.vmem [shape: f32[1,6], index: 7, kind: input, shape index: {}]   ;;  %s5748_s8 = inlined_call_operand.vmem [shape: f32[72,256], index: 8, kind: input, shape index: {}]   ;;  %s5749_s9 = inlined_call_operand.vmem [shape: f32[1,96], index: 9, kind: input, shape index: {}]   ;;  %s5750_s10 = inlined_call_operand.hbm [shape: bf16[160,128], index: 10, kind: input, shape index: {}]   ;;  %s5751_s11 = inlined_call_operand.vmem [shape: f32[1,128], index: 11, kind: input, shape index: {}]   ;;  %s5752_s12 = inlined_call_operand.hbm [shape: f32[64,128], index: 12, kind: output, shape index: {0}]   ;;  %s5753_s13 = inlined_call_operand.hbm [shape: f32[2,8,32], index: 13, kind: output, shape index: {1}]   ;;  %s5754_s14 = inlined_call_operand.vmem [shape: f32[8,2], index: 14, kind: output, shape index: {2}]   ;;  %s5755_s15 = inlined_call_operand.hbm [shape: f32[8,8], index: 15, kind: output, shape index: {3}]   ;;  %s5756_s16 = inlined_call_operand.hbm [shape: f32[8,7], index: 16, kind: output, shape index: {4}]  }
   0x1   :  { %5797 = sst [smem:[#allocation39_spill]] %s5740_s0 }
   0x2   :  { %5798 = sst [smem:[#allocation40_spill]] %s5741_s1 }
   0x3   :  { %5799 = sst [smem:[#allocation41_spill]] %s5750_s10 }
   0x4   :  { %22 = vsyncpa [#allocation9], 0 }
   0x5   :  { %23 = vsyncpa [#allocation10], 0 }
   0x6   :  { %25 = vsyncpa [#allocation10 + $0x1], 0 }
   0x7   :  { %26 = vsyncpa [#allocation13], 0 }
   0x8   :  { %27 = vsyncpa [#allocation16], 0  ;;  %s4636_s21 = smov 0   ;;  %s4638_s22 = smov 0  }
   0x9   :  { %s4640_s23 = smov 0   ;;  %s4642_s24 = smov 0  }
   0xa LB: > { %5800 = sst [smem:[#allocation21_spill]] %s4518_s21  ;;  %s4657_s25 = sadd.s32 4294967295, %s4530_s24   ;;  %s4530_s24 = sphi %s4642_s24, %s5868_s24   ;;  %s4526_s23 = sphi %s4640_s23, %s5870_s23   ;;  %s4522_s22 = sphi %s4638_s22, %s5872_s22   ;;  %s4518_s21 = sphi %s4636_s21, %s5871_s21  }
   0xb   : > { %5801 = sst [smem:[#allocation22_spill]] %s4526_s23  ;;  %s3874_s26 = sadd.s32 4294967294, %s4530_s24  }
   0xc   : > { %s4661_s27 = sadd.s32 1, %s4530_s24   ;;  %s297_s28 = sadd.s32 1, %s4526_s23 }
   0xd   : > { %5802 = sst [smem:[#allocation23_spill]] %s4661_s27  ;;  %s294_s29 = ssub.s32 %s4530_s24, %s4661_s27 }
   0xe   : > { %p307_p0 = scmp.ne.s32.totalorder %s4526_s23, %s4522_s22  ;;  %p295_p1 = scmp.eq.s32.totalorder %s294_s29, 0 }
   0xf   : > { %p5762_p2 = scmp.eq.s32.totalorder %s4657_s25, 1  ;;  %p313_p3 = scmp.ne.s32.totalorder %s4522_s22, %s4518_s21 }
  0x10   : > { %p314_p4 = scmp.eq.s32.totalorder %s3874_s26, 1  ;;  %p3875_p7 = scmp.ge.s32.totalorder %s4530_s24, 1 }
  0x11   : > { %s4672_s30 = scalar_select %p295_p1, %s4526_s23, %s297_s28  }
  0x12   : > { %p4676_p5 = por %p5762_p2, %p307_p0  ;;  %p4680_p6 = por %p314_p4, %p313_p3 }
  0x13   : > { %5803 = sst [smem:[#allocation24_spill]] %s4672_s30  ;;  %p405_p8 = scmp.lt.s32.totalorder %s4530_s24, 3 }
  0x14   : > { %s5804_s0 = scalar_select %p4676_p5, 1, 0 }
  0x15   : > { %s5805_s17 = scalar_select %p4680_p6, 1, 0 }
  0x16   : > { %p5763_p10 = scmp.eq.s32.totalorder %s4657_s25, 0  ;;  %p4688_p11 = pnand %p3875_p7, %p405_p8 }
  0x17   : > { %5806 = sst [smem:[#allocation25_spill]] %s5805_s17  ;;  %s4532_s19 = smov [#allocation8]  }
  0x18   : > { %s5807_s18 = scalar_select %p4688_p11, 1, 0 }
  0x19   : > { %s444_s20 = sshll.u32 %s4532_s19, 4  ;;  %p4137_p12 = pneg %p4688_p11  ;;  %s445_s20 = int_to_ptr.vmem [resolvable:$true] %s444_s20 }
  0x1a   : > { %s5809_s10 = sld [smem:[#allocation41_spill]] }
  0x1b   : > { %p4696_p13 = pnand %p5763_p10, %p4137_p12 }
  0x1d   : > { %p4352_p1 = pneg %p4696_p13 }
  0x20   : > { %s4350_s30 = scalar_lea.hbm %s5809_s10, 1280 }
  0x21   : > { %p4351_p0 = scmp.ne.s32.totalorder %s5809_s10, %s4350_s30  ;;  %p4357_p7 = scmp.lt.u32.totalorder %s4350_s30, %s5809_s10 }
  0x23   : > { %p4353_p3 = pnand %p4352_p1, %p4351_p0 }
  0x25   : > { %p4354_p4 = pneg %p4353_p3 }
  0x27   : > { %p4359_p8 = pnand %p4357_p7, %p4354_p4 }
  0x29   : > { %4362 = shalt.err (!%p4359_p8)
}
  0x2a   : > { %s4363_s21 = scalar_lea.vmem %s445_s20, 1280  ;;  %p4371_p10 = scmp.lt.s32.totalorder %s445_s20, %s445_s20 }
  0x2b   : > { %p4364_p12 = scmp.ne.s32.totalorder %s445_s20, %s4363_s21  ;;  %p4372_p6 = scmp.lt.s32.totalorder %s4363_s21, %s4363_s21 }
  0x2d   : > { %p4366_p2 = pnand %p4364_p12, %p4352_p1  ;;  %p4373_p5 = por %p4372_p6, %p4371_p10 }
  0x2f   : > { %p4367_p9 = pneg %p4366_p2 }
  0x31   : > { %p4374_p11 = pnand %p4373_p5, %p4367_p9 }
  0x33   : > { %4377 = shalt.err (!%p4374_p11)
}
  0x34   : > { %s4533_s23 = smov 64   ;;  %s4534_s27 = smov 4  }
  0x35   : > { %4140 = dma.hbm_to_vmem [thread:$0]  (!%p4696_p13), %s5809_s10, 1280, %s445_s20, [#allocation9], %s4533_s23, %s4533_s23, %s4534_s27  }
  0x36   : > { %p5810_p0 = scmp.ne.s32.totalorder %s5807_s18, 0 }
  0x38   : > { %472 = sbr.rel (%p5810_p0) target bundleno = 7128 (0x1bd8), region = 68 }
  0x3f   : > { %p5811_p3 = scmp.eq.s32.totalorder %s4657_s25, 0 }
  0x41   : > { %4501 = dma.done.wait (%p5811_p3), [#allocation9], 1280   ;;  %p5812_p2 = pmov %p5811_p3 }
  0x42   : > { %s5766_s21 = sand.u32 1, %s4522_s22   ;;  %s3881_s30 = sshll.u32 %s4657_s25, 2 }
  0x43   : > { %4503 = vsyncadd (%p5812_p2), [#allocation9], 4294966016  ;;  %s3880_s17 = sshll.u32 %s5766_s21, 5  ;;  %p523_p5 = scmp.lt.s32.totalorder %s3881_s30, 7 }
  0x44   : > { %s5813_s18 = sld [smem:[#allocation39_spill]]  ;;  %s4731_s27 = scalar_lea.vmem [#allocation11], %s3880_s17 }
  0x45   : > { %s5874_s30 = smov (!%p523_p5, %s3881_s30), 7  ;;  %p5814_p6 = scmp.ne.s32.totalorder %s4657_s25, 0 }
  0x46   : > { %s3882_s26 = sshll.u32 %s5874_s30, 3  ;;  %vm534_vm0 = vcmask (!%p5814_p6), 261120   ;;  %vm537_vm1 = vcmask (!%p5814_p6), 15360   ;;  %vm539_vm2 = vcmask (!%p5814_p6), 64512   ;;  %v4535_v0 = vmov (!%p5814_p6), 0.0  }
  0x47   : > { %533 = sbr.rel (%p5814_p6) target bundleno = 78 (0x4e), region = 76  ;;  %535 = vst.msk [vmem:[#allocation4] sm:$0xff] (!%p5814_p6), %vm534_vm0, %v4535_v0  ;;  %536 = vst.msk [vmem:[#allocation5] sm:$0xff] (!%p5814_p6), %vm534_vm0, %v4535_v0 }
  0x48   : > { %541 = vst [vmem:[#allocation3] sm:$0xff] (!%p5814_p6), %v4535_v0  ;;  %542 = vst.msk [vmem:[#allocation3 + $0x8] sm:$0xff] (!%p5814_p6), %vm534_vm0, %v4535_v0 }
  0x49   : > { %543 = vst [vmem:[#allocation3 + $0x10] sm:$0xff] (!%p5814_p6), %v4535_v0  ;;  %544 = vst.msk [vmem:[#allocation3 + $0x18] sm:$0xff] (!%p5814_p6), %vm534_vm0, %v4535_v0 }
  0x4a   : > { %s4729_s23 = scalar_lea.vmem %s5813_s18, %s3882_s26  ;;  %545 = vst [vmem:[#allocation3 + $0x20] sm:$0xff] (!%p5814_p6), %v4535_v0  ;;  %546 = vst.msk [vmem:[#allocation3 + $0x28] sm:$0xff] (!%p5814_p6), %vm534_vm0, %v4535_v0 }
  0x4b   : > { %547 = vst [vmem:[#allocation3 + $0x30] sm:$0xff] (!%p5814_p6), %v4535_v0  ;;  %548 = vst.msk [vmem:[#allocation3 + $0x38] sm:$0xff] (!%p5814_p6), %vm534_vm0, %v4535_v0 }
  0x4c   : > { %538 = vst.msk [vmem:[#allocation6] sm:$0xff] (!%p5814_p6), %vm537_vm1, %v4535_v0 }
  0x4d   : > { %540 = vst.msk [vmem:[#allocation7] sm:$0xff] (!%p5814_p6), %vm539_vm2, %v4535_v0 }
  0x4e PF: > { %v664_v2 = vld [vmem:[%s5744_s4 + $0x8] sm:$0xff]  ;;  %v666_v3 = vld [vmem:[%s5744_s4 + $0x18] sm:$0xff]  ;;  %vm584_vm3 = vcmask 1040384   ;;  %vm585_vm4 = vcmask 1041408   ;;  %s5767_s26 = smov 32   ;;  %v663_v5 = vld [vmem:[%s5744_s4] sm:$0xff]  ;;  %v558_v35 = vlaneseq }
  0x4f   : > { %v4742_v4 = vpack.c.bf16 %v666_v3, %v664_v2  ;;  %v665_v6 = vld [vmem:[%s5744_s4 + $0x10] sm:$0xff]  ;;  %v668_v7 = vld [vmem:[%s5744_s4 + $0x28] sm:$0xff]  ;;  %v670_v9 = vld [vmem:[%s5744_s4 + $0x38] sm:$0xff]  ;;  %v4537_v11 = vmov 65535   ;;  %v5769_v13 = vmov 0   ;;  %v5779_v25 = vmov 0.0  }
  0x50   : > { %v4753_v8 = vpack.c.bf16 %v665_v6, %v663_v5  ;;  %v3884_v10 = vld.sshfl [vmem:[%s5742_s2] sm:$0x33 pattern:$0x76325410]  ;;  %v586_v12 = vsel %vm584_vm3, 4294967295, %v4537_v11  ;;  %626 = vmatprep.mubr.bf16.mxu0 %v5769_v13  ;;  %v4763_v14 = vpack.c.bf16 %v670_v9, %v668_v7  ;;  %v669_v18 = vld [vmem:[%s5744_s4 + $0x30] sm:$0xff]  ;;  %777 = vmatprep.mubr.f32.mxu1 %v5779_v25 }
  0x51   : > { %4000 = vmatprep.subr.bf16.mxu1 %v4742_v4  ;;  %v576_v15 = vcombine.high %v3884_v10, %v3884_v10  ;;  %v587_v16 = vsel %vm585_vm4, %v586_v12, 0  ;;  %v667_v17 = vld [vmem:[%s5744_s4 + $0x20] sm:$0xff]  ;;  %v550_v22 = vld [vmem:[%s4729_s23 + $0x8] sm:$0xff]  ;;  %vm577_vm5 = vcmask 23552   ;;  %vm707_vm6 = vcmask 261120   ;;  %s5777_s19 = smov 64  }
  0x52   : > { %4002 = vmatpush1.bf16.msra.mxu1 %v4753_v8  ;;  %v4773_v19 = vpack.c.bf16 %v669_v18, %v667_v17  ;;  %v589_v20 = vand.u32 %v3884_v10, %v587_v16  ;;  %v549_v21 = vld [vmem:[%s4729_s23] sm:$0xff]  ;;  %v672_v24 = vld [vmem:[%s5744_s4 + $0x48] sm:$0xff]  ;;  %vm709_vm7 = vcmask 326656   ;;  %v4801_v36 = vshrl.u32 %v558_v35, 7  ;;  %s5815_s10 = smov 32   ;;  %v676_v57 = vld [vmem:[%s5746_s6 + $0x10] sm:$0xff] }
  0x53   : > { %4004 = vmatprep.subr.bf16.mxu1 %v4763_v14  ;;  %v592_v23 = vand.u32 %v587_v16, %v576_v15  ;;  %v553_v26 = vpack.c.bf16 %v550_v22, %v549_v21  ;;  %v671_v27 = vld [vmem:[%s5744_s4 + $0x40] sm:$0xff]  ;;  %v675_v56 = vld [vmem:[%s5746_s6 + $0x8] sm:$0xff]  ;;  %v5771_v58 = vmov 0.0|0.0   ;;  %v677_v60 = vld [vmem:[%s5746_s6 + $0x18] sm:$0xff]  ;;  %vm4542_vm8 = vmmov 0   ;;  %s5773_s29 = smov 124  }
  0x54   : > { %v702_v1 = vld [vmem:[#allocation7] sm:$0xff]  ;;  %v701_v28 = vld [vmem:[#allocation4] sm:$0xff]  ;;  %v4804_v37 = vsub.s32 0, %v4801_v36  ;;  %v4840_v61 = vpack.c.bf16 %v677_v60, %v676_v57  ;;  %v4865_v16 = vsub.s32 1, %v4801_v36  ;;  %v4875_v22 = vsub.s32 3, %v4801_v36  ;;  %s5820_s1 = sld [smem:[#allocation40_spill]] }
  0x55   : > { %704 = vrot.lane.b32.xlu0 %v702_v1, %s5767_s26  ;;  %594 = vmatprep.subr.bf16.mxu0 %v592_v23  ;;  %v556_v38 = vld [vmem:[%s5743_s3] sm:$0x3]  ;;  %s5775_s26 = smov 96   ;;  %vm1260_vm9 = vcmask 15360   ;;  %vm1112_vm10 = vcmask 50176   ;;  %vm1270_vm11 = vcmask 1041409  }
  0x56   : > { %4006 = vmatpush1.bf16.msra.mxu1 %v4773_v19  ;;  %595 = vmatpush1.bf16.msra.mxu0 %v589_v20  ;;  %v4810_v39 = vrot.slane %v556_v38, %v4804_v37  ;;  %v4816_v41 = vld [vmem:[%s5745_s5] ss:$0 sm:$0xff]  ;;  %v4871_v20 = vsub.s32 2, %v4801_v36  ;;  %vm1272_vm12 = vcmask 1042434   ;;  %vm1274_vm13 = vcmask 1043459   ;;  %s5825_s28 = smov 64  }
  0x57   : > { %721 = vmatprep.subr.mxu1 %v672_v24  ;;  %4014 = vmatprep.subr.bf16.mxu0 %v4742_v4  ;;  %v674_v55 = vld [vmem:[%s5746_s6] sm:$0xff]  ;;  %vm1276_vm14 = vcmask 1044484   ;;  %vm1278_vm15 = vcmask 1045509   ;;  %vm1280_vm0 = vcmask 1046534   ;;  %vm1282_vm1 = vcmask 1047559   ;;  %s5826_s30 = smov 96  }
  0x58   : > { %v4832_v59 = vpack.c.bf16 %v675_v56, %v674_v55  ;;  %v4861_v7 = vld [vmem:[%s5747_s7] ss:$0 sm:$0xff]  ;;  %v699_v55 = vand.u32 127, %v558_v35  ;;  %vm1308_vm2 = vcmask 56320   ;;  %vm1201_vm3 = vcmask 62464   ;;  %p5849_p10 = scmp.eq.s32.totalorder %s4657_s25, 1 }
  0x59   : > { %3885 = vmatmul.mubr.msk.bf16.vlgmr.msra.gmra.mrb[0].mxu0 %vm577_vm5, %v553_v26  ;;  %vm1285_vm4 = vcmask 64512  }
  0x5a   : > { %722 = vmatpush1.msra.mxu1 %v671_v27  ;;  %4016 = vmatpush1.bf16.msra.mxu0 %v4753_v8  ;;  %v4904_v60 = vcvt.s32.f32 %v699_v55 }
  0x5b   : > { %636 = vmatprep.mubr.bf16.mxu0 %v5769_v13  ;;  %4018 = vmatprep.subr.bf16.mxu0 %v4763_v14 }
  0x5c   : > { %4007 = vmatprep.subr.bf16.mxu1 %v5771_v58  ;;  %5819 = vst [vmem:[#allocation29_spill] sm:$0xff] %v4904_v60 }
  0x5e   : > { %4020 = vmatpush1.bf16.msra.mxu0 %v4773_v19 }
  0x5f   : > { %1328 = vmatprep.subr.mxu0 %v672_v24  ;;  %v4879_v24 = vsub.s32 4, %v4801_v36 }
  0x62   : > { %1329 = vmatpush1.msra.mxu0 %v671_v27  ;;  %v4883_v27 = vsub.s32 5, %v4801_v36 }
  0x64   : > { %5816 = vst [vmem:[#allocation26_spill] sm:$0xff] %v4883_v27 }
  0xc7   : > { %v705_v29 = vpop.permute.xlu0 %704 }
  0xc8   : > { %v708_v30 = vsel %vm707_vm6, %v701_v28, %v705_v29  ;;  %v906_v29 = vld [vmem:[#allocation6] sm:$0xff] }
  0xc9   : > { %3887 = vmatmul.mubr.msk.f32.vlgmr.msra.gmra.mrb[0].mxu1 %vm709_vm7, %v708_v30 }
  0xca   : > { %3963 = vmatprep.mubr.msk.f32.mxu1 %vm4542_vm8, %v5779_v25  ;;  %4009 = vmatpush3.bf16.msra.mxu1 %v4832_v59 }
  0xcb   : > { %4010 = vmatprep.subr.bf16.mxu1 %v5771_v58 }
  0xce   : > { %4012 = vmatpush3.bf16.msra.mxu1 %v4840_v61 }
  0xcf   : > { %4021 = vmatprep.subr.bf16.mxu1 %v5771_v58 }
 0x12c   : > { %v628_v31 = vpop.f32.mrb[0].mxu0 }
 0x12d   : > { %v4794_v32 = vpop.f32.mrb[1].mxu0  ;;  %v629_v40 = vadd.f32 %v628_v31, %v4810_v39 }
 0x12e   : > { %v4796_v33 = vpop.f32.mrb[2].mxu0 }
 0x12f   : > { %v4798_v34 = vpop.f32.mrb[3].mxu0 }
 0x19c   : > { %v779_v42 = vpop.f32.mrb[0].mxu1 }
 0x19d   : > { %v790_v43 = vadd.f32 %v4816_v41, %v779_v42  ;;  %v781_v44 = vpop.f32.mrb[1].mxu1  ;;  %v4890_v42 = vsub.s32 6, %v4801_v36 }
 0x19e   : > { %v792_v45 = vadd.f32 %v781_v44, %v629_v40 }
 0x19f   : > { %801 = vrot.lane.b32.xlu0 %v790_v43, %s5777_s19  ;;  %5817 = vst [vmem:[#allocation27_spill] sm:$0xff] %v4890_v42 }
 0x1a0   : > { %v793_v46 = vadd.f32 %v792_v45, %v790_v43 }
 0x1a2   : > { %v3889_v47 = vmul.f32 -1.442695, %v793_v46 }
 0x1a3   : > { %818 = vrot.lane.b32.xlu0 %v701_v28, %s5815_s10 }
 0x1a4   : > { %4214 = vpow2.f32 %v3889_v47 }
 0x1ae   : > { %v4215_v48 = vpop.eup %4214 }
 0x1af   : > { %v797_v49 = vadd.f32 1.0, %v4215_v48 }
 0x1b1   : > { %4216 = vrcp.f32 %v797_v49 }
 0x1bb   : > { %v4217_v50 = vpop.eup %4216 }
 0x1bc   : > { %v811_v0 = vsub.f32 1.0, %v4217_v50 }
 0x211   : > { %v802_v51 = vpop.permute.xlu0 %801 }
 0x212   : > { %v804_v52 = vmul.f32 %v4217_v50, %v802_v51 }
 0x214   : > { %806 = vrot.lane.b32.xlu1 %v804_v52, %s5777_s19 }
 0x215   : > { %v819_v63 = vpop.permute.xlu0 %818 }
 0x216   : > { %v821_v2 = vmul.f32 %v4217_v50, %v819_v63 }
 0x286   : > { %v807_v53 = vpop.permute.xlu1 %806 }
 0x287   : > { %v809_v54 = vadd.f32 %v807_v53, %v792_v45  ;;  %v4895_v45 = vsub.s32 7, %v4801_v36 }
 0x289   : > { %4218 = vtanh.f32 %v809_v54  ;;  %5818 = vst [vmem:[#allocation28_spill] sm:$0xff] %v4895_v45 }
 0x293   : > { %v4219_v62 = vpop.eup %4218 }
 0x294   : > { %813 = vrot.lane.b32.xlu1 %v4219_v62, %s5775_s26 }
 0x306   : > { %v814_v1 = vpop.permute.xlu1 %813 }
 0x307   : > { %v816_v3 = vmul.f32 %v814_v1, %v811_v0 }
 0x309   : > { %v822_v5 = vadd.f32 %v821_v2, %v816_v3 }
 0x30b   : > { %830 = vrot.lane.b32.xlu1 %v822_v5, %s5775_s26 }
 0x37d   : > { %v4847_v6 = vpop.permute.xlu1 %830 }
 0x37e   : > { %1259 = vst.msk [vmem:[#allocation4] sm:$0xff] %vm707_vm6, %v4847_v6  ;;  %3964 = vmatmul.mubr.msk.f32.vlgmr.msra.gmra.mrb[2].mxu1 %vm707_vm6, %v4847_v6 }
 0x37f   : > { %4023 = vmatpush3.bf16.msra.mxu1 %v4832_v59  ;;  %3974 = vmatprep.mubr.msk.f32.mxu1 %vm4542_vm8, %v5779_v25 }
 0x380   : > { %4024 = vmatprep.subr.bf16.mxu1 %v5771_v58 }
 0x383   : > { %4026 = vmatpush3.bf16.msra.mxu1 %v4840_v61 }
 0x451   : > { %v900_v9 = vpop.f32.mrb[2].mxu1 }
 0x452   : > { %v901_v10 = vadd.f32 %v4861_v7, %v900_v9  ;;  %v3965_v11 = vpop.f32.mrb[3].mxu1 }
 0x454   : > { %v904_v12 = vmul.f32 1.442695, %v901_v10 }
 0x456   : > { %4220 = vpow2.f32 %v904_v12 }
 0x460   : > { %v4221_v15 = vpop.eup %4220 }
 0x461   : > { %908 = vrot.lane.b32.xlu0 %v4221_v15, %s5773_s29  ;;  %v979_v17 = vrot.slane %v4221_v15, %v4804_v37  ;;  %v986_v18 = vrot.slane %v4221_v15, %v4865_v16  ;;  %v993_v21 = vrot.slane %v4221_v15, %v4871_v20  ;;  %v1000_v23 = vrot.slane %v4221_v15, %v4875_v22 }
 0x462   : > { %v1007_v26 = vrot.slane %v4221_v15, %v4879_v24  ;;  %v1014_v28 = vrot.slane %v4221_v15, %v4883_v27  ;;  %v1021_v43 = vrot.slane %v4221_v15, %v4890_v42  ;;  %v1028_v46 = vrot.slane %v4221_v15, %v4895_v45 }
 0x463   : > { %1034 = vbcast.lane.b32.xlu1 %v979_v17, 258 }
 0x465   : > { %1038 = vbcast.lane.b32.xlu0 %v986_v18, 258 }
 0x469   : > { %1042 = vbcast.lane.b32.xlu0 %v993_v21, 258 }
 0x46d   : > { %1046 = vbcast.lane.b32.xlu0 %v1000_v23, 258 }
 0x471   : > { %1050 = vbcast.lane.b32.xlu0 %v1007_v26, 258 }
 0x475   : > { %1054 = vbcast.lane.b32.xlu0 %v1014_v28, 258 }
 0x4d3   : > { %v909_v30 = vpop.permute.xlu0 %908 }
 0x4d4   : > { %v911_v31 = vadd.f32 %v909_v30, %v906_v29 }
 0x4d5   : > { %v1035_v56 = vpop.permute.xlu1 %1034 }
 0x4d6   : > { %1261 = vst.msk [vmem:[#allocation6] sm:$0xff] %vm1260_vm9, %v911_v31  ;;  %v922_v38 = vrot.slane %v911_v31, %v4865_v16  ;;  %v915_v40 = vrot.slane %v911_v31, %v4804_v37  ;;  %v929_v44 = vrot.slane %v911_v31, %v4871_v20  ;;  %v936_v47 = vrot.slane %v911_v31, %v4875_v22 }
 0x4d7   : > { %v943_v48 = vrot.slane %v911_v31, %v4879_v24  ;;  %v950_v49 = vrot.slane %v911_v31, %v4883_v27  ;;  %v957_v50 = vrot.slane %v911_v31, %v4890_v42  ;;  %v964_v36 = vrot.slane %v911_v31, %v4895_v45  ;;  %v1039_v51 = vpop.permute.xlu0 %1038 }
 0x4d8   : > { %924 = vbcast.lane.b32.xlu0 %v922_v38, 256  ;;  %917 = vbcast.lane.b32.xlu1 %v915_v40, 256  ;;  %v1065_v0 = vsub.f32 0.0, %v1039_v51  ;;  %v1064_v5 = vsub.f32 0.0, %v1035_v56 }
 0x4db   : > { %v1043_v52 = vpop.permute.xlu0 %1042 }
 0x4dc   : > { %1058 = vbcast.lane.b32.xlu0 %v1021_v43, 258  ;;  %931 = vbcast.lane.b32.xlu1 %v929_v44, 256 }
 0x4df   : > { %v1047_v53 = vpop.permute.xlu0 %1046 }
 0x4e0   : > { %1062 = vbcast.lane.b32.xlu0 %v1028_v46, 258  ;;  %938 = vbcast.lane.b32.xlu1 %v936_v47, 256 }
 0x4e3   : > { %v1051_v54 = vpop.permute.xlu0 %1050 }
 0x4e4   : > { %988 = vbcast.lane.b32.xlu0 %v986_v18, 256  ;;  %945 = vbcast.lane.b32.xlu1 %v943_v48, 256  ;;  %v1068_v31 = vsub.f32 0.0, %v1051_v54 }
 0x4e7   : > { %v1055_v57 = vpop.permute.xlu0 %1054 }
 0x4e8   : > { %1002 = vbcast.lane.b32.xlu0 %v1000_v23, 256  ;;  %952 = vbcast.lane.b32.xlu1 %v950_v49, 256 }
 0x4ec   : > { %1016 = vbcast.lane.b32.xlu0 %v1014_v28, 256  ;;  %959 = vbcast.lane.b32.xlu1 %v957_v50, 256  ;;  %v1069_v50 = vsub.f32 0.0, %v1055_v57 }
 0x4f0   : > { %1030 = vbcast.lane.b32.xlu0 %v1028_v46, 256  ;;  %966 = vbcast.lane.b32.xlu1 %v964_v36, 256 }
 0x4f4   : > { %981 = vbcast.lane.b32.xlu1 %v979_v17, 256  ;;  %v1066_v17 = vsub.f32 0.0, %v1043_v52 }
 0x4f8   : > { %995 = vbcast.lane.b32.xlu1 %v993_v21, 256  ;;  %v1067_v21 = vsub.f32 0.0, %v1047_v53 }
 0x4fc   : > { %1009 = vbcast.lane.b32.xlu1 %v1007_v26, 256 }
 0x500   : > { %1023 = vbcast.lane.b32.xlu1 %v1021_v43, 256 }
 0x54a   : > { %v925_v62 = vpop.permute.xlu0 %924  ;;  %v918_v63 = vpop.permute.xlu1 %917 }
 0x54b   : > { %v969_v1 = vsub.f32 %v925_v62, %v4904_v60  ;;  %v968_v2 = vsub.f32 %v918_v63, %v4904_v60 }
 0x54d   : > { %v1073_v3 = vmul.f32 %v1065_v0, %v969_v1  ;;  %v1072_v11 = vmul.f32 %v1064_v5, %v968_v2 }
 0x54e   : > { %v932_v9 = vpop.permute.xlu1 %931  ;;  %v1059_v35 = vpop.permute.xlu0 %1058 }
 0x54f   : > { %v1081_v10 = vmul.f32 %v1073_v3, %v969_v1  ;;  %v970_v12 = vsub.f32 %v932_v9, %v4904_v60  ;;  %v1080_v26 = vmul.f32 %v1072_v11, %v968_v2  ;;  %v1070_v63 = vsub.f32 0.0, %v1059_v35 }
 0x551   : > { %v1090_v15 = vmul.f32 1.442695, %v1081_v10  ;;  %v1074_v28 = vmul.f32 %v1066_v17, %v970_v12  ;;  %v1088_v44 = vmul.f32 1.442695, %v1080_v26 }
 0x552   : > { %v939_v18 = vpop.permute.xlu1 %938  ;;  %v1063_v38 = vpop.permute.xlu0 %1062 }
 0x553   : > { %4222 = vpow2.f32 %v1090_v15  ;;  %v971_v23 = vsub.f32 %v939_v18, %v4904_v60  ;;  %v1082_v46 = vmul.f32 %v1074_v28, %v970_v12  ;;  %v1071_v10 = vsub.f32 0.0, %v1063_v38 }
 0x555   : > { %v1075_v29 = vmul.f32 %v1067_v21, %v971_v23  ;;  %v1092_v51 = vmul.f32 1.442695, %v1082_v46 }
 0x556   : > { %v946_v30 = vpop.permute.xlu1 %945  ;;  %v989_v55 = vpop.permute.xlu0 %988 }
 0x557   : > { %v1083_v40 = vmul.f32 %v1075_v29, %v971_v23  ;;  %v972_v43 = vsub.f32 %v946_v30, %v4904_v60 }
 0x559   : > { %v1094_v47 = vmul.f32 1.442695, %v1083_v40  ;;  %v1076_v48 = vmul.f32 %v1068_v31, %v972_v43 }
 0x55a   : > { %v953_v49 = vpop.permute.xlu1 %952  ;;  %v1003_v35 = vpop.permute.xlu0 %1002 }
 0x55b   : > { %4224 = vpow2.f32 %v1094_v47  ;;  %v973_v36 = vsub.f32 %v953_v49, %v4904_v60  ;;  %v1084_v52 = vmul.f32 %v1076_v48, %v972_v43 }
 0x55c   : > { %4226 = vpow2.f32 %v1088_v44 }
 0x55d   : > { %v4223_v53 = vpop.eup %4222  ;;  %v1077_v54 = vmul.f32 %v1069_v50, %v973_v36  ;;  %4228 = vpow2.f32 %v1092_v51  ;;  %v1096_v57 = vmul.f32 1.442695, %v1084_v52 }
 0x55e   : > { %v1105_v56 = vmul.f32 %v4223_v53, %v989_v55  ;;  %v960_v62 = vpop.permute.xlu1 %959 }
 0x55f   : > { %v1085_v0 = vmul.f32 %v1077_v54, %v973_v36  ;;  %v974_v1 = vsub.f32 %v960_v62, %v4904_v60 }
 0x560   : > { %v1120_v2 = vsel %vm1112_vm10, %v1105_v56, 0.0  ;;  %v1017_v56 = vpop.permute.xlu0 %1016 }
 0x561   : > { %v1121_v3 = vrot.slane %v1120_v2, 4  ;;  %v1098_v5 = vmul.f32 1.442695, %v1085_v0  ;;  %v1078_v9 = vmul.f32 %v1070_v63, %v974_v1 }
 0x562   : > { %v967_v11 = vpop.permute.xlu1 %966 }
 0x563   : > { %v1122_v12 = vadd.f32 %v1121_v3, %v1120_v2  ;;  %4230 = vpow2.f32 %v1098_v5  ;;  %v1086_v15 = vmul.f32 %v1078_v9, %v974_v1  ;;  %v975_v17 = vsub.f32 %v967_v11, %v4904_v60 }
 0x564   : > { %4232 = vpow2.f32 %v1096_v57 }
 0x565   : > { %v4225_v18 = vpop.eup %4224  ;;  %v1100_v21 = vmul.f32 1.442695, %v1086_v15  ;;  %v1079_v23 = vmul.f32 %v1071_v10, %v975_v17  ;;  %v1123_v26 = vrot.slane %v1122_v12, 2 }
 0x566   : > { %v4227_v28 = vpop.eup %4226  ;;  %v1107_v29 = vmul.f32 %v4225_v18, %v1003_v35  ;;  %v982_v30 = vpop.permute.xlu1 %981 }
 0x567   : > { %4234 = vpow2.f32 %v1100_v21  ;;  %v1087_v31 = vmul.f32 %v1079_v23, %v975_v17  ;;  %v1104_v40 = vmul.f32 %v4227_v28, %v982_v30  ;;  %v1124_v43 = vadd.f32 %v1123_v26, %v1122_v12  ;;  %v4229_v49 = vpop.eup %4228 }
 0x568   : > { %v1134_v38 = vsel %vm1112_vm10, %v1107_v29, 0.0 }
 0x569   : > { %v1135_v44 = vrot.slane %v1134_v38, 4  ;;  %v1102_v46 = vmul.f32 1.442695, %v1087_v31  ;;  %v1113_v47 = vsel %vm1112_vm10, %v1104_v40, 0.0  ;;  %v1125_v48 = vrot.slane %v1124_v43, 1 }
 0x56a   : > { %v1114_v50 = vrot.slane %v1113_v47, 4  ;;  %v996_v36 = vpop.permute.xlu1 %995 }
 0x56b   : > { %v1136_v51 = vadd.f32 %v1135_v44, %v1134_v38  ;;  %4236 = vpow2.f32 %v1102_v46  ;;  %v1106_v52 = vmul.f32 %v4229_v49, %v996_v36  ;;  %v1126_v53 = vadd.f32 %v1125_v48, %v1124_v43  ;;  %v1031_v48 = vpop.permute.xlu0 %1030 }
 0x56c   : > { %v1115_v55 = vadd.f32 %v1114_v50, %v1113_v47 }
 0x56d   : > { %v4231_v54 = vpop.eup %4230  ;;  %v1127_v62 = vsel %vm1112_vm10, %v1106_v52, 0.0  ;;  %1173 = vbcast.lane.b32.xlu0 %v1126_v53, 256  ;;  %v1137_v63 = vrot.slane %v1136_v51, 2 }
 0x56e   : > { %v4233_v0 = vpop.eup %4232  ;;  %v1109_v1 = vmul.f32 %v4231_v54, %v1017_v56  ;;  %v1128_v2 = vrot.slane %v1127_v62, 4  ;;  %v1010_v57 = vpop.permute.xlu1 %1009  ;;  %v1116_v3 = vrot.slane %v1115_v55, 2 }
 0x56f   : > { %v1108_v5 = vmul.f32 %v4233_v0, %v1010_v57  ;;  %v1138_v9 = vadd.f32 %v1137_v63, %v1136_v51 }
 0x570   : > { %v1148_v10 = vsel %vm1112_vm10, %v1109_v1, 0.0  ;;  %v1129_v11 = vadd.f32 %v1128_v2, %v1127_v62  ;;  %v1117_v12 = vadd.f32 %v1116_v3, %v1115_v55 }
 0x571   : > { %v4235_v15 = vpop.eup %4234  ;;  %v1149_v17 = vrot.slane %v1148_v10, 4  ;;  %v1141_v18 = vsel %vm1112_vm10, %v1108_v5, 0.0  ;;  %v1139_v35 = vrot.slane %v1138_v9, 1 }
 0x572   : > { %v1142_v21 = vrot.slane %v1141_v18, 4  ;;  %v1024_v23 = vpop.permute.xlu1 %1023  ;;  %v1118_v26 = vrot.slane %v1117_v12, 1  ;;  %v1130_v28 = vrot.slane %v1129_v11, 2 }
 0x573   : > { %v1150_v29 = vadd.f32 %v1149_v17, %v1148_v10  ;;  %v1110_v30 = vmul.f32 %v4235_v15, %v1024_v23  ;;  %v1140_v31 = vadd.f32 %v1139_v35, %v1138_v9 }
 0x574   : > { %v1143_v40 = vadd.f32 %v1142_v21, %v1141_v18  ;;  %v1119_v43 = vadd.f32 %v1118_v26, %v1117_v12  ;;  %v1131_v38 = vadd.f32 %v1130_v28, %v1129_v11 }
 0x575   : > { %v4237_v44 = vpop.eup %4236  ;;  %v1155_v46 = vsel %vm1112_vm10, %v1110_v30, 0.0  ;;  %1179 = vbcast.lane.b32.xlu0 %v1140_v31, 256  ;;  %v1151_v47 = vrot.slane %v1150_v29, 2  ;;  %v551_v30 = vld [vmem:[%s4729_s23 + $0x10] sm:$0xff] }
 0x576   : > { %v1156_v49 = vrot.slane %v1155_v46, 4  ;;  %1170 = vbcast.lane.b32.xlu1 %v1119_v43, 256  ;;  %v1132_v50 = vrot.slane %v1131_v38, 1  ;;  %v1144_v36 = vrot.slane %v1143_v40, 2  ;;  %v1111_v52 = vmul.f32 %v4237_v44, %v1031_v48  ;;  %v4949_v48 = vld [vmem:[%s5820_s1] sm:$0x3f] }
 0x577   : > { %v1152_v51 = vadd.f32 %v1151_v47, %v1150_v29  ;;  %v1300_v3 = vsel %vm1270_vm11, %v1126_v53, %v1119_v43  ;;  %v4937_v43 = vld [vmem:[%s5820_s1 + $0x8] sm:$0x3f]  ;;  %v4944_v47 = vld [vmem:[%s5820_s1 + $0x18] sm:$0x3f] }
 0x578   : > { %v1157_v55 = vadd.f32 %v1156_v49, %v1155_v46  ;;  %v1133_v54 = vadd.f32 %v1132_v50, %v1131_v38  ;;  %v1145_v56 = vadd.f32 %v1144_v36, %v1143_v40  ;;  %v1162_v63 = vsel %vm1112_vm10, %v1111_v52, 0.0 }
 0x579   : > { %v1153_v62 = vrot.slane %v1152_v51, 1  ;;  %v1163_v2 = vrot.slane %v1162_v63, 4 }
 0x57a   : > { %1176 = vbcast.lane.b32.xlu1 %v1133_v54, 256  ;;  %v1146_v0 = vrot.slane %v1145_v56, 1  ;;  %v1158_v1 = vrot.slane %v1157_v55, 2  ;;  %v1301_v11 = vsel %vm1272_vm12, %v1133_v54, %v1300_v3  ;;  %v4957_v54 = vld [vmem:[%s5820_s1 + $0x10] sm:$0x3f] }
 0x57b   : > { %v1154_v57 = vadd.f32 %v1153_v62, %v1152_v51  ;;  %v1164_v10 = vadd.f32 %v1163_v2, %v1162_v63  ;;  %v1302_v17 = vsel %vm1274_vm13, %v1140_v31, %v1301_v11  ;;  %v552_v31 = vld [vmem:[%s4729_s23 + $0x18] sm:$0xff] }
 0x57c   : > { %v1147_v5 = vadd.f32 %v1146_v0, %v1145_v56  ;;  %v1159_v9 = vadd.f32 %v1158_v1, %v1157_v55  ;;  %v554_v40 = vpack.c.bf16 %v552_v31, %v551_v30 }
 0x57d   : > { %1185 = vbcast.lane.b32.xlu0 %v1154_v57, 256  ;;  %v1165_v15 = vrot.slane %v1164_v10, 2 }
 0x57e   : > { %1182 = vbcast.lane.b32.xlu1 %v1147_v5, 256  ;;  %v1160_v12 = vrot.slane %v1159_v9, 1  ;;  %v1303_v21 = vsel %vm1276_vm14, %v1147_v5, %v1302_v17  ;;  %3886 = vmatmul.mubr.msk.bf16.gmra.mrb[4].mxu0 %vm577_vm5, %v554_v40  ;;  %v4969_v5 = vld [vmem:[%s5820_s1 + $0x20] sm:$0x3f]  ;;  %vm1900_vm5 = vcmask 588800  }
 0x57f   : > { %v1166_v35 = vadd.f32 %v1165_v15, %v1164_v10  ;;  %v1304_v23 = vsel %vm1278_vm15, %v1154_v57, %v1303_v21  ;;  %1384 = vmatprep.mubr.f32.mxu0 %v5779_v25  ;;  %v4964_v57 = vld [vmem:[%s5820_s1 + $0x28] sm:$0x3f] }
 0x580   : > { %v1161_v18 = vadd.f32 %v1160_v12, %v1159_v9 }
 0x581   : > { %v1167_v53 = vrot.slane %v1166_v35, 1 }
 0x582   : > { %1188 = vbcast.lane.b32.xlu1 %v1161_v18, 256  ;;  %v1305_v28 = vsel %vm1280_vm0, %v1161_v18, %v1304_v23 }
 0x583   : > { %v1168_v26 = vadd.f32 %v1167_v53, %v1166_v35 }
 0x585   : > { %1191 = vbcast.lane.b32.xlu0 %v1168_v26, 256  ;;  %v1306_v29 = vsel %vm1282_vm1, %v1168_v26, %v1305_v28  ;;  %v4978_v28 = vld [vmem:[%s5820_s1 + $0x30] sm:$0x3f] }
 0x586   : > { %1309 = vst.msk [vmem:[#allocation15] sm:$0xff] %vm1308_vm2, %v1306_v29 }
 0x5df   : > { %v1174_v38 = vpop.permute.xlu0 %1173 }
 0x5e0   : > { %v1194_v44 = vmul.f32 %v1174_v38, %v4937_v43 }
 0x5e2   : > { %v1209_v46 = vsel %vm1201_vm3, %v1194_v44, 0.0 }
 0x5e3   : > { %v1210_v49 = vrot.slane %v1209_v46, 4 }
 0x5e5   : > { %v1211_v56 = vadd.f32 %v1210_v49, %v1209_v46 }
 0x5e7   : > { %v1180_v50 = vpop.permute.xlu0 %1179  ;;  %v1212_v9 = vrot.slane %v1211_v56, 2 }
 0x5e8   : > { %v1196_v36 = vmul.f32 %v1180_v50, %v4944_v47  ;;  %v1171_v51 = vpop.permute.xlu1 %1170 }
 0x5e9   : > { %v1193_v52 = vmul.f32 %v1171_v51, %v4949_v48  ;;  %v1213_v29 = vadd.f32 %v1212_v9, %v1211_v56 }
 0x5ea   : > { %v1223_v55 = vsel %vm1201_vm3, %v1196_v36, 0.0 }
 0x5eb   : > { %v1224_v62 = vrot.slane %v1223_v55, 4  ;;  %v1202_v63 = vsel %vm1201_vm3, %v1193_v52, 0.0 }
 0x5ec   : > { %v1203_v0 = vrot.slane %v1202_v63, 4  ;;  %v1177_v1 = vpop.permute.xlu1 %1176 }
 0x5ed   : > { %v1195_v2 = vmul.f32 %v1177_v1, %v4957_v54  ;;  %v1225_v10 = vadd.f32 %v1224_v62, %v1223_v55  ;;  %v4985_v55 = vld [vmem:[%s5820_s1 + $0x38] sm:$0x3f]  ;;  %v1214_v62 = vrot.slane %v1213_v29, 1 }
 0x5ee   : > { %v1204_v3 = vadd.f32 %v1203_v0, %v1202_v63 }
 0x5ef   : > { %v1216_v11 = vsel %vm1201_vm3, %v1195_v2, 0.0  ;;  %v1186_v12 = vpop.permute.xlu0 %1185  ;;  %v1226_v30 = vrot.slane %v1225_v10, 2 }
 0x5f0   : > { %v1205_v15 = vrot.slane %v1204_v3, 2  ;;  %v1217_v17 = vrot.slane %v1216_v11, 4  ;;  %v1198_v18 = vmul.f32 %v1186_v12, %v4964_v57  ;;  %v1183_v35 = vpop.permute.xlu1 %1182 }
 0x5f1   : > { %v1197_v21 = vmul.f32 %v1183_v35, %v4969_v5  ;;  %v1227_v56 = vadd.f32 %v1226_v30, %v1225_v10 }
 0x5f2   : > { %v1206_v53 = vadd.f32 %v1205_v15, %v1204_v3  ;;  %v1218_v23 = vadd.f32 %v1217_v17, %v1216_v11  ;;  %v1237_v26 = vsel %vm1201_vm3, %v1198_v18, 0.0  ;;  %v1215_v18 = vadd.f32 %v1214_v62, %v1213_v29 }
 0x5f3   : > { %v1238_v31 = vrot.slane %v1237_v26, 4  ;;  %v1230_v40 = vsel %vm1201_vm3, %v1197_v21, 0.0  ;;  %v1228_v35 = vrot.slane %v1227_v56, 1 }
 0x5f4   : > { %v1219_v38 = vrot.slane %v1218_v23, 2  ;;  %v1231_v44 = vrot.slane %v1230_v40, 4  ;;  %v1189_v46 = vpop.permute.xlu1 %1188  ;;  %v1207_v36 = vrot.slane %v1206_v53, 1 }
 0x5f5   : > { %v1239_v49 = vadd.f32 %v1238_v31, %v1237_v26  ;;  %v1199_v50 = vmul.f32 %v1189_v46, %v4978_v28 }
 0x5f6   : > { %v1220_v51 = vadd.f32 %v1219_v38, %v1218_v23  ;;  %v1232_v52 = vadd.f32 %v1231_v44, %v1230_v40  ;;  %v1208_v12 = vadd.f32 %v1207_v36, %v1206_v53 }
 0x5f7   : > { %v1244_v63 = vsel %vm1201_vm3, %v1199_v50, 0.0  ;;  %v1240_v1 = vrot.slane %v1239_v49, 2  ;;  %v1192_v9 = vpop.permute.xlu0 %1191 }
 0x5f8   : > { %v1221_v0 = vrot.slane %v1220_v51, 1  ;;  %v1233_v2 = vrot.slane %v1232_v52, 2  ;;  %v1245_v3 = vrot.slane %v1244_v63, 4  ;;  %v1200_v11 = vmul.f32 %v1192_v9, %v4985_v55 }
 0x5f9   : > { %v1241_v26 = vadd.f32 %v1240_v1, %v1239_v49  ;;  %v1271_v40 = vsel %vm1270_vm11, %v1215_v18, %v1208_v12  ;;  %v1229_v9 = vadd.f32 %v1228_v35, %v1227_v56 }
 0x5fa   : > { %v1234_v15 = vadd.f32 %v1233_v2, %v1232_v52  ;;  %v1246_v17 = vadd.f32 %v1245_v3, %v1244_v63  ;;  %v1222_v21 = vadd.f32 %v1221_v0, %v1220_v51  ;;  %v1251_v23 = vsel %vm1201_vm3, %v1200_v11, 0.0 }
 0x5fb   : > { %v1252_v30 = vrot.slane %v1251_v23, 4  ;;  %v1242_v53 = vrot.slane %v1241_v26, 1 }
 0x5fc   : > { %v1235_v31 = vrot.slane %v1234_v15, 1  ;;  %v1247_v10 = vrot.slane %v1246_v17, 2  ;;  %v1273_v46 = vsel %vm1272_vm12, %v1222_v21, %v1271_v40  ;;  %v1310_v21 = vld [vmem:[#allocation4] sm:$0xff] }
 0x5fd   : > { %v1253_v44 = vadd.f32 %v1252_v30, %v1251_v23  ;;  %v1275_v29 = vsel %vm1274_vm13, %v1229_v9, %v1273_v46  ;;  %v1243_v63 = vadd.f32 %v1242_v53, %v1241_v26  ;;  %v633_v26 = vadd.f32 %v4796_v33, %v4810_v39 }
 0x5fe   : > { %v1248_v38 = vadd.f32 %v1247_v10, %v1246_v17  ;;  %v1236_v50 = vadd.f32 %v1235_v31, %v1234_v15 }
 0x5ff   : > { %v1254_v52 = vrot.slane %v1253_v44, 2 }
 0x600   : > { %v1249_v36 = vrot.slane %v1248_v38, 1  ;;  %v1277_v62 = vsel %vm1276_vm14, %v1236_v50, %v1275_v29 }
 0x601   : > { %v1255_v51 = vadd.f32 %v1254_v52, %v1253_v44  ;;  %v1279_v1 = vsel %vm1278_vm15, %v1243_v63, %v1277_v62 }
 0x602   : > { %v1250_v49 = vadd.f32 %v1249_v36, %v1248_v38 }
 0x603   : > { %v1256_v0 = vrot.slane %v1255_v51, 1 }
 0x604   : > { %v1281_v3 = vsel %vm1280_vm0, %v1250_v49, %v1279_v1 }
 0x605   : > { %v1257_v2 = vadd.f32 %v1256_v0, %v1255_v51 }
 0x607   : > { %v4997_v11 = vsel %vm1282_vm1, %v1257_v2, %v1281_v3 }
 0x608   : > { %1286 = vst.msk [vmem:[#allocation7] sm:$0xff] %vm1285_vm4, %v4997_v11 }
 0x60f   : > { %v1311_v56 = vld [vmem:[#allocation7] sm:$0xff] }
 0x610   : > { %1313 = vrot.lane.b32.xlu1 %v1311_v56, %s5815_s10 }
 0x651   : > { %v5002_v12 = vpop.f32.mrb[4].mxu0 }
 0x652   : > { %v5004_v15 = vpop.f32.mrb[5].mxu0 }
 0x653   : > { %5821 = vst [vmem:[#allocation30_spill] sm:$0xff] %v5004_v15  ;;  %v5006_v17 = vpop.f32.mrb[6].mxu0 }
 0x654   : > { %v5008_v18 = vpop.f32.mrb[7].mxu0 }
 0x655   : > { %5822 = vst [vmem:[#allocation31_spill] sm:$0xff] %v5008_v18 }
 0x682   : > { %v1314_v35 = vpop.permute.xlu1 %1313 }
 0x683   : > { %v1316_v23 = vsel %vm707_vm6, %v1310_v21, %v1314_v35 }
 0x684   : > { %3892 = vmatmul.mubr.msk.f32.vlgmr.msra.gmra.mrb[8].mxu0 %vm709_vm7, %v1316_v23 }
 0x685   : > { %2677 = vmatprep.mubr.f32.mxu0 %v5779_v25 }
 0x757   : > { %v1386_v31 = vpop.f32.mrb[8].mxu0 }
 0x758   : > { %v1391_v10 = vadd.f32 %v4816_v41, %v1386_v31  ;;  %v1388_v30 = vpop.f32.mrb[9].mxu0 }
 0x759   : > { %v1393_v40 = vadd.f32 %v1388_v30, %v633_v26 }
 0x75a   : > { %1402 = vrot.lane.b32.xlu0 %v1391_v10, %s5777_s19 }
 0x75b   : > { %v1394_v38 = vadd.f32 %v1393_v40, %v1391_v10 }
 0x75d   : > { %v3893_v44 = vmul.f32 -1.442695, %v1394_v38 }
 0x75f   : > { %4238 = vpow2.f32 %v3893_v44 }
 0x769   : > { %v4239_v46 = vpop.eup %4238 }
 0x76a   : > { %v1398_v50 = vadd.f32 1.0, %v4239_v46 }
 0x76c   : > { %4240 = vrcp.f32 %v1398_v50 }
 0x776   : > { %v4241_v9 = vpop.eup %4240 }
 0x777   : > { %v1412_v51 = vsub.f32 1.0, %v4241_v9 }
 0x7cc   : > { %v1403_v53 = vpop.permute.xlu0 %1402 }
 0x7cd   : > { %v1405_v36 = vmul.f32 %v4241_v9, %v1403_v53 }
 0x7cf   : > { %1407 = vrot.lane.b32.xlu1 %v1405_v36, %s5777_s19  ;;  %s5827_s19 = smov 124  }
 0x7d3   : > { %1419 = vrot.lane.b32.xlu1 %v1310_v21, %s5815_s10 }
 0x841   : > { %v1408_v33 = vpop.permute.xlu1 %1407 }
 0x842   : > { %v1410_v52 = vadd.f32 %v1408_v33, %v1393_v40  ;;  %v1501_v40 = vld [vmem:[#allocation6] sm:$0xff] }
 0x844   : > { %4242 = vtanh.f32 %v1410_v52 }
 0x845   : > { %v1420_v29 = vpop.permute.xlu1 %1419 }
 0x846   : > { %v1422_v49 = vmul.f32 %v4241_v9, %v1420_v29 }
 0x84e   : > { %v4243_v41 = vpop.eup %4242 }
 0x84f   : > { %1414 = vrot.lane.b32.xlu0 %v4243_v41, %s5775_s26 }
 0x8c1   : > { %v1415_v62 = vpop.permute.xlu0 %1414 }
 0x8c2   : > { %v1417_v63 = vmul.f32 %v1415_v62, %v1412_v51 }
 0x8c4   : > { %v1423_v0 = vadd.f32 %v1422_v49, %v1417_v63 }
 0x8c6   : > { %1425 = vrot.lane.b32.xlu0 %v1423_v0, %s5775_s26 }
 0x938   : > { %v5021_v1 = vpop.permute.xlu0 %1425 }
 0x939   : > { %1852 = vst.msk [vmem:[#allocation4] sm:$0xff] %vm707_vm6, %v5021_v1  ;;  %3975 = vmatmul.mubr.msk.f32.vlgmr.msra.gmra.mrb[4].mxu1 %vm707_vm6, %v5021_v1 }
 0x93a   : > { %1968 = vmatprep.mubr.f32.mxu1 %v5779_v25 }
 0xa0c   : > { %v1495_v2 = vpop.f32.mrb[4].mxu1 }
 0xa0d   : > { %v1496_v3 = vadd.f32 %v4861_v7, %v1495_v2  ;;  %v3976_v56 = vpop.f32.mrb[5].mxu1 }
 0xa0f   : > { %v1499_v35 = vmul.f32 1.442695, %v1496_v3 }
 0xa11   : > { %4244 = vpow2.f32 %v1499_v35 }
 0xa1b   : > { %v4245_v21 = vpop.eup %4244 }
 0xa1c   : > { %1503 = vrot.lane.b32.xlu1 %v4245_v21, %s5773_s29  ;;  %v1574_v23 = vrot.slane %v4245_v21, %v4804_v37  ;;  %v1581_v26 = vrot.slane %v4245_v21, %v4865_v16  ;;  %v1588_v31 = vrot.slane %v4245_v21, %v4871_v20  ;;  %v1595_v10 = vrot.slane %v4245_v21, %v4875_v22 }
 0xa1d   : > { %v1602_v7 = vrot.slane %v4245_v21, %v4879_v24  ;;  %v1609_v30 = vrot.slane %v4245_v21, %v4883_v27  ;;  %v1616_v9 = vrot.slane %v4245_v21, %v4890_v42  ;;  %v1623_v36 = vrot.slane %v4245_v21, %v4895_v45 }
 0xa1e   : > { %1629 = vbcast.lane.b32.xlu0 %v1574_v23, 258 }
 0xa20   : > { %1633 = vbcast.lane.b32.xlu1 %v1581_v26, 258 }
 0xa24   : > { %1637 = vbcast.lane.b32.xlu1 %v1588_v31, 258 }
 0xa28   : > { %1641 = vbcast.lane.b32.xlu1 %v1595_v10, 258 }
 0xa2c   : > { %1645 = vbcast.lane.b32.xlu1 %v1602_v7, 258 }
 0xa30   : > { %1649 = vbcast.lane.b32.xlu1 %v1609_v30, 258 }
 0xa8e   : > { %v1504_v38 = vpop.permute.xlu1 %1503 }
 0xa8f   : > { %v1506_v44 = vadd.f32 %v1504_v38, %v1501_v40 }
 0xa90   : > { %v1630_v2 = vpop.permute.xlu0 %1629 }
 0xa91   : > { %1853 = vst.msk [vmem:[#allocation6] sm:$0xff] %vm1260_vm9, %v1506_v44  ;;  %v1517_v46 = vrot.slane %v1506_v44, %v4865_v16  ;;  %v1510_v50 = vrot.slane %v1506_v44, %v4804_v37  ;;  %v1524_v53 = vrot.slane %v1506_v44, %v4871_v20  ;;  %v1531_v33 = vrot.slane %v1506_v44, %v4875_v22 }
 0xa92   : > { %v1538_v52 = vrot.slane %v1506_v44, %v4879_v24  ;;  %v1545_v41 = vrot.slane %v1506_v44, %v4883_v27  ;;  %v1552_v29 = vrot.slane %v1506_v44, %v4890_v42  ;;  %v1559_v51 = vrot.slane %v1506_v44, %v4895_v45  ;;  %v1634_v62 = vpop.permute.xlu1 %1633 }
 0xa93   : > { %1519 = vbcast.lane.b32.xlu1 %v1517_v46, 256  ;;  %1512 = vbcast.lane.b32.xlu0 %v1510_v50, 256  ;;  %v1660_v21 = vsub.f32 0.0, %v1634_v62  ;;  %v1659_v40 = vsub.f32 0.0, %v1630_v2 }
 0xa96   : > { %v1638_v49 = vpop.permute.xlu1 %1637 }
 0xa97   : > { %1653 = vbcast.lane.b32.xlu1 %v1616_v9, 258  ;;  %1526 = vbcast.lane.b32.xlu0 %v1524_v53, 256  ;;  %v1661_v50 = vsub.f32 0.0, %v1638_v49 }
 0xa9a   : > { %v1642_v63 = vpop.permute.xlu1 %1641 }
 0xa9b   : > { %1657 = vbcast.lane.b32.xlu1 %v1623_v36, 258  ;;  %1533 = vbcast.lane.b32.xlu0 %v1531_v33, 256  ;;  %v1662_v53 = vsub.f32 0.0, %v1642_v63 }
 0xa9e   : > { %v1646_v0 = vpop.permute.xlu1 %1645 }
 0xa9f   : > { %1583 = vbcast.lane.b32.xlu1 %v1581_v26, 256  ;;  %1540 = vbcast.lane.b32.xlu0 %v1538_v52, 256 }
 0xaa2   : > { %v1650_v3 = vpop.permute.xlu1 %1649 }
 0xaa3   : > { %1597 = vbcast.lane.b32.xlu1 %v1595_v10, 256  ;;  %1547 = vbcast.lane.b32.xlu0 %v1545_v41, 256  ;;  %v1664_v49 = vsub.f32 0.0, %v1650_v3 }
 0xaa7   : > { %1611 = vbcast.lane.b32.xlu1 %v1609_v30, 256  ;;  %1554 = vbcast.lane.b32.xlu0 %v1552_v29, 256 }
 0xaab   : > { %1625 = vbcast.lane.b32.xlu1 %v1623_v36, 256  ;;  %1561 = vbcast.lane.b32.xlu0 %v1559_v51, 256  ;;  %v1663_v51 = vsub.f32 0.0, %v1646_v0 }
 0xaaf   : > { %1576 = vbcast.lane.b32.xlu0 %v1574_v23, 256 }
 0xab3   : > { %1590 = vbcast.lane.b32.xlu0 %v1588_v31, 256 }
 0xab7   : > { %1604 = vbcast.lane.b32.xlu0 %v1602_v7, 256 }
 0xabb   : > { %1618 = vbcast.lane.b32.xlu0 %v1616_v9, 256 }
 0xb05   : > { %v1520_v56 = vpop.permute.xlu1 %1519  ;;  %v1513_v35 = vpop.permute.xlu0 %1512 }
 0xb06   : > { %v1564_v26 = vsub.f32 %v1520_v56, %v4904_v60  ;;  %v1563_v10 = vsub.f32 %v1513_v35, %v4904_v60 }
 0xb08   : > { %v1668_v30 = vmul.f32 %v1660_v21, %v1564_v26  ;;  %v1667_v31 = vmul.f32 %v1659_v40, %v1563_v10 }
 0xb09   : > { %v1527_v38 = vpop.permute.xlu0 %1526  ;;  %v1654_v46 = vpop.permute.xlu1 %1653 }
 0xb0a   : > { %v1676_v23 = vmul.f32 %v1668_v30, %v1564_v26  ;;  %v1565_v7 = vsub.f32 %v1527_v38, %v4904_v60  ;;  %v1675_v33 = vmul.f32 %v1667_v31, %v1563_v10 }
 0xb0c   : > { %v1685_v44 = vmul.f32 1.442695, %v1676_v23  ;;  %v1669_v52 = vmul.f32 %v1661_v50, %v1565_v7  ;;  %v1683_v35 = vmul.f32 1.442695, %v1675_v33 }
 0xb0d   : > { %v1534_v9 = vpop.permute.xlu0 %1533  ;;  %v1658_v62 = vpop.permute.xlu1 %1657 }
 0xb0e   : > { %4246 = vpow2.f32 %v1685_v44  ;;  %v1566_v36 = vsub.f32 %v1534_v9, %v4904_v60  ;;  %v1677_v21 = vmul.f32 %v1669_v52, %v1565_v7  ;;  %v1665_v9 = vsub.f32 0.0, %v1654_v46 }
 0xb10   : > { %v1670_v41 = vmul.f32 %v1662_v53, %v1566_v36  ;;  %v1687_v38 = vmul.f32 1.442695, %v1677_v21 }
 0xb11   : > { %v1541_v29 = vpop.permute.xlu0 %1540  ;;  %v1584_v31 = vpop.permute.xlu1 %1583 }
 0xb12   : > { %v1678_v2 = vmul.f32 %v1670_v41, %v1566_v36  ;;  %v1567_v56 = vsub.f32 %v1541_v29, %v4904_v60  ;;  %v1666_v29 = vsub.f32 0.0, %v1658_v62 }
 0xb14   : > { %v1689_v26 = vmul.f32 1.442695, %v1678_v2  ;;  %v1671_v30 = vmul.f32 %v1663_v51, %v1567_v56 }
 0xb15   : > { %v1548_v40 = vpop.permute.xlu0 %1547  ;;  %v1598_v46 = vpop.permute.xlu1 %1597 }
 0xb16   : > { %4248 = vpow2.f32 %v1689_v26  ;;  %v1568_v63 = vsub.f32 %v1548_v40, %v4904_v60  ;;  %v1679_v10 = vmul.f32 %v1671_v30, %v1567_v56 }
 0xb17   : > { %4250 = vpow2.f32 %v1683_v35 }
 0xb18   : > { %v4247_v23 = vpop.eup %4246  ;;  %v1672_v44 = vmul.f32 %v1664_v49, %v1568_v63  ;;  %4252 = vpow2.f32 %v1687_v38  ;;  %v1691_v33 = vmul.f32 1.442695, %v1679_v10 }
 0xb19   : > { %v1700_v0 = vmul.f32 %v4247_v23, %v1584_v31  ;;  %v1555_v50 = vpop.permute.xlu0 %1554 }
 0xb1a   : > { %v1680_v53 = vmul.f32 %v1672_v44, %v1568_v63  ;;  %v1569_v36 = vsub.f32 %v1555_v50, %v4904_v60 }
 0xb1b   : > { %v1714_v7 = vsel %vm1112_vm10, %v1700_v0, 0.0 }
 0xb1c   : > { %v1715_v3 = vrot.slane %v1714_v7, 4  ;;  %v1693_v52 = vmul.f32 1.442695, %v1680_v53  ;;  %v1673_v41 = vmul.f32 %v1665_v9, %v1569_v36 }
 0xb1d   : > { %v1562_v51 = vpop.permute.xlu0 %1561 }
 0xb1e   : > { %v1716_v2 = vadd.f32 %v1715_v3, %v1714_v7  ;;  %4254 = vpow2.f32 %v1693_v52  ;;  %v1681_v56 = vmul.f32 %v1673_v41, %v1569_v36  ;;  %v1570_v35 = vsub.f32 %v1562_v51, %v4904_v60  ;;  %v1612_v51 = vpop.permute.xlu1 %1611 }
 0xb1f   : > { %4256 = vpow2.f32 %v1691_v33 }
 0xb20   : > { %v4249_v21 = vpop.eup %4248  ;;  %v1695_v26 = vmul.f32 1.442695, %v1681_v56  ;;  %v1674_v30 = vmul.f32 %v1666_v29, %v1570_v35  ;;  %v1717_v40 = vrot.slane %v1716_v2, 2 }
 0xb21   : > { %v4251_v49 = vpop.eup %4250  ;;  %v1702_v63 = vmul.f32 %v4249_v21, %v1598_v46  ;;  %v1577_v38 = vpop.permute.xlu0 %1576 }
 0xb22   : > { %4258 = vpow2.f32 %v1695_v26  ;;  %v1682_v10 = vmul.f32 %v1674_v30, %v1570_v35  ;;  %v1699_v23 = vmul.f32 %v4251_v49, %v1577_v38  ;;  %v1718_v31 = vadd.f32 %v1717_v40, %v1716_v2  ;;  %v4253_v53 = vpop.eup %4252 }
 0xb23   : > { %v1728_v62 = vsel %vm1112_vm10, %v1702_v63, 0.0 }
 0xb24   : > { %v1729_v44 = vrot.slane %v1728_v62, 4  ;;  %v1697_v0 = vmul.f32 1.442695, %v1682_v10  ;;  %v1707_v50 = vsel %vm1112_vm10, %v1699_v23, 0.0  ;;  %v1719_v9 = vrot.slane %v1718_v31, 1 }
 0xb25   : > { %v1708_v36 = vrot.slane %v1707_v50, 4  ;;  %v1591_v7 = vpop.permute.xlu0 %1590 }
 0xb26   : > { %v1730_v33 = vadd.f32 %v1729_v44, %v1728_v62  ;;  %4260 = vpow2.f32 %v1697_v0  ;;  %v1701_v3 = vmul.f32 %v4253_v53, %v1591_v7  ;;  %v1720_v52 = vadd.f32 %v1719_v9, %v1718_v31 }
 0xb27   : > { %v1709_v41 = vadd.f32 %v1708_v36, %v1707_v50 }
 0xb28   : > { %v4255_v29 = vpop.eup %4254  ;;  %v1721_v56 = vsel %vm1112_vm10, %v1701_v3, 0.0  ;;  %1767 = vbcast.lane.b32.xlu1 %v1720_v52, 256  ;;  %v1731_v2 = vrot.slane %v1730_v33, 2 }
 0xb29   : > { %v4257_v35 = vpop.eup %4256  ;;  %v1704_v21 = vmul.f32 %v4255_v29, %v1612_v51  ;;  %v1722_v46 = vrot.slane %v1721_v56, 4  ;;  %v1605_v26 = vpop.permute.xlu0 %1604  ;;  %v1710_v30 = vrot.slane %v1709_v41, 2 }
 0xb2a   : > { %v1703_v40 = vmul.f32 %v4257_v35, %v1605_v26  ;;  %v1732_v49 = vadd.f32 %v1731_v2, %v1730_v33 }
 0xb2b   : > { %v1742_v63 = vsel %vm1112_vm10, %v1704_v21, 0.0  ;;  %v1723_v38 = vadd.f32 %v1722_v46, %v1721_v56  ;;  %v1711_v10 = vadd.f32 %v1710_v30, %v1709_v41  ;;  %v1626_v56 = vpop.permute.xlu1 %1625 }
 0xb2c   : > { %v4259_v23 = vpop.eup %4258  ;;  %v1743_v31 = vrot.slane %v1742_v63, 4  ;;  %v1735_v62 = vsel %vm1112_vm10, %v1703_v40, 0.0  ;;  %v1733_v44 = vrot.slane %v1732_v49, 1 }
 0xb2d   : > { %v1736_v0 = vrot.slane %v1735_v62, 4  ;;  %v1619_v50 = vpop.permute.xlu0 %1618  ;;  %v1712_v9 = vrot.slane %v1711_v10, 1  ;;  %v1724_v53 = vrot.slane %v1723_v38, 2 }
 0xb2e   : > { %v1744_v36 = vadd.f32 %v1743_v31, %v1742_v63  ;;  %v1705_v7 = vmul.f32 %v4259_v23, %v1619_v50  ;;  %v1734_v3 = vadd.f32 %v1733_v44, %v1732_v49 }
 0xb2f   : > { %v1737_v29 = vadd.f32 %v1736_v0, %v1735_v62  ;;  %v1713_v51 = vadd.f32 %v1712_v9, %v1711_v10  ;;  %v1725_v35 = vadd.f32 %v1724_v53, %v1723_v38 }
 0xb30   : > { %v4261_v33 = vpop.eup %4260  ;;  %v1749_v2 = vsel %vm1112_vm10, %v1705_v7, 0.0  ;;  %1773 = vbcast.lane.b32.xlu1 %v1734_v3, 256  ;;  %v1745_v41 = vrot.slane %v1744_v36, 2 }
 0xb31   : > { %v1750_v21 = vrot.slane %v1749_v2, 4  ;;  %1764 = vbcast.lane.b32.xlu0 %v1713_v51, 256  ;;  %v1726_v46 = vrot.slane %v1725_v35, 1  ;;  %v1738_v26 = vrot.slane %v1737_v29, 2  ;;  %v1706_v40 = vmul.f32 %v4261_v33, %v1626_v56 }
 0xb32   : > { %v1746_v30 = vadd.f32 %v1745_v41, %v1744_v36  ;;  %v1884_v44 = vsel %vm1270_vm11, %v1720_v52, %v1713_v51  ;;  %v682_v51 = vld [vmem:[%s5748_s8 + $0x18] sm:$0xff] }
 0xb33   : > { %v1751_v13 = vadd.f32 %v1750_v21, %v1749_v2  ;;  %v1727_v58 = vadd.f32 %v1726_v46, %v1725_v35  ;;  %v1739_v63 = vadd.f32 %v1738_v26, %v1737_v29  ;;  %v1756_v49 = vsel %vm1112_vm10, %v1706_v40, 0.0  ;;  %v679_v21 = vld [vmem:[%s5748_s8] sm:$0xff]  ;;  %v684_v26 = vld [vmem:[%s5748_s8 + $0x28] sm:$0xff] }
 0xb34   : > { %v1747_v23 = vrot.slane %v1746_v30, 1  ;;  %v1757_v31 = vrot.slane %v1756_v49, 4 }
 0xb35   : > { %1770 = vbcast.lane.b32.xlu0 %v1727_v58, 256  ;;  %v1740_v38 = vrot.slane %v1739_v63, 1  ;;  %v1752_v10 = vrot.slane %v1751_v13, 2  ;;  %v1885_v53 = vsel %vm1272_vm12, %v1727_v58, %v1884_v44  ;;  %v687_v44 = vld [vmem:[%s5748_s8 + $0x40] sm:$0xff] }
 0xb36   : > { %v1748_v62 = vadd.f32 %v1747_v23, %v1746_v30  ;;  %v1758_v9 = vadd.f32 %v1757_v31, %v1756_v49  ;;  %v1886_v29 = vsel %vm1274_vm13, %v1734_v3, %v1885_v53  ;;  %v680_v3 = vld [vmem:[%s5748_s8 + $0x8] sm:$0xff]  ;;  %v686_v30 = vld [vmem:[%s5748_s8 + $0x38] sm:$0xff]  ;;  %v683_v23 = vld [vmem:[%s5748_s8 + $0x20] sm:$0xff] }
 0xb37   : > { %v1741_v0 = vadd.f32 %v1740_v38, %v1739_v63  ;;  %v1753_v50 = vadd.f32 %v1752_v10, %v1751_v13  ;;  %v5082_v46 = vpack.c.bf16 %v682_v51, %v680_v3  ;;  %v5095_v63 = vpack.c.bf16 %v686_v30, %v684_v26  ;;  %v685_v49 = vld [vmem:[%s5748_s8 + $0x30] sm:$0xff]  ;;  %v688_v38 = vld [vmem:[%s5748_s8 + $0x48] sm:$0xff]  ;;  %v690_v10 = vld [vmem:[%s5748_s8 + $0x58] sm:$0xff] }
 0xb38   : > { %1779 = vbcast.lane.b32.xlu1 %v1748_v62, 256  ;;  %v1759_v7 = vrot.slane %v1758_v9, 2  ;;  %v5112_v31 = vpack.c.bf16 %v685_v49, %v683_v23 }
 0xb39   : > { %1776 = vbcast.lane.b32.xlu0 %v1741_v0, 256  ;;  %v1754_v36 = vrot.slane %v1753_v50, 1  ;;  %v1887_v2 = vsel %vm1276_vm14, %v1741_v0, %v1886_v29  ;;  %4028 = vmatprep.subr.bf16.mxu1 %v5082_v46  ;;  %v689_v0 = vld [vmem:[%s5748_s8 + $0x50] sm:$0xff] }
 0xb3a   : > { %v1760_v33 = vadd.f32 %v1759_v7, %v1758_v9  ;;  %v1888_v56 = vsel %vm1278_vm15, %v1748_v62, %v1887_v2  ;;  %4058 = vmatprep.subr.bf16.mxu0 %v5082_v46  ;;  %v5116_v62 = vpack.c.bf16 %v690_v10, %v688_v38  ;;  %v694_v9 = vld [vmem:[%s5748_s8 + $0x78] sm:$0xff]  ;;  %v5132_v53 = vpack.c.bf16 %v689_v0, %v687_v44  ;;  %v691_v7 = vld [vmem:[%s5748_s8 + $0x60] sm:$0xff]  ;;  %v693_v29 = vld [vmem:[%s5748_s8 + $0x70] sm:$0xff] }
 0xb3b   : > { %v1755_v35 = vadd.f32 %v1754_v36, %v1753_v50  ;;  %v692_v50 = vld [vmem:[%s5748_s8 + $0x68] sm:$0xff] }
 0xb3c   : > { %v1761_v41 = vrot.slane %v1760_v33, 1  ;;  %v5136_v36 = vpack.c.bf16 %v694_v9, %v692_v50 }
 0xb3d   : > { %1782 = vbcast.lane.b32.xlu0 %v1755_v35, 256  ;;  %v1889_v13 = vsel %vm1280_vm0, %v1755_v35, %v1888_v56  ;;  %v5146_v35 = vpack.c.bf16 %v693_v29, %v691_v7 }
 0xb3e   : > { %v1762_v52 = vadd.f32 %v1761_v41, %v1760_v33  ;;  %v5154_v33 = vld [vmem:[%s5748_s8 + $0x88] sm:$0xff] }
 0xb40   : > { %1785 = vbcast.lane.b32.xlu1 %v1762_v52, 256  ;;  %v1890_v58 = vsel %vm1282_vm1, %v1762_v52, %v1889_v13 }
 0xb41   : > { %1287 = vrot.lane.b32.xlu0 %v4997_v11, %s5815_s10  ;;  %1892 = vst.msk [vmem:[#allocation15] sm:$0xff] %vm1308_vm2, %v1890_v58  ;;  %v681_v11 = vld [vmem:[%s5748_s8 + $0x10] sm:$0xff] }
 0xb42   : > { %v5093_v40 = vpack.c.bf16 %v681_v11, %v679_v21 }
 0xb44   : > { %4030 = vmatpush1.bf16.msra.mxu1 %v5093_v40  ;;  %4060 = vmatpush1.bf16.msra.mxu0 %v5093_v40 }
 0xb45   : > { %4032 = vmatprep.subr.bf16.mxu1 %v5095_v63  ;;  %4062 = vmatprep.subr.bf16.mxu0 %v5095_v63 }
 0xb48   : > { %4034 = vmatpush1.bf16.msra.mxu1 %v5112_v31  ;;  %4064 = vmatpush1.bf16.msra.mxu0 %v5112_v31 }
 0xb49   : > { %4036 = vmatprep.subr.bf16.mxu1 %v5116_v62  ;;  %4066 = vmatprep.subr.bf16.mxu0 %v5116_v62 }
 0xb4c   : > { %4038 = vmatpush1.bf16.msra.mxu1 %v5132_v53  ;;  %4068 = vmatpush1.bf16.msra.mxu0 %v5132_v53 }
 0xb4d   : > { %4040 = vmatprep.subr.bf16.mxu1 %v5136_v36  ;;  %4070 = vmatprep.subr.bf16.mxu0 %v5136_v36 }
 0xb50   : > { %4042 = vmatpush1.bf16.msra.mxu1 %v5146_v35  ;;  %4072 = vmatpush1.bf16.msra.mxu0 %v5146_v35 }
 0xb51   : > { %1920 = vmatprep.subr.mxu1 %v5154_v33  ;;  %2629 = vmatprep.subr.mxu0 %v5154_v33 }
 0xb9a   : > { %v1768_v2 = vpop.permute.xlu1 %1767 }
 0xb9b   : > { %v1788_v41 = vmul.f32 %v1768_v2, %v4937_v43 }
 0xb9d   : > { %v1802_v56 = vsel %vm1201_vm3, %v1788_v41, 0.0 }
 0xb9e   : > { %v1803_v52 = vrot.slane %v1802_v56, 4 }
 0xba0   : > { %v1804_v11 = vadd.f32 %v1803_v52, %v1802_v56 }
 0xba2   : > { %v1774_v13 = vpop.permute.xlu1 %1773  ;;  %v1805_v10 = vrot.slane %v1804_v11, 2 }
 0xba3   : > { %v1790_v58 = vmul.f32 %v1774_v13, %v4944_v47  ;;  %v1765_v3 = vpop.permute.xlu0 %1764 }
 0xba4   : > { %v1787_v51 = vmul.f32 %v1765_v3, %v4949_v48  ;;  %v1806_v52 = vadd.f32 %v1805_v10, %v1804_v11 }
 0xba5   : > { %v1816_v21 = vsel %vm1201_vm3, %v1790_v58, 0.0 }
 0xba6   : > { %v1817_v26 = vrot.slane %v1816_v21, 4  ;;  %v1795_v30 = vsel %vm1201_vm3, %v1787_v51, 0.0  ;;  %v1807_v11 = vrot.slane %v1806_v52, 1 }
 0xba7   : > { %v1796_v23 = vrot.slane %v1795_v30, 4  ;;  %v1771_v49 = vpop.permute.xlu0 %1770 }
 0xba8   : > { %v1789_v38 = vmul.f32 %v1771_v49, %v4957_v54  ;;  %v1818_v44 = vadd.f32 %v1817_v26, %v1816_v21 }
 0xba9   : > { %v1797_v43 = vadd.f32 %v1796_v23, %v1795_v30 }
 0xbaa   : > { %v1809_v0 = vsel %vm1201_vm3, %v1789_v38, 0.0  ;;  %v1780_v50 = vpop.permute.xlu1 %1779  ;;  %v1819_v13 = vrot.slane %v1818_v44, 2 }
 0xbab   : > { %v1798_v47 = vrot.slane %v1797_v43, 2  ;;  %v1810_v9 = vrot.slane %v1809_v0, 4  ;;  %v1792_v48 = vmul.f32 %v1780_v50, %v4964_v57  ;;  %v1777_v7 = vpop.permute.xlu0 %1776  ;;  %v5176_v57 = vld [vmem:[%s5748_s8 + $0x80] sm:$0xff] }
 0xbac   : > { %v1791_v29 = vmul.f32 %v1777_v7, %v4969_v5  ;;  %1921 = vmatpush1.msra.mxu1 %v5176_v57  ;;  %2630 = vmatpush1.msra.mxu0 %v5176_v57  ;;  %v1820_v38 = vadd.f32 %v1819_v13, %v1818_v44 }
 0xbad   : > { %v1799_v2 = vadd.f32 %v1798_v47, %v1797_v43  ;;  %v1811_v41 = vadd.f32 %v1810_v9, %v1809_v0  ;;  %v1830_v56 = vsel %vm1201_vm3, %v1792_v48, 0.0  ;;  %4044 = vmatprep.subr.bf16.mxu1 %v4742_v4  ;;  %4088 = vmatprep.subr.bf16.mxu0 %v5082_v46 }
 0xbae   : > { %v1831_v54 = vrot.slane %v1830_v56, 4  ;;  %v1823_v58 = vsel %vm1201_vm3, %v1791_v29, 0.0  ;;  %v1821_v13 = vrot.slane %v1820_v38, 1 }
 0xbaf   : > { %v1812_v3 = vrot.slane %v1811_v41, 2  ;;  %v1824_v51 = vrot.slane %v1823_v58, 4  ;;  %v1783_v21 = vpop.permute.xlu0 %1782  ;;  %v1800_v5 = vrot.slane %v1799_v2, 1 }
 0xbb0   : > { %v1832_v26 = vadd.f32 %v1831_v54, %v1830_v56  ;;  %v1793_v30 = vmul.f32 %v1783_v21, %v4978_v28  ;;  %v1808_v56 = vadd.f32 %v1807_v11, %v1806_v52 }
 0xbb1   : > { %v1813_v23 = vadd.f32 %v1812_v3, %v1811_v41  ;;  %v1825_v49 = vadd.f32 %v1824_v51, %v1823_v58  ;;  %v1801_v29 = vadd.f32 %v1800_v5, %v1799_v2  ;;  %v1822_v5 = vadd.f32 %v1821_v13, %v1820_v38  ;;  %v4334_v13 = vld [vmem:[%s5744_s4 + $0x48] sm:$0xff] }
 0xbb2   : > { %v1837_v43 = vsel %vm1201_vm3, %v1793_v30, 0.0  ;;  %v1833_v10 = vrot.slane %v1832_v26, 2  ;;  %v1786_v47 = vpop.permute.xlu1 %1785 }
 0xbb3   : > { %v1814_v28 = vrot.slane %v1813_v23, 1  ;;  %v1826_v0 = vrot.slane %v1825_v49, 2  ;;  %v1838_v50 = vrot.slane %v1837_v43, 4  ;;  %v1288_v9 = vpop.permute.xlu0 %1287  ;;  %v1794_v48 = vmul.f32 %v1786_v47, %v4985_v55 }
 0xbb4   : > { %v1290_v7 = vsel %vm707_vm6, %v4847_v6, %v1288_v9  ;;  %v1834_v3 = vadd.f32 %v1833_v10, %v1832_v26  ;;  %v1862_v25 = vsel %vm1270_vm11, %v1808_v56, %v1801_v29  ;;  %v5201_v29 = vld [vmem:[#allocation5] sm:$0xff]  ;;  %v5823_v56 = vmov 0.0  }
 0xbb5   : > { %v1827_v41 = vadd.f32 %v1826_v0, %v1825_v49  ;;  %v1839_v44 = vadd.f32 %v1838_v50, %v1837_v43  ;;  %1291 = vst.msk [vmem:[#allocation3] sm:$0xff] %vm709_vm7, %v1290_v7  ;;  %v1815_v54 = vadd.f32 %v1814_v28, %v1813_v23  ;;  %v1844_v58 = vsel %vm1201_vm3, %v1794_v48, 0.0 }
 0xbb6   : > { %v1845_v30 = vrot.slane %v1844_v58, 4  ;;  %v1835_v49 = vrot.slane %v1834_v3, 1 }
 0xbb7   : > { %v1828_v51 = vrot.slane %v1827_v41, 1  ;;  %v1840_v21 = vrot.slane %v1839_v44, 2  ;;  %v1863_v6 = vsel %vm1272_vm12, %v1815_v54, %v1862_v25  ;;  %v4335_v54 = vld [vmem:[%s5744_s4 + $0x40] sm:$0xff] }
 0xbb8   : > { %v1846_v47 = vadd.f32 %v1845_v30, %v1844_v58  ;;  %v1864_v23 = vsel %vm1274_vm13, %v1822_v5, %v1863_v6  ;;  %v1836_v10 = vadd.f32 %v1835_v49, %v1834_v3  ;;  %v5824_v58 = vmov 0.0|0.0   ;;  %v4336_v30 = vld [vmem:[%s5743_s3] sm:$0x3] }
 0xbb9   : > { %v1841_v55 = vadd.f32 %v1840_v21, %v1839_v44  ;;  %v1829_v2 = vadd.f32 %v1828_v51, %v1827_v41  ;;  %v2020_v51 = vld [vmem:[#allocation4] sm:$0xff]  ;;  %v639_v49 = vadd.f32 %v5002_v12, %v4810_v39 }
 0xbba   : > { %v1847_v0 = vrot.slane %v1846_v47, 2 }
 0xbbb   : > { %v1842_v43 = vrot.slane %v1841_v55, 1  ;;  %v1865_v26 = vsel %vm1276_vm14, %v1829_v2, %v1864_v23 }
 0xbbc   : > { %v1894_v52 = vld [vmem:[#allocation3] sm:$0xff]  ;;  %v1848_v11 = vadd.f32 %v1847_v0, %v1846_v47  ;;  %v1866_v9 = vsel %vm1278_vm15, %v1836_v10, %v1865_v26 }
 0xbbd   : > { %1896 = vrot.lane.b32.xlu1 %v1894_v52, %s5815_s10  ;;  %v1843_v28 = vadd.f32 %v1842_v43, %v1841_v55  ;;  %v5229_v55 = vrot.slane %v4336_v30, %v4865_v16 }
 0xbbe   : > { %v1849_v50 = vrot.slane %v1848_v11, 1 }
 0xbbf   : > { %v1867_v25 = vsel %vm1280_vm0, %v1843_v28, %v1866_v9  ;;  %v631_v47 = vadd.f32 %v4794_v32, %v5229_v55 }
 0xbc0   : > { %v1850_v48 = vadd.f32 %v1849_v50, %v1848_v11 }
 0xbc2   : > { %v5196_v38 = vsel %vm1282_vm1, %v1850_v48, %v1867_v25 }
 0xbc3   : > { %1870 = vst.msk [vmem:[#allocation7] sm:$0xff] %vm1285_vm4, %v5196_v38 }
 0xbca   : > { %v2021_v7 = vld [vmem:[#allocation7] sm:$0xff] }
 0xbcb   : > { %2023 = vrot.lane.b32.xlu0 %v2021_v7, %s5815_s10 }
 0xc2f   : > { %v1897_v41 = vpop.permute.xlu1 %1896 }
 0xc30   : > { %v1899_v44 = vsel %vm707_vm6, %v5201_v29, %v1897_v41 }
 0xc31   : > { %3895 = vmatmul.mubr.msk.f32.vlgmr.msra.gmra.mrb[6].mxu1 %vm1900_vm5, %v1899_v44 }
 0xc32   : > { %4046 = vmatpush1.bf16.msra.mxu1 %v4753_v8  ;;  %2094 = vmatprep.mubr.f32.mxu1 %v5823_v56 }
 0xc33   : > { %4048 = vmatprep.subr.bf16.mxu1 %v4763_v14 }
 0xc36   : > { %4050 = vmatpush1.bf16.msra.mxu1 %v4773_v19 }
 0xc37   : > { %2038 = vmatprep.subr.mxu1 %v4334_v13 }
 0xc3a   : > { %2039 = vmatpush1.msra.mxu1 %v4335_v54 }
 0xc3b   : > { %4051 = vmatprep.subr.bf16.mxu1 %v5824_v58 }
 0xc3d   : > { %v2024_v3 = vpop.permute.xlu0 %2023 }
 0xc3e   : > { %v2026_v21 = vsel %vm707_vm6, %v2020_v51, %v2024_v3 }
 0xc3f   : > { %3898 = vmatmul.mubr.msk.f32.vlgmr.msra.gmra.mrb[8].mxu1 %vm709_vm7, %v2026_v21 }
 0xc40   : > { %4053 = vmatpush3.bf16.msra.mxu1 %v4832_v59  ;;  %3985 = vmatprep.mubr.msk.f32.mxu1 %vm4542_vm8, %v5823_v56 }
 0xc41   : > { %4054 = vmatprep.subr.bf16.mxu1 %v5824_v58 }
 0xc44   : > { %4056 = vmatpush3.bf16.msra.mxu1 %v4840_v61 }
 0xc45   : > { %4074 = vmatprep.subr.bf16.mxu1 %v4742_v4  ;;  %v5242_v4 = vld [vmem:[%s5745_s5] ss:$0 sm:$0xff] }
 0xd04   : > { %v5233_v6 = vpop.f32.mrb[6].mxu1 }
 0xd05   : > { %v1972_v2 = vpop.f32.mrb[7].mxu1 }
 0xd06   : > { %v5235_v5 = vadd.f32 %v1972_v2, %v631_v47  ;;  %v5264_v2 = vld [vmem:[%s5747_s7] ss:$0 sm:$0xff] }
 0xd12   : > { %v2096_v43 = vpop.f32.mrb[8].mxu1 }
 0xd13   : > { %v2101_v0 = vadd.f32 %v5242_v4, %v2096_v43  ;;  %v2098_v52 = vpop.f32.mrb[9].mxu1 }
 0xd14   : > { %v2103_v23 = vadd.f32 %v2098_v52, %v639_v49 }
 0xd15   : > { %2112 = vrot.lane.b32.xlu1 %v2101_v0, %s5825_s28 }
 0xd16   : > { %v2104_v32 = vadd.f32 %v2103_v23, %v2101_v0 }
 0xd18   : > { %v3899_v11 = vmul.f32 -1.442695, %v2104_v32  ;;  %v2211_v32 = vld [vmem:[#allocation6] sm:$0xff] }
 0xd1a   : > { %4262 = vpow2.f32 %v3899_v11 }
 0xd24   : > { %v4263_v26 = vpop.eup %4262 }
 0xd25   : > { %v2108_v28 = vadd.f32 1.0, %v4263_v26 }
 0xd27   : > { %4264 = vrcp.f32 %v2108_v28 }
 0xd31   : > { %v4265_v10 = vpop.eup %4264 }
 0xd32   : > { %v2122_v41 = vsub.f32 1.0, %v4265_v10 }
 0xd87   : > { %v2113_v12 = vpop.permute.xlu1 %2112 }
 0xd88   : > { %v2115_v50 = vmul.f32 %v4265_v10, %v2113_v12 }
 0xd8a   : > { %2117 = vrot.lane.b32.xlu0 %v2115_v50, %s5825_s28 }
 0xd8e   : > { %2129 = vrot.lane.b32.xlu0 %v2020_v51, %s5815_s10 }
 0xdfc   : > { %v2118_v9 = vpop.permute.xlu0 %2117 }
 0xdfd   : > { %v2120_v48 = vadd.f32 %v2118_v9, %v2103_v23 }
 0xdff   : > { %4266 = vtanh.f32 %v2120_v48 }
 0xe00   : > { %v2130_v7 = vpop.permute.xlu0 %2129 }
 0xe01   : > { %v2132_v3 = vmul.f32 %v4265_v10, %v2130_v7 }
 0xe09   : > { %v4267_v25 = vpop.eup %4266 }
 0xe0a   : > { %2124 = vrot.lane.b32.xlu1 %v4267_v25, %s5826_s30 }
 0xe7c   : > { %v2125_v44 = vpop.permute.xlu1 %2124 }
 0xe7d   : > { %v2127_v21 = vmul.f32 %v2125_v44, %v2122_v41 }
 0xe7f   : > { %v2133_v30 = vadd.f32 %v2132_v3, %v2127_v21  ;;  %v5288_v3 = vld [vmem:[%s5749_s9] ss:$0 sm:$0xff] }
 0xe80   : > { %v1981_v21 = vadd.f32 %v5288_v3, %v5233_v6 }
 0xe81   : > { %2135 = vrot.lane.b32.xlu1 %v2133_v30, %s5826_s30 }
 0xef3   : > { %v5250_v47 = vpop.permute.xlu1 %2135 }
 0xef4   : > { %2562 = vst.msk [vmem:[#allocation4] sm:$0xff] %vm707_vm6, %v5250_v47  ;;  %3986 = vmatmul.mubr.msk.f32.vlgmr.msra.gmra.mrb[10].mxu1 %vm707_vm6, %v5250_v47 }
 0xef5   : > { %4076 = vmatpush1.bf16.msra.mxu1 %v4753_v8  ;;  %2797 = vmatprep.mubr.f32.mxu1 %v5823_v56 }
 0xef6   : > { %4078 = vmatprep.subr.bf16.mxu1 %v4763_v14 }
 0xef9   : > { %4080 = vmatpush1.bf16.msra.mxu1 %v4773_v19 }
 0xefa   : > { %2741 = vmatprep.subr.mxu1 %v4334_v13 }
 0xefd   : > { %2742 = vmatpush1.msra.mxu1 %v4335_v54 }
 0xefe   : > { %4081 = vmatprep.subr.bf16.mxu1 %v5824_v58 }
 0xfc7   : > { %v2205_v51 = vpop.f32.mrb[10].mxu1 }
 0xfc8   : > { %v2206_v49 = vadd.f32 %v5264_v2, %v2205_v51  ;;  %v3987_v43 = vpop.f32.mrb[11].mxu1 }
 0xfca   : > { %v2209_v8 = vmul.f32 1.442695, %v2206_v49 }
 0xfcc   : > { %4268 = vpow2.f32 %v2209_v8 }
 0xfd6   : > { %v4269_v0 = vpop.eup %4268 }
 0xfd7   : > { %2213 = vrot.lane.b32.xlu0 %v4269_v0, %s5827_s19  ;;  %v2284_v14 = vrot.slane %v4269_v0, %v4804_v37  ;;  %v2291_v19 = vrot.slane %v4269_v0, %v4865_v16  ;;  %v2298_v13 = vrot.slane %v4269_v0, %v4871_v20  ;;  %v2305_v54 = vrot.slane %v4269_v0, %v4875_v22 }
 0xfd8   : > { %v2312_v52 = vrot.slane %v4269_v0, %v4879_v24  ;;  %v2319_v23 = vrot.slane %v4269_v0, %v4883_v27  ;;  %v2326_v12 = vrot.slane %v4269_v0, %v4890_v42  ;;  %v2333_v9 = vrot.slane %v4269_v0, %v4895_v45 }
 0xfd9   : > { %2339 = vbcast.lane.b32.xlu1 %v2284_v14, 258 }
 0xfdb   : > { %2343 = vbcast.lane.b32.xlu0 %v2291_v19, 258 }
 0xfdf   : > { %2347 = vbcast.lane.b32.xlu0 %v2298_v13, 258 }
 0xfe3   : > { %2351 = vbcast.lane.b32.xlu0 %v2305_v54, 258 }
 0xfe7   : > { %2355 = vbcast.lane.b32.xlu0 %v2312_v52, 258 }
 0xfeb   : > { %2359 = vbcast.lane.b32.xlu0 %v2319_v23, 258 }
0x1049   : > { %v2214_v11 = vpop.permute.xlu0 %2213 }
0x104a   : > { %v2216_v26 = vadd.f32 %v2214_v11, %v2211_v32 }
0x104b   : > { %v2340_v8 = vpop.permute.xlu1 %2339 }
0x104c   : > { %2563 = vst.msk [vmem:[#allocation6] sm:$0xff] %vm1260_vm9, %v2216_v26  ;;  %v2227_v28 = vrot.slane %v2216_v26, %v4865_v16  ;;  %v2220_v10 = vrot.slane %v2216_v26, %v4804_v37  ;;  %v2234_v50 = vrot.slane %v2216_v26, %v4871_v20  ;;  %v2241_v48 = vrot.slane %v2216_v26, %v4875_v22 }
0x104d   : > { %v2248_v25 = vrot.slane %v2216_v26, %v4879_v24  ;;  %v2255_v7 = vrot.slane %v2216_v26, %v4883_v27  ;;  %v2262_v41 = vrot.slane %v2216_v26, %v4890_v42  ;;  %v2269_v44 = vrot.slane %v2216_v26, %v4895_v45  ;;  %v2344_v30 = vpop.permute.xlu0 %2343 }
0x104e   : > { %2229 = vbcast.lane.b32.xlu0 %v2227_v28, 256  ;;  %2222 = vbcast.lane.b32.xlu1 %v2220_v10, 256  ;;  %v2369_v32 = vsub.f32 0.0, %v2340_v8 }
0x1051   : > { %v2348_v51 = vpop.permute.xlu0 %2347 }
0x1052   : > { %2363 = vbcast.lane.b32.xlu0 %v2326_v12, 258  ;;  %2236 = vbcast.lane.b32.xlu1 %v2234_v50, 256  ;;  %v2371_v50 = vsub.f32 0.0, %v2348_v51 }
0x1055   : > { %v2352_v49 = vpop.permute.xlu0 %2351 }
0x1056   : > { %2367 = vbcast.lane.b32.xlu0 %v2333_v9, 258  ;;  %2243 = vbcast.lane.b32.xlu1 %v2241_v48, 256  ;;  %v2372_v48 = vsub.f32 0.0, %v2352_v49 }
0x1059   : > { %v2356_v43 = vpop.permute.xlu0 %2355 }
0x105a   : > { %2293 = vbcast.lane.b32.xlu0 %v2291_v19, 256  ;;  %2250 = vbcast.lane.b32.xlu1 %v2248_v25, 256 }
0x105d   : > { %v2360_v0 = vpop.permute.xlu0 %2359 }
0x105e   : > { %2307 = vbcast.lane.b32.xlu0 %v2305_v54, 256  ;;  %2257 = vbcast.lane.b32.xlu1 %v2255_v7, 256  ;;  %v2374_v51 = vsub.f32 0.0, %v2360_v0 }
0x1062   : > { %2321 = vbcast.lane.b32.xlu0 %v2319_v23, 256  ;;  %2264 = vbcast.lane.b32.xlu1 %v2262_v41, 256 }
0x1066   : > { %2335 = vbcast.lane.b32.xlu0 %v2333_v9, 256  ;;  %2271 = vbcast.lane.b32.xlu1 %v2269_v44, 256 }
0x106a   : > { %2286 = vbcast.lane.b32.xlu1 %v2284_v14, 256 }
0x106e   : > { %2300 = vbcast.lane.b32.xlu1 %v2298_v13, 256  ;;  %v2370_v13 = vsub.f32 0.0, %v2344_v30 }
0x1072   : > { %2314 = vbcast.lane.b32.xlu1 %v2312_v52, 256 }
0x1076   : > { %2328 = vbcast.lane.b32.xlu1 %v2326_v12, 256 }
0x107a   : > { %1992 = vrot.lane.b32.xlu1 %v1981_v21, %s5825_s28 }
0x10c0   : > { %v2230_v14 = vpop.permute.xlu0 %2229  ;;  %v2223_v19 = vpop.permute.xlu1 %2222 }
0x10c1   : > { %v2274_v54 = vsub.f32 %v2230_v14, %v4904_v60  ;;  %v2273_v52 = vsub.f32 %v2223_v19, %v4904_v60  ;;  %v2373_v14 = vsub.f32 0.0, %v2356_v43 }
0x10c3   : > { %v2378_v23 = vmul.f32 %v2370_v13, %v2274_v54  ;;  %v2377_v6 = vmul.f32 %v2369_v32, %v2273_v52 }
0x10c4   : > { %v2237_v11 = vpop.permute.xlu1 %2236  ;;  %v2364_v12 = vpop.permute.xlu0 %2363 }
0x10c5   : > { %v2386_v26 = vmul.f32 %v2378_v23, %v2274_v54  ;;  %v2275_v28 = vsub.f32 %v2237_v11, %v4904_v60  ;;  %v2385_v7 = vmul.f32 %v2377_v6, %v2273_v52 }
0x10c7   : > { %v2395_v10 = vmul.f32 1.442695, %v2386_v26  ;;  %v2379_v41 = vmul.f32 %v2371_v50, %v2275_v28  ;;  %v2393_v54 = vmul.f32 1.442695, %v2385_v7 }
0x10c8   : > { %v2244_v9 = vpop.permute.xlu1 %2243  ;;  %v2368_v19 = vpop.permute.xlu0 %2367 }
0x10c9   : > { %4270 = vpow2.f32 %v2395_v10  ;;  %v2276_v25 = vsub.f32 %v2244_v9, %v4904_v60  ;;  %v2387_v23 = vmul.f32 %v2379_v41, %v2275_v28  ;;  %v1984_v28 = vadd.f32 %v5235_v5, %v1981_v21 }
0x10cb   : > { %v2380_v44 = vmul.f32 %v2372_v48, %v2276_v25  ;;  %v2397_v10 = vmul.f32 1.442695, %v2387_v23 }
0x10cc   : > { %v2251_v30 = vpop.permute.xlu1 %2250  ;;  %v2294_v50 = vpop.permute.xlu0 %2293 }
0x10cd   : > { %v2388_v8 = vmul.f32 %v2380_v44, %v2276_v25  ;;  %v2277_v13 = vsub.f32 %v2251_v30, %v4904_v60  ;;  %v2375_v25 = vsub.f32 0.0, %v2364_v12  ;;  %v3897_v12 = vmul.f32 -1.442695, %v1984_v28 }
0x10cf   : > { %v2399_v32 = vmul.f32 1.442695, %v2388_v8  ;;  %v2381_v11 = vmul.f32 %v2373_v14, %v2277_v13 }
0x10d0   : > { %v2258_v26 = vpop.permute.xlu1 %2257 }
0x10d1   : > { %4272 = vpow2.f32 %v2399_v32  ;;  %v2278_v49 = vsub.f32 %v2258_v26, %v4904_v60  ;;  %v2389_v52 = vmul.f32 %v2381_v11, %v2277_v13 }
0x10d2   : > { %4274 = vpow2.f32 %v2393_v54  ;;  %v2376_v54 = vsub.f32 0.0, %v2368_v19 }
0x10d3   : > { %v4271_v6 = vpop.eup %4270  ;;  %v2382_v9 = vmul.f32 %v2374_v51, %v2278_v49  ;;  %4276 = vpow2.f32 %v2397_v10  ;;  %v2401_v41 = vmul.f32 1.442695, %v2389_v52 }
0x10d4   : > { %v2410_v43 = vmul.f32 %v4271_v6, %v2294_v50  ;;  %v2265_v48 = vpop.permute.xlu1 %2264 }
0x10d5   : > { %v2390_v44 = vmul.f32 %v2382_v9, %v2278_v49  ;;  %v2279_v7 = vsub.f32 %v2265_v48, %v4904_v60  ;;  %v2308_v49 = vpop.permute.xlu0 %2307 }
0x10d6   : > { %v2424_v0 = vsel %vm1112_vm10, %v2410_v43, 0.0 }
0x10d7   : > { %v2425_v30 = vrot.slane %v2424_v0, 4  ;;  %v2403_v14 = vmul.f32 1.442695, %v2390_v44  ;;  %v2383_v8 = vmul.f32 %v2375_v25, %v2279_v7 }
0x10d8   : > { %v2272_v13 = vpop.permute.xlu1 %2271 }
0x10d9   : > { %v2426_v23 = vadd.f32 %v2425_v30, %v2424_v0  ;;  %4278 = vpow2.f32 %v2403_v14  ;;  %v2391_v32 = vmul.f32 %v2383_v8, %v2279_v7  ;;  %v2280_v11 = vsub.f32 %v2272_v13, %v4904_v60 }
0x10da   : > { %4280 = vpow2.f32 %v2401_v41 }
0x10db   : > { %v4273_v26 = vpop.eup %4272  ;;  %v2427_v51 = vrot.slane %v2426_v23, 2  ;;  %v2405_v21 = vmul.f32 1.442695, %v2391_v32  ;;  %v2384_v10 = vmul.f32 %v2376_v54, %v2280_v11 }
0x10dc   : > { %v4275_v6 = vpop.eup %4274  ;;  %v2412_v50 = vmul.f32 %v4273_v26, %v2308_v49  ;;  %v2287_v52 = vpop.permute.xlu1 %2286 }
0x10dd   : > { %v2428_v9 = vadd.f32 %v2427_v51, %v2426_v23  ;;  %4282 = vpow2.f32 %v2405_v21  ;;  %v2392_v43 = vmul.f32 %v2384_v10, %v2280_v11  ;;  %v2409_v19 = vmul.f32 %v4275_v6, %v2287_v52  ;;  %v4277_v0 = vpop.eup %4276  ;;  %v2322_v11 = vpop.permute.xlu0 %2321 }
0x10de   : > { %4284 = vpow2.f32 %v3897_v12  ;;  %v2438_v48 = vsel %vm1112_vm10, %v2412_v50, 0.0 }
0x10df   : > { %v2439_v25 = vrot.slane %v2438_v48, 4  ;;  %v2407_v44 = vmul.f32 1.442695, %v2392_v43  ;;  %v2417_v7 = vsel %vm1112_vm10, %v2409_v19, 0.0  ;;  %v2429_v28 = vrot.slane %v2428_v9, 1 }
0x10e0   : > { %v2418_v41 = vrot.slane %v2417_v7, 4  ;;  %v2301_v30 = vpop.permute.xlu1 %2300 }
0x10e1   : > { %v2440_v14 = vadd.f32 %v2439_v25, %v2438_v48  ;;  %4286 = vpow2.f32 %v2407_v44  ;;  %v2411_v8 = vmul.f32 %v4277_v0, %v2301_v30  ;;  %v2430_v54 = vadd.f32 %v2429_v28, %v2428_v9 }
0x10e2   : > { %v2419_v13 = vadd.f32 %v2418_v41, %v2417_v7 }
0x10e3   : > { %v4279_v23 = vpop.eup %4278  ;;  %v2441_v32 = vrot.slane %v2440_v14, 2  ;;  %v2431_v12 = vsel %vm1112_vm10, %v2411_v8, 0.0  ;;  %2477 = vbcast.lane.b32.xlu1 %v2430_v54, 256 }
0x10e4   : > { %v4281_v26 = vpop.eup %4280  ;;  %v2414_v51 = vmul.f32 %v4279_v23, %v2322_v11  ;;  %v2420_v49 = vrot.slane %v2419_v13, 2  ;;  %v2432_v21 = vrot.slane %v2431_v12, 4  ;;  %v2315_v10 = vpop.permute.xlu1 %2314 }
0x10e5   : > { %v2442_v6 = vadd.f32 %v2441_v32, %v2440_v14  ;;  %v2413_v50 = vmul.f32 %v4281_v26, %v2315_v10 }
0x10e6   : > { %v2452_v52 = vsel %vm1112_vm10, %v2414_v51, 0.0  ;;  %v2421_v43 = vadd.f32 %v2420_v49, %v2419_v13  ;;  %v2433_v19 = vadd.f32 %v2432_v21, %v2431_v12  ;;  %v2336_v49 = vpop.permute.xlu0 %2335 }
0x10e7   : > { %v4283_v48 = vpop.eup %4282  ;;  %v2453_v9 = vrot.slane %v2452_v52, 4  ;;  %v2445_v25 = vsel %vm1112_vm10, %v2413_v50, 0.0  ;;  %v2443_v44 = vrot.slane %v2442_v6, 1 }
0x10e8   : > { %v4285_v7 = vpop.eup %4284  ;;  %v2434_v28 = vrot.slane %v2433_v19, 2  ;;  %v2446_v0 = vrot.slane %v2445_v25, 4  ;;  %v2329_v41 = vpop.permute.xlu1 %2328  ;;  %v2422_v30 = vrot.slane %v2421_v43, 1 }
0x10e9   : > { %v2454_v8 = vadd.f32 %v2453_v9, %v2452_v52  ;;  %v2415_v23 = vmul.f32 %v4283_v48, %v2329_v41  ;;  %v2444_v11 = vadd.f32 %v2443_v44, %v2442_v6  ;;  %v1988_v51 = vadd.f32 1.0, %v4285_v7 }
0x10ea   : > { %v2435_v18 = vadd.f32 %v2434_v28, %v2433_v19  ;;  %v2447_v14 = vadd.f32 %v2446_v0, %v2445_v25  ;;  %v2423_v32 = vadd.f32 %v2422_v30, %v2421_v43 }
0x10eb   : > { %v4287_v26 = vpop.eup %4286  ;;  %v2455_v13 = vrot.slane %v2454_v8, 2  ;;  %v2459_v12 = vsel %vm1112_vm10, %v2415_v23, 0.0  ;;  %2483 = vbcast.lane.b32.xlu1 %v2444_v11, 256  ;;  %4288 = vrcp.f32 %v1988_v51 }
0x10ec   : > { %v2448_v21 = vrot.slane %v2447_v14, 2  ;;  %v2460_v10 = vrot.slane %v2459_v12, 4  ;;  %2474 = vbcast.lane.b32.xlu0 %v2423_v32, 256  ;;  %v2436_v50 = vrot.slane %v2435_v18, 1  ;;  %v2416_v15 = vmul.f32 %v4287_v26, %v2336_v49  ;;  %v1993_v26 = vpop.permute.xlu1 %1992 }
0x10ed   : > { %v2456_v60 = vadd.f32 %v2455_v13, %v2454_v8  ;;  %v2594_v28 = vsel %vm1270_vm11, %v2430_v54, %v2423_v32 }
0x10ee   : > { %v2449_v45 = vadd.f32 %v2448_v21, %v2447_v14  ;;  %v2461_v52 = vadd.f32 %v2460_v10, %v2459_v12  ;;  %v2437_v48 = vadd.f32 %v2436_v50, %v2435_v18  ;;  %v2466_v43 = vsel %vm1112_vm10, %v2416_v15, 0.0  ;;  %v5325_v21 = vld [vmem:[%s5820_s1 + $0x8] sm:$0x3f] }
0x10ef   : > { %v2457_v6 = vrot.slane %v2456_v60, 1  ;;  %v2467_v25 = vrot.slane %v2466_v43, 4  ;;  %5828 = vst [vmem:[#allocation32_spill] sm:$0xff] %v5325_v21 }
0x10f0   : > { %v2462_v19 = vrot.slane %v2461_v52, 2  ;;  %2480 = vbcast.lane.b32.xlu0 %v2437_v48, 256  ;;  %v2450_v9 = vrot.slane %v2449_v45, 1  ;;  %v2595_v30 = vsel %vm1272_vm12, %v2437_v48, %v2594_v28 }
0x10f1   : > { %v2458_v44 = vadd.f32 %v2457_v6, %v2456_v60  ;;  %v2468_v41 = vadd.f32 %v2467_v25, %v2466_v43  ;;  %v2596_v23 = vsel %vm1274_vm13, %v2444_v11, %v2595_v30  ;;  %v5332_v6 = vld [vmem:[%s5820_s1 + $0x18] sm:$0x3f] }
0x10f2   : > { %v2463_v7 = vadd.f32 %v2462_v19, %v2461_v52  ;;  %v2451_v0 = vadd.f32 %v2450_v9, %v2449_v45  ;;  %5829 = vst [vmem:[#allocation33_spill] sm:$0xff] %v5332_v6  ;;  %v5338_v9 = vld [vmem:[%s5820_s1] sm:$0x3f] }
0x10f3   : > { %2489 = vbcast.lane.b32.xlu1 %v2458_v44, 256  ;;  %v2469_v18 = vrot.slane %v2468_v41, 2  ;;  %5830 = vst [vmem:[#allocation34_spill] sm:$0xff] %v5338_v9 }
0x10f4   : > { %2486 = vbcast.lane.b32.xlu0 %v2451_v0, 256  ;;  %v2464_v8 = vrot.slane %v2463_v7, 1  ;;  %v2597_v51 = vsel %vm1276_vm14, %v2451_v0, %v2596_v23 }
0x10f5   : > { %v2470_v15 = vadd.f32 %v2469_v18, %v2468_v41  ;;  %v5314_v13 = vpop.eup %4288  ;;  %v2598_v32 = vsel %vm1278_vm15, %v2458_v44, %v2597_v51 }
0x10f6   : > { %v2465_v14 = vadd.f32 %v2464_v8, %v2463_v7  ;;  %v1995_v45 = vmul.f32 %v5314_v13, %v1993_v26  ;;  %v5346_v8 = vld [vmem:[%s5820_s1 + $0x10] sm:$0x3f] }
0x10f7   : > { %v2471_v60 = vrot.slane %v2470_v15, 1  ;;  %5831 = vst [vmem:[#allocation35_spill] sm:$0xff] %v5346_v8 }
0x10f8   : > { %2492 = vbcast.lane.b32.xlu0 %v2465_v14, 256  ;;  %v2599_v12 = vsel %vm1280_vm0, %v2465_v14, %v2598_v32 }
0x10f9   : > { %v2472_v54 = vadd.f32 %v2471_v60, %v2470_v15 }
0x10fb   : > { %2495 = vbcast.lane.b32.xlu1 %v2472_v54, 256  ;;  %v2600_v11 = vsel %vm1282_vm1, %v2472_v54, %v2599_v12  ;;  %v5353_v54 = vld [vmem:[%s5820_s1 + $0x28] sm:$0x3f] }
0x10fc   : > { %1997 = vrot.lane.b32.xlu0 %v1995_v45, %s5825_s28  ;;  %2602 = vst.msk [vmem:[#allocation15] sm:$0xff] %vm1308_vm2, %v2600_v11  ;;  %5832 = vst [vmem:[#allocation36_spill] sm:$0xff] %v5353_v54  ;;  %v5359_v11 = vld [vmem:[%s5820_s1 + $0x20] sm:$0x3f] }
0x10fd   : > { %5833 = vst [vmem:[#allocation37_spill] sm:$0xff] %v5359_v11 }
0x1155   : > { %v2478_v49 = vpop.permute.xlu1 %2477 }
0x1156   : > { %v2498_v10 = vmul.f32 %v5325_v21, %v2478_v49 }
0x1158   : > { %v2512_v50 = vsel %vm1201_vm3, %v2498_v10, 0.0 }
0x1159   : > { %v2513_v52 = vrot.slane %v2512_v50, 4 }
0x115b   : > { %v2514_v44 = vadd.f32 %v2513_v52, %v2512_v50 }
0x115d   : > { %v2484_v48 = vpop.permute.xlu1 %2483  ;;  %v2515_v23 = vrot.slane %v2514_v44, 2 }
0x115e   : > { %v2500_v43 = vmul.f32 %v5332_v6, %v2484_v48  ;;  %v2475_v19 = vpop.permute.xlu0 %2474 }
0x115f   : > { %v2497_v25 = vmul.f32 %v5338_v9, %v2475_v19  ;;  %v2516_v10 = vadd.f32 %v2515_v23, %v2514_v44 }
0x1160   : > { %v2526_v7 = vsel %vm1201_vm3, %v2500_v43, 0.0 }
0x1161   : > { %v2527_v28 = vrot.slane %v2526_v7, 4  ;;  %v2505_v0 = vsel %vm1201_vm3, %v2497_v25, 0.0  ;;  %v2517_v44 = vrot.slane %v2516_v10, 1 }
0x1162   : > { %v2506_v41 = vrot.slane %v2505_v0, 4  ;;  %v2481_v30 = vpop.permute.xlu0 %2480 }
0x1163   : > { %v2499_v18 = vmul.f32 %v5346_v8, %v2481_v30  ;;  %v2528_v15 = vadd.f32 %v2527_v28, %v2526_v7  ;;  %v5367_v30 = vld [vmem:[%s5820_s1 + $0x30] sm:$0x3f] }
0x1164   : > { %v2507_v14 = vadd.f32 %v2506_v41, %v2505_v0  ;;  %5834 = vst [vmem:[#allocation38_spill] sm:$0xff] %v5367_v30 }
0x1165   : > { %v2519_v26 = vsel %vm1201_vm3, %v2499_v18, 0.0  ;;  %v2490_v51 = vpop.permute.xlu1 %2489  ;;  %v2529_v43 = vrot.slane %v2528_v15, 2 }
0x1166   : > { %v2508_v60 = vrot.slane %v2507_v14, 2  ;;  %v2520_v45 = vrot.slane %v2519_v26, 4  ;;  %v2502_v32 = vmul.f32 %v5353_v54, %v2490_v51  ;;  %v2487_v12 = vpop.permute.xlu0 %2486 }
0x1167   : > { %v2501_v49 = vmul.f32 %v5359_v11, %v2487_v12  ;;  %v2530_v51 = vadd.f32 %v2529_v43, %v2528_v15 }
0x1168   : > { %v2509_v50 = vadd.f32 %v2508_v60, %v2507_v14  ;;  %v2521_v52 = vadd.f32 %v2520_v45, %v2519_v26  ;;  %v2540_v48 = vsel %vm1201_vm3, %v2502_v32, 0.0 }
0x1169   : > { %v2541_v19 = vrot.slane %v2540_v48, 4  ;;  %v2533_v25 = vsel %vm1201_vm3, %v2501_v49, 0.0 }
0x116a   : > { %v2522_v7 = vrot.slane %v2521_v52, 2  ;;  %v2534_v28 = vrot.slane %v2533_v25, 4  ;;  %v2493_v0 = vpop.permute.xlu0 %2492  ;;  %v2510_v23 = vrot.slane %v2509_v50, 1 }
0x116b   : > { %v2542_v41 = vadd.f32 %v2541_v19, %v2540_v48  ;;  %v2503_v18 = vmul.f32 %v5367_v30, %v2493_v0  ;;  %v5374_v19 = vld [vmem:[%s5820_s1 + $0x38] sm:$0x3f] }
0x116c   : > { %v2523_v14 = vadd.f32 %v2522_v7, %v2521_v52  ;;  %v2535_v26 = vadd.f32 %v2534_v28, %v2533_v25  ;;  %v2518_v52 = vadd.f32 %v2517_v44, %v2516_v10  ;;  %v2511_v25 = vadd.f32 %v2510_v23, %v2509_v50 }
0x116d   : > { %v2547_v60 = vsel %vm1201_vm3, %v2503_v18, 0.0  ;;  %v2543_v32 = vrot.slane %v2542_v41, 2  ;;  %v2496_v11 = vpop.permute.xlu1 %2495  ;;  %v2531_v7 = vrot.slane %v2530_v51, 1 }
0x116e   : > { %v2524_v45 = vrot.slane %v2523_v14, 1  ;;  %v2536_v12 = vrot.slane %v2535_v26, 2  ;;  %v2548_v49 = vrot.slane %v2547_v60, 4  ;;  %v1998_v48 = vpop.permute.xlu0 %1997  ;;  %v2504_v0 = vmul.f32 %v5374_v19, %v2496_v11 }
0x116f   : > { %v2000_v30 = vadd.f32 %v1998_v48, %v5235_v5  ;;  %v2544_v54 = vadd.f32 %v2543_v32, %v2542_v41  ;;  %v2572_v21 = vsel %vm1270_vm11, %v2518_v52, %v2511_v25  ;;  %v2532_v10 = vadd.f32 %v2531_v7, %v2530_v51 }
0x1170   : > { %v2537_v15 = vadd.f32 %v2536_v12, %v2535_v26  ;;  %v2549_v43 = vadd.f32 %v2548_v49, %v2547_v60  ;;  %v2525_v28 = vadd.f32 %v2524_v45, %v2523_v14  ;;  %v2554_v18 = vsel %vm1201_vm3, %v2504_v0, 0.0  ;;  %v2723_v49 = vld [vmem:[#allocation4] sm:$0xff] }
0x1171   : > { %4290 = vtanh.f32 %v2000_v30  ;;  %v2555_v6 = vrot.slane %v2554_v18, 4  ;;  %v2545_v50 = vrot.slane %v2544_v54, 1  ;;  %v2002_v0 = vsub.f32 1.0, %v5314_v13 }
0x1172   : > { %v2538_v8 = vrot.slane %v2537_v15, 1  ;;  %v2550_v9 = vrot.slane %v2549_v43, 2  ;;  %v2573_v11 = vsel %vm1272_vm12, %v2525_v28, %v2572_v21 }
0x1173   : > { %v2556_v27 = vadd.f32 %v2555_v6, %v2554_v18  ;;  %v2574_v14 = vsel %vm1274_vm13, %v2532_v10, %v2573_v11  ;;  %v2546_v60 = vadd.f32 %v2545_v50, %v2544_v54 }
0x1174   : > { %v2551_v42 = vadd.f32 %v2550_v9, %v2549_v43  ;;  %v2539_v5 = vadd.f32 %v2538_v8, %v2537_v15 }
0x1175   : > { %v2557_v23 = vrot.slane %v2556_v27, 2 }
0x1176   : > { %v2552_v44 = vrot.slane %v2551_v42, 1  ;;  %v2575_v30 = vsel %vm1276_vm14, %v2539_v5, %v2574_v14 }
0x1177   : > { %v2558_v26 = vadd.f32 %v2557_v23, %v2556_v27  ;;  %v2576_v12 = vsel %vm1278_vm15, %v2546_v60, %v2575_v30 }
0x1178   : > { %v2553_v41 = vadd.f32 %v2552_v44, %v2551_v42 }
0x1179   : > { %v2559_v45 = vrot.slane %v2558_v26, 1 }
0x117a   : > { %v2577_v21 = vsel %vm1280_vm0, %v2553_v41, %v2576_v12 }
0x117b   : > { %v4291_v32 = vpop.eup %4290  ;;  %v2560_v9 = vadd.f32 %v2559_v45, %v2558_v26 }
0x117c   : > { %2004 = vrot.lane.b32.xlu0 %v4291_v32, %s5826_s30 }
0x117d   : > { %v5387_v6 = vsel %vm1282_vm1, %v2560_v9, %v2577_v21 }
0x117e   : > { %2580 = vst.msk [vmem:[#allocation7] sm:$0xff] %vm1285_vm4, %v5387_v6 }
0x1180   : > { %1871 = vrot.lane.b32.xlu0 %v5196_v38, %s5815_s10 }
0x1185   : > { %v2724_v27 = vld [vmem:[#allocation7] sm:$0xff] }
0x1186   : > { %2726 = vrot.lane.b32.xlu1 %v2724_v27, %s5815_s10 }
0x118a   : > { %2009 = vrot.lane.b32.xlu1 %v5201_v29, %s5815_s10 }
0x11ee   : > { %v2005_v42 = vpop.permute.xlu0 %2004 }
0x11f2   : > { %v1872_v8 = vpop.permute.xlu0 %1871 }
0x11f3   : > { %v1874_v54 = vsel %vm707_vm6, %v5021_v1, %v1872_v8  ;;  %v2007_v1 = vmul.f32 %v2005_v42, %v2002_v0 }
0x11f4   : > { %1875 = vst.msk [vmem:[#allocation3 + $0x10] sm:$0xff] %vm709_vm7, %v1874_v54 }
0x11f8   : > { %v2727_v51 = vpop.permute.xlu1 %2726 }
0x11f9   : > { %v2729_v48 = vsel %vm707_vm6, %v2723_v49, %v2727_v51 }
0x11fa   : > { %3903 = vmatmul.mubr.msk.f32.vlgmr.msra.gmra.mrb[12].mxu1 %vm709_vm7, %v2729_v48 }
0x11fb   : > { %v5401_v38 = vld [vmem:[#allocation3 + $0x10] sm:$0xff]  ;;  %4083 = vmatpush3.bf16.msra.mxu1 %v4832_v59  ;;  %3996 = vmatprep.mubr.msk.f32.mxu1 %vm4542_vm8, %v5823_v56 }
0x11fc   : > { %2606 = vrot.lane.b32.xlu0 %v5401_v38, %s5815_s10  ;;  %v2010_v29 = vpop.permute.xlu1 %2009  ;;  %4084 = vmatprep.subr.bf16.mxu1 %v5824_v58 }
0x11fd   : > { %v2012_v52 = vmul.f32 %v5314_v13, %v2010_v29 }
0x11ff   : > { %v2013_v25 = vadd.f32 %v2012_v52, %v2007_v1  ;;  %4086 = vmatpush3.bf16.msra.mxu1 %v4840_v61  ;;  %v5835_v61 = vmov 0  }
0x1200   : > { %4104 = vmatprep.subr.bf16.mxu1 %v5082_v46  ;;  %v643_v46 = vadd.f32 %v5006_v17, %v4810_v39  ;;  %v635_v39 = vadd.f32 %v4798_v34, %v5229_v55 }
0x1201   : > { %2015 = vrot.lane.b32.xlu1 %v2013_v25, %s5826_s30 }
0x126e   : > { %v2607_v59 = vpop.permute.xlu0 %2606 }
0x1273   : > { %v2016_v15 = vpop.permute.xlu1 %2015 }
0x1274   : > { %2018 = vst.msk [vmem:[#allocation5] sm:$0xff] %vm707_vm6, %v2016_v15  ;;  %2019 = vst.msk [vmem:[#allocation3 + $0x8] sm:$0xff] %vm707_vm6, %v2016_v15 }
0x127b   : > { %v2603_v58 = vld [vmem:[#allocation5] sm:$0xff] }
0x127c   : > { %v2609_v43 = vsel %vm707_vm6, %v2603_v58, %v2607_v59 }
0x127d   : > { %3901 = vmatmul.mubr.msk.f32.vlgmr.msra.gmra.mrb[10].mxu0 %vm1900_vm5, %v2609_v43  ;;  %v4204_v43 = vld [vmem:[#allocation8] sm:$0xff]  }
0x127e   : > { %4090 = vmatpush1.bf16.msra.mxu0 %v5093_v40  ;;  %3380 = vmatprep.mubr.f32.mxu0 %v5823_v56 }
0x127f   : > { %4092 = vmatprep.subr.bf16.mxu0 %v5095_v63 }
0x1282   : > { %4094 = vmatpush1.bf16.msra.mxu0 %v5112_v31 }
0x1283   : > { %4096 = vmatprep.subr.bf16.mxu0 %v5116_v62 }
0x1286   : > { %4098 = vmatpush1.bf16.msra.mxu0 %v5132_v53 }
0x1287   : > { %4100 = vmatprep.subr.bf16.mxu0 %v5136_v36 }
0x128a   : > { %4102 = vmatpush1.bf16.msra.mxu0 %v5146_v35 }
0x128b   : > { %3332 = vmatprep.subr.mxu0 %v5154_v33 }
0x128e   : > { %3333 = vmatpush1.msra.mxu0 %v5176_v57 }
0x128f   : > { %3651 = vmatprep.subr.bf16.mxu0 %v5835_v61 }
0x12cd   : > { %v2799_v13 = vpop.f32.mrb[12].mxu1 }
0x12ce   : > { %v2804_v7 = vadd.f32 %v5242_v4, %v2799_v13  ;;  %v2801_v28 = vpop.f32.mrb[13].mxu1 }
0x12cf   : > { %v2806_v18 = vadd.f32 %v2801_v28, %v643_v46 }
0x12d0   : > { %2815 = vrot.lane.b32.xlu1 %v2804_v7, %s5825_s28 }
0x12d1   : > { %v2807_v11 = vadd.f32 %v2806_v18, %v2804_v7 }
0x12d3   : > { %v3904_v5 = vmul.f32 -1.442695, %v2807_v11  ;;  %v4206_v11 = vld [vmem:[#allocation8 + $0x10] sm:$0xff]  }
0x12d5   : > { %4292 = vpow2.f32 %v3904_v5  ;;  %v4207_v5 = vld [vmem:[#allocation8 + $0x18] sm:$0xff]  }
0x12df   : > { %v4293_v10 = vpop.eup %4292 }
0x12e0   : > { %v2811_v50 = vadd.f32 1.0, %v4293_v10  ;;  %v4208_v10 = vld [vmem:[#allocation8 + $0x20] sm:$0xff]  }
0x12e2   : > { %4294 = vrcp.f32 %v2811_v50  ;;  %v4209_v50 = vld [vmem:[#allocation8 + $0x28] sm:$0xff]  }
0x12ec   : > { %v4295_v33 = vpop.eup %4294 }
0x12ed   : > { %v2825_v42 = vsub.f32 1.0, %v4295_v33 }
0x1342   : > { %v2816_v57 = vpop.permute.xlu1 %2815 }
0x1343   : > { %v2818_v44 = vmul.f32 %v4295_v33, %v2816_v57  ;;  %v4211_v57 = vld [vmem:[#allocation8 + $0x38] sm:$0xff]  }
0x1345   : > { %2820 = vrot.lane.b32.xlu0 %v2818_v44, %s5825_s28  ;;  %v4212_v44 = vld [vmem:[#allocation8 + $0x40] sm:$0xff]  }
0x1350   : > { %v2679_v17 = vpop.f32.mrb[10].mxu0 }
0x1351   : > { %v2684_v4 = vadd.f32 %v5288_v3, %v2679_v17  ;;  %v2681_v23 = vpop.f32.mrb[11].mxu0  ;;  %v3546_v17 = vld [vmem:[#allocation3] sm:$0xff] }
0x1352   : > { %v2686_v14 = vadd.f32 %v2681_v23, %v635_v39  ;;  %v4213_v39 = vld [vmem:[#allocation8 + $0x48] sm:$0xff]  }
0x1353   : > { %2695 = vrot.lane.b32.xlu1 %v2684_v4, %s5825_s28 }
0x1354   : > { %v2687_v26 = vadd.f32 %v2686_v14, %v2684_v4  ;;  %v3554_v4 = vpack.c.bf16 %v5401_v38, %v3546_v17 }
0x1356   : > { %v3902_v30 = vmul.f32 -1.442695, %v2687_v26 }
0x1357   : > { %2832 = vrot.lane.b32.xlu1 %v2723_v49, %s5815_s10 }
0x1358   : > { %4296 = vpow2.f32 %v3902_v30 }
0x1362   : > { %v4297_v41 = vpop.eup %4296 }
0x1363   : > { %v2691_v60 = vadd.f32 1.0, %v4297_v41 }
0x13b7   : > { %v2821_v45 = vpop.permute.xlu0 %2820 }
0x13b8   : > { %v2823_v32 = vadd.f32 %v2821_v45, %v2806_v18  ;;  %v4205_v18 = vld [vmem:[#allocation8 + $0x8] sm:$0xff]  }
0x13ba   : > { %4298 = vtanh.f32 %v2823_v32  ;;  %v5836_v32 = vld [vmem:[#allocation26_spill] sm:$0xff] }
0x13bb   : > { %4300 = vrcp.f32 %v2691_v60 }
0x13c4   : > { %v4299_v12 = vpop.eup %4298 }
0x13c5   : > { %v4301_v34 = vpop.eup %4300  ;;  %v2696_v9 = vpop.permute.xlu1 %2695  ;;  %2827 = vrot.lane.b32.xlu0 %v4299_v12, %s5826_s30 }
0x13c6   : > { %v2698_v21 = vmul.f32 %v4301_v34, %v2696_v9  ;;  %v2705_v25 = vsub.f32 1.0, %v4301_v34 }
0x13c9   : > { %2700 = vrot.lane.b32.xlu0 %v2698_v21, %s5825_s28  ;;  %v2833_v27 = vpop.permute.xlu1 %2832 }
0x13ca   : > { %v2835_v54 = vmul.f32 %v4295_v33, %v2833_v27  ;;  %v4210_v33 = vld [vmem:[#allocation8 + $0x30] sm:$0xff]  }
0x1437   : > { %v2828_v8 = vpop.permute.xlu0 %2827 }
0x1438   : > { %v2830_v51 = vmul.f32 %v2828_v8, %v2825_v42  ;;  %v5837_v8 = vld [vmem:[#allocation27_spill] sm:$0xff] }
0x143a   : > { %v2836_v49 = vadd.f32 %v2835_v54, %v2830_v51 }
0x143b   : > { %v2701_v48 = vpop.permute.xlu0 %2700 }
0x143c   : > { %v2703_v0 = vadd.f32 %v2701_v48, %v2686_v14  ;;  %2838 = vrot.lane.b32.xlu1 %v2836_v49, %s5826_s30  ;;  %v5838_v48 = vld [vmem:[#allocation28_spill] sm:$0xff] }
0x143e   : > { %4302 = vtanh.f32 %v2703_v0 }
0x1440   : > { %2712 = vrot.lane.b32.xlu1 %v2603_v58, %s5815_s10 }
0x1448   : > { %v4303_v29 = vpop.eup %4302 }
0x1449   : > { %2707 = vrot.lane.b32.xlu0 %v4303_v29, %s5826_s30 }
0x144d   : > { %2581 = vrot.lane.b32.xlu0 %v5387_v6, %s5815_s10 }
0x14ae   : > { %v5446_v1 = vpop.permute.xlu1 %2838 }
0x14af   : > { %3265 = vst.msk [vmem:[#allocation4] sm:$0xff] %vm707_vm6, %v5446_v1  ;;  %3997 = vmatmul.mubr.msk.f32.vlgmr.msra.gmra.mrb[14].mxu1 %vm707_vm6, %v5446_v1 }
0x14b0   : > { %4106 = vmatpush1.bf16.msra.mxu1 %v5093_v40  ;;  %3500 = vmatprep.mubr.f32.mxu1 %v5823_v56 }
0x14b1   : > { %4108 = vmatprep.subr.bf16.mxu1 %v5095_v63  ;;  %v4347_v63 = vld [vmem:[%s5748_s8 + $0x88] sm:$0xff] }
0x14b2   : > { %v2713_v6 = vpop.permute.xlu1 %2712 }
0x14b3   : > { %v2715_v59 = vmul.f32 %v4301_v34, %v2713_v6  ;;  %v2914_v34 = vld [vmem:[#allocation6] sm:$0xff] }
0x14b4   : > { %4110 = vmatpush1.bf16.msra.mxu1 %v5112_v31 }
0x14b5   : > { %4112 = vmatprep.subr.bf16.mxu1 %v5116_v62 }
0x14b6   : > { %v3704_v52 = vld [vmem:[#allocation4] sm:$0xff] }
0x14b7   : > { %3705 = vst.msk [vmem:[#allocation12] sm:$0xff] %vm707_vm6, %v3704_v52 }
0x14b8   : > { %4114 = vmatpush1.bf16.msra.mxu1 %v5132_v53  ;;  %v4348_v53 = vld [vmem:[%s5748_s8 + $0x80] sm:$0xff] }
0x14b9   : > { %4116 = vmatprep.subr.bf16.mxu1 %v5136_v36 }
0x14bb   : > { %v2708_v15 = vpop.permute.xlu0 %2707 }
0x14bc   : > { %v2710_v40 = vmul.f32 %v2708_v15, %v2705_v25  ;;  %4118 = vmatpush1.bf16.msra.mxu1 %v5146_v35 }
0x14bd   : > { %3452 = vmatprep.subr.mxu1 %v4347_v63 }
0x14be   : > { %v2716_v31 = vadd.f32 %v2715_v59, %v2710_v40  ;;  %v5525_v40 = vld [vmem:[%s5751_s11] ss:$0 sm:$0xff] }
0x14bf   : > { %v2582_v62 = vpop.permute.xlu0 %2581 }
0x14c0   : > { %v2584_v56 = vsel %vm707_vm6, %v5250_v47, %v2582_v62  ;;  %2718 = vrot.lane.b32.xlu1 %v2716_v31, %s5826_s30  ;;  %3453 = vmatpush1.msra.mxu1 %v4348_v53  ;;  %v3547_v47 = vld [vmem:[#allocation3 + $0x8] sm:$0xff] }
0x14c1   : > { %2585 = vst.msk [vmem:[#allocation3 + $0x20] sm:$0xff] %vm709_vm7, %v2584_v56 }
0x14c8   : > { %v5471_v36 = vld [vmem:[#allocation3 + $0x20] sm:$0xff] }
0x14c9   : > { %3309 = vrot.lane.b32.xlu0 %v5471_v36, %s5815_s10 }
0x1532   : > { %v2719_v35 = vpop.permute.xlu1 %2718 }
0x1533   : > { %2721 = vst.msk [vmem:[#allocation5] sm:$0xff] %vm707_vm6, %v2719_v35  ;;  %2722 = vst.msk [vmem:[#allocation3 + $0x18] sm:$0xff] %vm707_vm6, %v2719_v35 }
0x153a   : > { %v5477_v58 = vld [vmem:[#allocation5] sm:$0xff]  ;;  %v3549_v46 = vld [vmem:[#allocation3 + $0x18] sm:$0xff] }
0x153b   : > { %v3310_v13 = vpop.permute.xlu0 %3309  ;;  %v3555_v7 = vpack.c.bf16 %v3549_v46, %v3547_v47 }
0x153c   : > { %v3312_v28 = vsel %vm707_vm6, %v5477_v58, %v3310_v13 }
0x153d   : > { %3906 = vmatmul.mubr.msk.f32.vlgmr.msra.gmra.mrb[12].mxu0 %vm1900_vm5, %v3312_v28 }
0x153e   : > { %3652 = vmatpush1.bf16.msra.mxu0 %v4204_v43  ;;  %3921 = vmatprep.mubr.msk.bf16.mxu0 %vm707_vm6, %v3555_v7 }
0x153f   : > { %3653 = vmatprep.subr.bf16.mxu0 %v5835_v61 }
0x1542   : > { %3654 = vmatpush1.bf16.msra.mxu0 %v4205_v18 }
0x1543   : > { %3655 = vmatprep.subr.bf16.mxu0 %v5835_v61 }
0x1546   : > { %3656 = vmatpush1.bf16.msra.mxu0 %v4206_v11 }
0x1547   : > { %3657 = vmatprep.subr.bf16.mxu0 %v5835_v61 }
0x154a   : > { %3658 = vmatpush1.bf16.msra.mxu0 %v4207_v5  ;;  %v5840_v5 = vld [vmem:[#allocation29_spill] sm:$0xff] }
0x154b   : > { %3659 = vmatprep.subr.bf16.mxu0 %v5835_v61 }
0x154e   : > { %3660 = vmatpush1.bf16.msra.mxu0 %v4208_v10 }
0x154f   : > { %3661 = vmatprep.subr.bf16.mxu0 %v5835_v61 }
0x1552   : > { %3662 = vmatpush1.bf16.msra.mxu0 %v4209_v50 }
0x1553   : > { %3663 = vmatprep.subr.bf16.mxu0 %v5835_v61 }
0x1556   : > { %3664 = vmatpush1.bf16.msra.mxu0 %v4210_v33 }
0x1557   : > { %3665 = vmatprep.subr.bf16.mxu0 %v5835_v61 }
0x155a   : > { %3666 = vmatpush1.bf16.msra.mxu0 %v4211_v57 }
0x155b   : > { %3667 = vmatprep.subr.bf16.mxu0 %v5835_v61 }
0x155e   : > { %3668 = vmatpush1.bf16.msra.mxu0 %v4212_v44 }
0x155f   : > { %3669 = vmatprep.subr.bf16.mxu0 %v5835_v61 }
0x1562   : > { %3670 = vmatpush1.bf16.msra.mxu0 %v4213_v39 }
0x1565   : > { %3684 = vmatmul.mubr.bf16.vlgmr.msra.gmra.mrb[16].mxu0 %v3554_v4 }
0x1582   : > { %v2908_v23 = vpop.f32.mrb[14].mxu1 }
0x1583   : > { %v2909_v14 = vadd.f32 %v5264_v2, %v2908_v23  ;;  %v3998_v26 = vpop.f32.mrb[15].mxu1 }
0x1585   : > { %v2912_v30 = vmul.f32 1.442695, %v2909_v14 }
0x1587   : > { %4304 = vpow2.f32 %v2912_v30 }
0x1591   : > { %v4305_v41 = vpop.eup %4304 }
0x1592   : > { %2916 = vrot.lane.b32.xlu1 %v4305_v41, %s5827_s19  ;;  %v2987_v60 = vrot.slane %v4305_v41, %v4804_v37  ;;  %v2994_v45 = vrot.slane %v4305_v41, %v4865_v16  ;;  %v3001_v61 = vrot.slane %v4305_v41, %v4871_v20  ;;  %v3008_v38 = vrot.slane %v4305_v41, %v4875_v22 }
0x1593   : > { %v3015_v2 = vrot.slane %v4305_v41, %v4879_v24  ;;  %v3022_v12 = vrot.slane %v4305_v41, %v5836_v32  ;;  %v3029_v54 = vrot.slane %v4305_v41, %v5837_v8  ;;  %v3036_v0 = vrot.slane %v4305_v41, %v5838_v48 }
0x1594   : > { %3042 = vbcast.lane.b32.xlu0 %v2987_v60, 258 }
0x1596   : > { %3046 = vbcast.lane.b32.xlu1 %v2994_v45, 258 }
0x159a   : > { %3050 = vbcast.lane.b32.xlu1 %v3001_v61, 258 }
0x159e   : > { %3054 = vbcast.lane.b32.xlu1 %v3008_v38, 258 }
0x15a2   : > { %3058 = vbcast.lane.b32.xlu1 %v3015_v2, 258 }
0x15a6   : > { %3062 = vbcast.lane.b32.xlu1 %v3022_v12, 258 }
0x1604   : > { %v2917_v9 = vpop.permute.xlu1 %2916 }
0x1605   : > { %v2919_v21 = vadd.f32 %v2917_v9, %v2914_v34 }
0x1606   : > { %v3043_v13 = vpop.permute.xlu0 %3042 }
0x1607   : > { %3266 = vst.msk [vmem:[#allocation6] sm:$0xff] %vm1260_vm9, %v2919_v21  ;;  %v2930_v27 = vrot.slane %v2919_v21, %v4865_v16  ;;  %v2923_v42 = vrot.slane %v2919_v21, %v4804_v37  ;;  %v2937_v51 = vrot.slane %v2919_v21, %v4871_v20  ;;  %v2944_v16 = vrot.slane %v2919_v21, %v4875_v22  ;;  %v5839_v37 = vld [vmem:[#allocation30_spill] sm:$0xff] }
0x1608   : > { %v641_v29 = vadd.f32 %v5839_v37, %v5229_v55  ;;  %v2951_v25 = vrot.slane %v2919_v21, %v4879_v24  ;;  %v2958_v15 = vrot.slane %v2919_v21, %v5836_v32  ;;  %v2965_v59 = vrot.slane %v2919_v21, %v5837_v8  ;;  %v3047_v47 = vpop.permute.xlu1 %3046 }
0x1609   : > { %2932 = vbcast.lane.b32.xlu1 %v2930_v27, 256  ;;  %2925 = vbcast.lane.b32.xlu0 %v2923_v42, 256  ;;  %v2972_v22 = vrot.slane %v2919_v21, %v5838_v48  ;;  %v3073_v11 = vsub.f32 0.0, %v3047_v47  ;;  %v3072_v57 = vsub.f32 0.0, %v3043_v13 }
0x160c   : > { %v3051_v43 = vpop.permute.xlu1 %3050 }
0x160d   : > { %3066 = vbcast.lane.b32.xlu1 %v3029_v54, 258  ;;  %2939 = vbcast.lane.b32.xlu0 %v2937_v51, 256  ;;  %v3074_v26 = vsub.f32 0.0, %v3051_v43 }
0x160e   : > { %v3709_v49 = vld [vmem:[#allocation6] sm:$0xff] }
0x160f   : > { %3710 = vst.msk [vmem:[%s5754_s14] sm:$0xff] %vm1260_vm9, %v3709_v49 }
0x1610   : > { %v3382_v52 = vpop.f32.mrb[12].mxu0 }
0x1611   : > { %3070 = vbcast.lane.b32.xlu1 %v3036_v0, 258  ;;  %2946 = vbcast.lane.b32.xlu0 %v2944_v16, 256  ;;  %v3384_v6 = vpop.f32.mrb[13].mxu0  ;;  %v3387_v24 = vadd.f32 %v5288_v3, %v3382_v52  ;;  %v3055_v3 = vpop.permute.xlu1 %3054 }
0x1612   : > { %v5514_v20 = vadd.f32 %v3384_v6, %v641_v29  ;;  %v3075_v41 = vsub.f32 0.0, %v3055_v3 }
0x1615   : > { %2996 = vbcast.lane.b32.xlu1 %v2994_v45, 256  ;;  %2953 = vbcast.lane.b32.xlu0 %v2951_v25, 256  ;;  %v3059_v46 = vpop.permute.xlu1 %3058 }
0x1616   : > { %v3076_v32 = vsub.f32 0.0, %v3059_v46 }
0x1619   : > { %3010 = vbcast.lane.b32.xlu1 %v3008_v38, 256  ;;  %2960 = vbcast.lane.b32.xlu0 %v2958_v15, 256  ;;  %v3063_v7 = vpop.permute.xlu1 %3062 }
0x161a   : > { %v3077_v51 = vsub.f32 0.0, %v3063_v7 }
0x161d   : > { %3024 = vbcast.lane.b32.xlu1 %v3022_v12, 256  ;;  %2967 = vbcast.lane.b32.xlu0 %v2965_v59, 256 }
0x1621   : > { %3038 = vbcast.lane.b32.xlu1 %v3036_v0, 256  ;;  %2974 = vbcast.lane.b32.xlu0 %v2972_v22, 256  ;;  %v3390_v22 = vadd.f32 %v5514_v20, %v3387_v24 }
0x1623   : > { %v3907_v13 = vmul.f32 -1.442695, %v3390_v22 }
0x1625   : > { %2989 = vbcast.lane.b32.xlu0 %v2987_v60, 256 }
0x1629   : > { %3003 = vbcast.lane.b32.xlu0 %v3001_v61, 256 }
0x162d   : > { %3017 = vbcast.lane.b32.xlu0 %v3015_v2, 256 }
0x1631   : > { %3031 = vbcast.lane.b32.xlu0 %v3029_v54, 256 }
0x1635   : > { %3398 = vrot.lane.b32.xlu0 %v3387_v24, %s5825_s28 }
0x1638   : > { %v3685_v63 = vpop.f32.mrb[16].mxu0 }
0x1639   : > { %v3686_v31 = vadd.f32 %v5525_v40, %v3685_v63  ;;  %v3687_v62 = vpop.f32.mrb[17].mxu0 }
0x163a   : > { %v3688_v56 = vpop.f32.mrb[18].mxu0 }
0x163b   : > { %3700 = vst [vmem:[%s4731_s27] sm:$0xff] %v3686_v31  ;;  %v3689_v53 = vadd.f32 %v5525_v40, %v3688_v56  ;;  %v3690_v35 = vpop.f32.mrb[19].mxu0 }
0x163d   : > { %3701 = vst [vmem:[%s4731_s27 + $0x8] sm:$0xff] %v3689_v53 }
0x167b   : > { %v2933_v28 = vpop.permute.xlu1 %2932  ;;  %v2926_v18 = vpop.permute.xlu0 %2925 }
0x167c   : > { %v2977_v10 = vsub.f32 %v2933_v28, %v5840_v5  ;;  %v2976_v50 = vsub.f32 %v2926_v18, %v5840_v5 }
0x167e   : > { %v3081_v33 = vmul.f32 %v3073_v11, %v2977_v10  ;;  %v3080_v17 = vmul.f32 %v3072_v57, %v2976_v50 }
0x167f   : > { %v2940_v44 = vpop.permute.xlu0 %2939  ;;  %v3067_v14 = vpop.permute.xlu1 %3066 }
0x1680   : > { %v3089_v39 = vmul.f32 %v3081_v33, %v2977_v10  ;;  %v2978_v4 = vsub.f32 %v2940_v44, %v5840_v5  ;;  %v3088_v45 = vmul.f32 %v3080_v17, %v2976_v50  ;;  %v3078_v25 = vsub.f32 0.0, %v3067_v14 }
0x1682   : > { %v3098_v23 = vmul.f32 1.442695, %v3089_v39  ;;  %v3082_v61 = vmul.f32 %v3074_v26, %v2978_v4  ;;  %v3096_v21 = vmul.f32 1.442695, %v3088_v45 }
0x1683   : > { %v2947_v30 = vpop.permute.xlu0 %2946  ;;  %v3071_v12 = vpop.permute.xlu1 %3070 }
0x1684   : > { %4306 = vpow2.f32 %v3098_v23  ;;  %v2979_v60 = vsub.f32 %v2947_v30, %v5840_v5  ;;  %v3090_v27 = vmul.f32 %v3082_v61, %v2978_v4  ;;  %v3079_v35 = vsub.f32 0.0, %v3071_v12 }
0x1686   : > { %v3083_v38 = vmul.f32 %v3075_v41, %v2979_v60  ;;  %v3100_v48 = vmul.f32 1.442695, %v3090_v27 }
0x1687   : > { %v2954_v2 = vpop.permute.xlu0 %2953  ;;  %v2997_v37 = vpop.permute.xlu1 %2996 }
0x1688   : > { %v3091_v34 = vmul.f32 %v3083_v38, %v2979_v60  ;;  %v2980_v9 = vsub.f32 %v2954_v2, %v5840_v5 }
0x168a   : > { %v3102_v42 = vmul.f32 1.442695, %v3091_v34  ;;  %v3084_v8 = vmul.f32 %v3076_v32, %v2980_v9 }
0x168b   : > { %v2961_v54 = vpop.permute.xlu0 %2960  ;;  %v3011_v18 = vpop.permute.xlu1 %3010 }
0x168c   : > { %4308 = vpow2.f32 %v3102_v42  ;;  %v2981_v49 = vsub.f32 %v2961_v54, %v5840_v5  ;;  %v3092_v0 = vmul.f32 %v3084_v8, %v2980_v9 }
0x168d   : > { %4310 = vpow2.f32 %v3096_v21 }
0x168e   : > { %v4307_v16 = vpop.eup %4306  ;;  %v3085_v29 = vmul.f32 %v3077_v51, %v2981_v49  ;;  %4312 = vpow2.f32 %v3100_v48  ;;  %v3104_v31 = vmul.f32 1.442695, %v3092_v0 }
0x168f   : > { %v3113_v52 = vmul.f32 %v4307_v16, %v2997_v37  ;;  %v2968_v6 = vpop.permute.xlu0 %2967  ;;  %v3025_v12 = vpop.permute.xlu1 %3024 }
0x1690   : > { %v3093_v15 = vmul.f32 %v3085_v29, %v2981_v49  ;;  %v2982_v59 = vsub.f32 %v2968_v6, %v5840_v5 }
0x1691   : > { %v3127_v63 = vsel %vm1112_vm10, %v3113_v52, 0.0 }
0x1692   : > { %v3128_v62 = vrot.slane %v3127_v63, 4  ;;  %v3106_v56 = vmul.f32 1.442695, %v3093_v15  ;;  %v3086_v53 = vmul.f32 %v3078_v25, %v2982_v59 }
0x1693   : > { %v2975_v47 = vpop.permute.xlu0 %2974 }
0x1694   : > { %v3129_v43 = vadd.f32 %v3128_v62, %v3127_v63  ;;  %4314 = vpow2.f32 %v3106_v56  ;;  %v3094_v3 = vmul.f32 %v3086_v53, %v2982_v59  ;;  %v2983_v46 = vsub.f32 %v2975_v47, %v5840_v5 }
0x1695   : > { %4316 = vpow2.f32 %v3104_v31 }
0x1696   : > { %v4309_v7 = vpop.eup %4308  ;;  %v3130_v28 = vrot.slane %v3129_v43, 2  ;;  %v3108_v24 = vmul.f32 1.442695, %v3094_v3  ;;  %v3087_v11 = vmul.f32 %v3079_v35, %v2983_v46 }
0x1697   : > { %v4311_v10 = vpop.eup %4310  ;;  %v3115_v50 = vmul.f32 %v4309_v7, %v3011_v18  ;;  %v2990_v33 = vpop.permute.xlu0 %2989 }
0x1698   : > { %v3131_v57 = vadd.f32 %v3130_v28, %v3129_v43  ;;  %4318 = vpow2.f32 %v3108_v24  ;;  %v3095_v44 = vmul.f32 %v3087_v11, %v2983_v46  ;;  %v3112_v39 = vmul.f32 %v4311_v10, %v2990_v33  ;;  %v4313_v26 = vpop.eup %4312 }
0x1699   : > { %4320 = vpow2.f32 %v3907_v13  ;;  %v3141_v17 = vsel %vm1112_vm10, %v3115_v50, 0.0  ;;  %v3039_v13 = vpop.permute.xlu1 %3038 }
0x169a   : > { %v3142_v4 = vrot.slane %v3141_v17, 4  ;;  %v3110_v23 = vmul.f32 1.442695, %v3095_v44  ;;  %v3120_v5 = vsel %vm1112_vm10, %v3112_v39, 0.0  ;;  %v3132_v14 = vrot.slane %v3131_v57, 1 }
0x169b   : > { %v3121_v30 = vrot.slane %v3120_v5, 4  ;;  %v3004_v41 = vpop.permute.xlu0 %3003 }
0x169c   : > { %v3143_v60 = vadd.f32 %v3142_v4, %v3141_v17  ;;  %4322 = vpow2.f32 %v3110_v23  ;;  %v3114_v45 = vmul.f32 %v4313_v26, %v3004_v41  ;;  %v3133_v61 = vadd.f32 %v3132_v14, %v3131_v57 }
0x169d   : > { %v3122_v38 = vadd.f32 %v3121_v30, %v3120_v5 }
0x169e   : > { %v4315_v2 = vpop.eup %4314  ;;  %v3144_v32 = vrot.slane %v3143_v60, 2  ;;  %v3134_v34 = vsel %vm1112_vm10, %v3114_v45, 0.0  ;;  %3180 = vbcast.lane.b32.xlu0 %v3133_v61, 256 }
0x169f   : > { %v4317_v9 = vpop.eup %4316  ;;  %v3117_v21 = vmul.f32 %v4315_v2, %v3025_v12  ;;  %v3123_v27 = vrot.slane %v3122_v38, 2  ;;  %v3135_v42 = vrot.slane %v3134_v34, 4  ;;  %v3018_v8 = vpop.permute.xlu0 %3017 }
0x16a0   : > { %v3145_v54 = vadd.f32 %v3144_v32, %v3143_v60  ;;  %v3116_v51 = vmul.f32 %v4317_v9, %v3018_v8 }
0x16a1   : > { %v3155_v49 = vsel %vm1112_vm10, %v3117_v21, 0.0  ;;  %v3124_v48 = vadd.f32 %v3123_v27, %v3122_v38  ;;  %v3136_v0 = vadd.f32 %v3135_v42, %v3134_v34 }
0x16a2   : > { %v4319_v16 = vpop.eup %4318  ;;  %v3156_v37 = vrot.slane %v3155_v49, 4  ;;  %v3148_v29 = vsel %vm1112_vm10, %v3116_v51, 0.0  ;;  %v3146_v52 = vrot.slane %v3145_v54, 1 }
0x16a3   : > { %v4321_v6 = vpop.eup %4320  ;;  %v3137_v25 = vrot.slane %v3136_v0, 2  ;;  %v3149_v15 = vrot.slane %v3148_v29, 4  ;;  %v3032_v59 = vpop.permute.xlu0 %3031  ;;  %v3125_v22 = vrot.slane %v3124_v48, 1 }
0x16a4   : > { %v3157_v63 = vadd.f32 %v3156_v37, %v3155_v49  ;;  %v3118_v31 = vmul.f32 %v4319_v16, %v3032_v59  ;;  %v3147_v62 = vadd.f32 %v3146_v52, %v3145_v54  ;;  %v3394_v43 = vadd.f32 1.0, %v4321_v6  ;;  %v5841_v49 = vld [vmem:[#allocation32_spill] sm:$0xff] }
0x16a5   : > { %v3138_v56 = vadd.f32 %v3137_v25, %v3136_v0  ;;  %v3150_v53 = vadd.f32 %v3149_v15, %v3148_v29  ;;  %v3126_v35 = vadd.f32 %v3125_v22, %v3124_v48  ;;  %v5842_v29 = vld [vmem:[#allocation33_spill] sm:$0xff]  ;;  %v5843_v25 = vld [vmem:[#allocation34_spill] sm:$0xff] }
0x16a6   : > { %v4323_v47 = vpop.eup %4322  ;;  %v3158_v3 = vrot.slane %v3157_v63, 2  ;;  %v3162_v46 = vsel %vm1112_vm10, %v3118_v31, 0.0  ;;  %3186 = vbcast.lane.b32.xlu0 %v3147_v62, 256  ;;  %4324 = vrcp.f32 %v3394_v43 }
0x16a7   : > { %v3151_v7 = vrot.slane %v3150_v53, 2  ;;  %v3163_v28 = vrot.slane %v3162_v46, 4  ;;  %3177 = vbcast.lane.b32.xlu1 %v3126_v35, 256  ;;  %v3139_v18 = vrot.slane %v3138_v56, 1  ;;  %v3119_v11 = vmul.f32 %v4323_v47, %v3039_v13  ;;  %v3399_v12 = vpop.permute.xlu0 %3398 }
0x16a8   : > { %v3159_v24 = vadd.f32 %v3158_v3, %v3157_v63  ;;  %v3297_v14 = vsel %vm1270_vm11, %v3133_v61, %v3126_v35 }
0x16a9   : > { %v3152_v10 = vadd.f32 %v3151_v7, %v3150_v53  ;;  %v3164_v50 = vadd.f32 %v3163_v28, %v3162_v46  ;;  %v3140_v33 = vadd.f32 %v3139_v18, %v3138_v56  ;;  %v3169_v44 = vsel %vm1112_vm10, %v3119_v11, 0.0  ;;  %v5844_v56 = vld [vmem:[#allocation35_spill] sm:$0xff]  ;;  %v5845_v28 = vld [vmem:[#allocation36_spill] sm:$0xff]  ;;  %v5846_v11 = vld [vmem:[#allocation37_spill] sm:$0xff] }
0x16aa   : > { %v3160_v57 = vrot.slane %v3159_v24, 1  ;;  %v3170_v4 = vrot.slane %v3169_v44, 4 }
0x16ab   : > { %v3165_v39 = vrot.slane %v3164_v50, 2  ;;  %3183 = vbcast.lane.b32.xlu1 %v3140_v33, 256  ;;  %v3153_v17 = vrot.slane %v3152_v10, 1  ;;  %v3298_v41 = vsel %vm1272_vm12, %v3140_v33, %v3297_v14 }
0x16ac   : > { %v3161_v23 = vadd.f32 %v3160_v57, %v3159_v24  ;;  %v3171_v30 = vadd.f32 %v3170_v4, %v3169_v44  ;;  %v3299_v38 = vsel %vm1274_vm13, %v3147_v62, %v3298_v41 }
0x16ad   : > { %v3166_v5 = vadd.f32 %v3165_v39, %v3164_v50  ;;  %v3154_v26 = vadd.f32 %v3153_v17, %v3152_v10 }
0x16ae   : > { %3192 = vbcast.lane.b32.xlu0 %v3161_v23, 256  ;;  %v3172_v45 = vrot.slane %v3171_v30, 2 }
0x16af   : > { %3189 = vbcast.lane.b32.xlu1 %v3154_v26, 256  ;;  %v3167_v60 = vrot.slane %v3166_v5, 1  ;;  %v3300_v34 = vsel %vm1276_vm14, %v3154_v26, %v3299_v38 }
0x16b0   : > { %v3173_v32 = vadd.f32 %v3172_v45, %v3171_v30  ;;  %v5552_v21 = vpop.eup %4324  ;;  %v3301_v42 = vsel %vm1278_vm15, %v3161_v23, %v3300_v34  ;;  %v5847_v30 = vld [vmem:[#allocation38_spill] sm:$0xff] }
0x16b1   : > { %v3168_v2 = vadd.f32 %v3167_v60, %v3166_v5  ;;  %v3401_v61 = vmul.f32 %v5552_v21, %v3399_v12 }
0x16b2   : > { %v3174_v9 = vrot.slane %v3173_v32, 1 }
0x16b3   : > { %3195 = vbcast.lane.b32.xlu1 %v3168_v2, 256  ;;  %v3302_v8 = vsel %vm1280_vm0, %v3168_v2, %v3301_v42 }
0x16b4   : > { %v3175_v27 = vadd.f32 %v3174_v9, %v3173_v32 }
0x16b6   : > { %3198 = vbcast.lane.b32.xlu0 %v3175_v27, 256  ;;  %v3303_v54 = vsel %vm1282_vm1, %v3175_v27, %v3302_v8 }
0x16b7   : > { %3403 = vrot.lane.b32.xlu1 %v3401_v61, %s5825_s28  ;;  %3305 = vst.msk [vmem:[#allocation15] sm:$0xff] %vm1308_vm2, %v3303_v54 }
0x16bb   : > { %3415 = vrot.lane.b32.xlu1 %v5477_v58, %s5815_s10 }
0x1710   : > { %v3181_v51 = vpop.permute.xlu0 %3180 }
0x1711   : > { %v3201_v48 = vmul.f32 %v5841_v49, %v3181_v51 }
0x1713   : > { %v3215_v0 = vsel %vm1201_vm3, %v3201_v48, 0.0 }
0x1714   : > { %v3216_v16 = vrot.slane %v3215_v0, 4 }
0x1716   : > { %v3217_v59 = vadd.f32 %v3216_v16, %v3215_v0 }
0x1718   : > { %v3187_v37 = vpop.permute.xlu0 %3186  ;;  %v3218_v35 = vrot.slane %v3217_v59, 2 }
0x1719   : > { %v3203_v52 = vmul.f32 %v5842_v29, %v3187_v37  ;;  %v3178_v6 = vpop.permute.xlu1 %3177 }
0x171a   : > { %v3200_v15 = vmul.f32 %v5843_v25, %v3178_v6  ;;  %v3219_v50 = vadd.f32 %v3218_v35, %v3217_v59 }
0x171b   : > { %v3229_v22 = vsel %vm1201_vm3, %v3203_v52, 0.0 }
0x171c   : > { %v3230_v63 = vrot.slane %v3229_v22, 4  ;;  %v3208_v31 = vsel %vm1201_vm3, %v3200_v15, 0.0  ;;  %v3220_v60 = vrot.slane %v3219_v50, 1 }
0x171d   : > { %v3209_v62 = vrot.slane %v3208_v31, 4  ;;  %v3184_v58 = vpop.permute.xlu1 %3183 }
0x171e   : > { %v3202_v53 = vmul.f32 %v5844_v56, %v3184_v58  ;;  %v3231_v43 = vadd.f32 %v3230_v63, %v3229_v22  ;;  %v3221_v49 = vadd.f32 %v3220_v60, %v3219_v50 }
0x171f   : > { %v3210_v47 = vadd.f32 %v3209_v62, %v3208_v31 }
0x1720   : > { %v3222_v3 = vsel %vm1201_vm3, %v3202_v53, 0.0  ;;  %v3193_v46 = vpop.permute.xlu0 %3192  ;;  %v3232_v39 = vrot.slane %v3231_v43, 2 }
0x1721   : > { %v3211_v13 = vrot.slane %v3210_v47, 2  ;;  %v3223_v7 = vrot.slane %v3222_v3, 4  ;;  %v3205_v18 = vmul.f32 %v5845_v28, %v3193_v46  ;;  %v3190_v24 = vpop.permute.xlu1 %3189 }
0x1722   : > { %v3204_v10 = vmul.f32 %v5846_v11, %v3190_v24  ;;  %v3233_v32 = vadd.f32 %v3232_v39, %v3231_v43 }
0x1723   : > { %v3212_v33 = vadd.f32 %v3211_v13, %v3210_v47  ;;  %v3224_v57 = vadd.f32 %v3223_v7, %v3222_v3  ;;  %v3243_v44 = vsel %vm1201_vm3, %v3205_v18, 0.0 }
0x1724   : > { %v3244_v17 = vrot.slane %v3243_v44, 4  ;;  %v3236_v4 = vsel %vm1201_vm3, %v3204_v10, 0.0  ;;  %v3234_v37 = vrot.slane %v3233_v32, 1 }
0x1725   : > { %v3225_v23 = vrot.slane %v3224_v57, 2  ;;  %v3237_v5 = vrot.slane %v3236_v4, 4  ;;  %v3196_v14 = vpop.permute.xlu1 %3195  ;;  %v3213_v45 = vrot.slane %v3212_v33, 1 }
0x1726   : > { %v3245_v26 = vadd.f32 %v3244_v17, %v3243_v44  ;;  %v3206_v41 = vmul.f32 %v5847_v30, %v3196_v14  ;;  %v3235_v62 = vadd.f32 %v3234_v37, %v3233_v32 }
0x1727   : > { %v3226_v38 = vadd.f32 %v3225_v23, %v3224_v57  ;;  %v3238_v2 = vadd.f32 %v3237_v5, %v3236_v4  ;;  %v3214_v48 = vadd.f32 %v3213_v45, %v3212_v33  ;;  %v3408_v33 = vsub.f32 1.0, %v5552_v21  ;;  %v4349_v45 = vld [vmem:[%s5749_s9] ss:$0 sm:$0xff] }
0x1728   : > { %v3250_v12 = vsel %vm1201_vm3, %v3206_v41, 0.0  ;;  %v3246_v9 = vrot.slane %v3245_v26, 2  ;;  %v3199_v42 = vpop.permute.xlu0 %3198 }
0x1729   : > { %v3227_v34 = vrot.slane %v3226_v38, 1  ;;  %v3239_v61 = vrot.slane %v3238_v2, 2  ;;  %v3251_v27 = vrot.slane %v3250_v12, 4  ;;  %v3404_v8 = vpop.permute.xlu1 %3403  ;;  %v3207_v54 = vmul.f32 %v5374_v19, %v3199_v42 }
0x172a   : > { %v3406_v51 = vadd.f32 %v3404_v8, %v5514_v20  ;;  %v3247_v6 = vadd.f32 %v3246_v9, %v3245_v26  ;;  %v3275_v22 = vsel %vm1270_vm11, %v3221_v49, %v3214_v48 }
0x172b   : > { %v3240_v0 = vadd.f32 %v3239_v61, %v3238_v2  ;;  %v3252_v16 = vadd.f32 %v3251_v27, %v3250_v12  ;;  %v3228_v29 = vadd.f32 %v3227_v34, %v3226_v38  ;;  %v3257_v52 = vsel %vm1201_vm3, %v3207_v54, 0.0 }
0x172c   : > { %4326 = vtanh.f32 %v3406_v51  ;;  %v3258_v59 = vrot.slane %v3257_v52, 4  ;;  %v3248_v58 = vrot.slane %v3247_v6, 1 }
0x172d   : > { %v3241_v25 = vrot.slane %v3240_v0, 1  ;;  %v3253_v15 = vrot.slane %v3252_v16, 2  ;;  %v3276_v19 = vsel %vm1272_vm12, %v3228_v29, %v3275_v22  ;;  %v3416_v50 = vpop.permute.xlu1 %3415 }
0x172e   : > { %v3259_v31 = vadd.f32 %v3258_v59, %v3257_v52  ;;  %v3277_v47 = vsel %vm1274_vm13, %v3235_v62, %v3276_v19  ;;  %v3249_v46 = vadd.f32 %v3248_v58, %v3247_v6  ;;  %v3418_v44 = vmul.f32 %v5552_v21, %v3416_v50 }
0x172f   : > { %v3254_v63 = vadd.f32 %v3253_v15, %v3252_v16  ;;  %v3242_v20 = vadd.f32 %v3241_v25, %v3240_v0 }
0x1730   : > { %v3260_v53 = vrot.slane %v3259_v31, 2 }
0x1731   : > { %v3255_v56 = vrot.slane %v3254_v63, 1  ;;  %v3278_v3 = vsel %vm1276_vm14, %v3242_v20, %v3277_v47 }
0x1732   : > { %v3261_v35 = vadd.f32 %v3260_v53, %v3259_v31  ;;  %v3279_v18 = vsel %vm1278_vm15, %v3249_v46, %v3278_v3 }
0x1733   : > { %v3256_v43 = vadd.f32 %v3255_v56, %v3254_v63 }
0x1734   : > { %v3262_v13 = vrot.slane %v3261_v35, 1 }
0x1735   : > { %v3280_v24 = vsel %vm1280_vm0, %v3256_v43, %v3279_v18 }
0x1736   : > { %v4327_v7 = vpop.eup %4326  ;;  %v3263_v28 = vadd.f32 %v3262_v13, %v3261_v35 }
0x1737   : > { %3410 = vrot.lane.b32.xlu0 %v4327_v7, %s5826_s30 }
0x1738   : > { %v3281_v11 = vsel %vm1282_vm1, %v3263_v28, %v3280_v24 }
0x1739   : > { %3283 = vst.msk [vmem:[#allocation7] sm:$0xff] %vm1285_vm4, %v3281_v11 }
0x173b   : > { %3284 = vrot.lane.b32.xlu0 %v3281_v11, %s5815_s10 }
0x1740   : > { %v3711_v10 = vld [vmem:[#allocation7] sm:$0xff] }
0x1741   : > { %3712 = vst.msk [vmem:[#allocation14] sm:$0xff] %vm1285_vm4, %v3711_v10 }
0x17a9   : > { %v3411_v57 = vpop.permute.xlu0 %3410 }
0x17aa   : > { %v3413_v39 = vmul.f32 %v3411_v57, %v3408_v33 }
0x17ac   : > { %v3419_v17 = vadd.f32 %v3418_v44, %v3413_v39 }
0x17ad   : > { %v3285_v4 = vpop.permute.xlu0 %3284 }
0x17ae   : > { %v3287_v23 = vsel %vm707_vm6, %v5446_v1, %v3285_v4  ;;  %3421 = vrot.lane.b32.xlu1 %v3419_v17, %s5826_s30  ;;  %v5848_v1 = vld [vmem:[#allocation31_spill] sm:$0xff] }
0x17af   : > { %3288 = vst.msk [vmem:[#allocation3 + $0x30] sm:$0xff] %vm709_vm7, %v3287_v23  ;;  %v645_v41 = vadd.f32 %v5848_v1, %v5229_v55 }
0x17b6   : > { %v3427_v5 = vld [vmem:[#allocation3 + $0x30] sm:$0xff] }
0x17b7   : > { %3429 = vrot.lane.b32.xlu0 %v3427_v5, %s5815_s10  ;;  %v3556_v22 = vpack.c.bf16 %v3427_v5, %v5471_v36 }
0x1820   : > { %v3422_v14 = vpop.permute.xlu1 %3421 }
0x1821   : > { %3424 = vst.msk [vmem:[#allocation5] sm:$0xff] %vm707_vm6, %v3422_v14  ;;  %3425 = vst.msk [vmem:[#allocation3 + $0x28] sm:$0xff] %vm707_vm6, %v3422_v14 }
0x1828   : > { %v3426_v26 = vld [vmem:[#allocation5] sm:$0xff] }
0x1829   : > { %v3430_v21 = vpop.permute.xlu0 %3429  ;;  %v3551_v6 = vld [vmem:[#allocation3 + $0x28] sm:$0xff] }
0x182a   : > { %v3432_v30 = vsel %vm707_vm6, %v3426_v26, %v3430_v21 }
0x182b   : > { %3908 = vmatmul.mubr.msk.f32.vlgmr.msra.gmra.mrb[16].mxu1 %vm1900_vm5, %v3432_v30 }
0x18fe   : > { %v3502_v60 = vpop.f32.mrb[16].mxu1 }
0x18ff   : > { %v3507_v38 = vadd.f32 %v4349_v45, %v3502_v60  ;;  %v3504_v2 = vpop.f32.mrb[17].mxu1 }
0x1900   : > { %v3509_v32 = vadd.f32 %v3504_v2, %v645_v41 }
0x1901   : > { %3518 = vrot.lane.b32.xlu1 %v3507_v38, %s5825_s28 }
0x1902   : > { %v3510_v12 = vadd.f32 %v3509_v32, %v3507_v38 }
0x1904   : > { %v3909_v34 = vmul.f32 -1.442695, %v3510_v12 }
0x1906   : > { %4328 = vpow2.f32 %v3909_v34 }
0x1910   : > { %v4329_v9 = vpop.eup %4328 }
0x1911   : > { %v3514_v61 = vadd.f32 1.0, %v4329_v9 }
0x1913   : > { %4330 = vrcp.f32 %v3514_v61 }
0x191d   : > { %v4331_v27 = vpop.eup %4330 }
0x191e   : > { %v3528_v48 = vsub.f32 1.0, %v4331_v27 }
0x1973   : > { %v3519_v42 = vpop.permute.xlu1 %3518 }
0x1974   : > { %v3521_v8 = vmul.f32 %v4331_v27, %v3519_v42 }
0x1976   : > { %3523 = vrot.lane.b32.xlu0 %v3521_v8, %s5825_s28 }
0x197a   : > { %3535 = vrot.lane.b32.xlu0 %v3426_v26, %s5815_s10  ;;  %s4545_s10 = smov [#allocation12]  }
0x197b   : > { %s3740_s28 = sshll.u32 %s4545_s10, 4  ;;  %s3741_s28 = int_to_ptr.vmem [resolvable:$true] %s3740_s28 }
0x197c   : > { %p4385_p1 = scmp.lt.s32.totalorder %s3741_s28, %s3741_s28 }
0x19e8   : > { %v3524_v55 = vpop.permute.xlu0 %3523 }
0x19e9   : > { %v3526_v54 = vadd.f32 %v3524_v55, %v3509_v32 }
0x19eb   : > { %4332 = vtanh.f32 %v3526_v54 }
0x19ec   : > { %v3536_v49 = vpop.permute.xlu0 %3535 }
0x19ed   : > { %v3538_v16 = vmul.f32 %v4331_v27, %v3536_v49 }
0x19f5   : > { %v4333_v51 = vpop.eup %4332 }
0x19f6   : > { %3530 = vrot.lane.b32.xlu1 %v4333_v51, %s5826_s30 }
0x1a68   : > { %v3531_v0 = vpop.permute.xlu1 %3530 }
0x1a69   : > { %v3533_v37 = vmul.f32 %v3531_v0, %v3528_v48 }
0x1a6b   : > { %v3539_v29 = vadd.f32 %v3538_v16, %v3533_v37 }
0x1a6d   : > { %3541 = vrot.lane.b32.xlu1 %v3539_v29, %s5826_s30  ;;  %s4378_s30 = scalar_lea.vmem %s3741_s28, 256 }
0x1a6e   : > { %p4379_p9 = scmp.ne.s32.totalorder %s3741_s28, %s4378_s30  ;;  %p4386_p4 = scmp.lt.s32.totalorder %s4378_s30, %s4378_s30 }
0x1a70   : > { %p4380_p11 = pnand %p4379_p9, %p5849_p10  ;;  %p4387_p7 = por %p4386_p4, %p4385_p1 }
0x1a72   : > { %p4381_p13 = pneg %p4380_p11 }
0x1a74   : > { %p4388_p8 = pnand %p4387_p7, %p4381_p13 }
0x1adf   : > { %v3542_v52 = vpop.permute.xlu1 %3541 }
0x1ae0   : > { %3544 = vst.msk [vmem:[#allocation5] sm:$0xff] %vm707_vm6, %v3542_v52  ;;  %3545 = vst.msk [vmem:[#allocation3 + $0x38] sm:$0xff] %vm707_vm6, %v3542_v52 }
0x1ae7   : > { %v3553_v25 = vld [vmem:[#allocation3 + $0x38] sm:$0xff]  ;;  %v3706_v15 = vld [vmem:[#allocation5] sm:$0xff] }
0x1ae8   : > { %v3557_v59 = vpack.c.bf16 %v3553_v25, %v3551_v6  ;;  %3708 = vst.msk [vmem:[#allocation12 + $0x8] sm:$0xff] %vm707_vm6, %v3706_v15 }
0x1aea   : > { %3922 = vmatprep.mubr.msk.bf16.mxu0 %vm707_vm6, %v3557_v59 }
0x1aeb   : > { %3692 = vmatmul.mubr.bf16.gmra.mrb[20].mxu0 %v3556_v22 }
0x1aec   : > { %4391 = shalt.err (!%p4388_p8)
}
0x1aed   : > { %s4392_s19 = scalar_lea.hbm %s5753_s13, 256  ;;  %p5850_p0 = pmov %p5849_p10 }
0x1aee   : > { %p4393_p12 = scmp.ne.s32.totalorder %s5753_s13, %s4392_s19  ;;  %p4398_p5 = scmp.lt.u32.totalorder %s4392_s19, %s5753_s13 }
0x1af0   : > { %p4394_p3 = pnand %p4393_p12, %p5850_p0 }
0x1af2   : > { %p4395_p2 = pneg %p4394_p3 }
0x1af4   : > { %p4400_p6 = pnand %p4398_p5, %p4395_p2 }
0x1af6   : > { %4403 = shalt.err (!%p4400_p6)
}
0x1af7   : > { %s5796_s29 = smov 128   ;;  %s4547_s10 = smov 8  }
0x1af8   : > { %p5851_p9 = pmov %p5850_p0  ;;  %s4548_s26 = smov [#allocation14]  }
0x1af9   : > { %s3757_s21 = sshll.u32 %s4548_s26, 4  ;;  %s4549_s20 = smov [#allocation15]   ;;  %s3758_s21 = int_to_ptr.vmem [resolvable:$true] %s3757_s21 }
0x1afa   : > { %4125 = dma.vmem_to_hbm [thread:$0]  (%p5851_p9), %s3741_s28, 256, %s5753_s13, [#allocation13], %s5796_s29, %s5796_s29, %s4547_s10  }
0x1afb   : > { %s3768_s23 = sshll.u32 %s4549_s20, 4  ;;  %s4404_s19 = scalar_lea.vmem %s3758_s21, 128  ;;  %s3769_s23 = int_to_ptr.vmem [resolvable:$true] %s3768_s23 }
0x1afc   : > { %p4405_p10 = scmp.ne.s32.totalorder %s3758_s21, %s4404_s19  ;;  %p5852_p11 = pmov %p5850_p0 }
0x1afd   : > { %p4411_p4 = scmp.lt.s32.totalorder %s3758_s21, %s3758_s21  ;;  %p4412_p7 = scmp.lt.s32.totalorder %s4404_s19, %s4404_s19 }
0x1afe   : > { %p4406_p13 = pnand %p4405_p10, %p5852_p11 }
0x1aff   : > { %p4413_p8 = por %p4412_p7, %p4411_p4 }
0x1b00   : > { %p4407_p1 = pneg %p4406_p13 }
0x1b02   : > { %p4414_p12 = pnand %p4413_p8, %p4407_p1 }
0x1b04   : > { %4417 = shalt.err (!%p4414_p12)
}
0x1b05   : > { %s4418_s28 = scalar_lea.hbm %s5755_s15, 128  ;;  %p5853_p3 = pmov %p5851_p9 }
0x1b06   : > { %p4419_p0 = scmp.ne.s32.totalorder %s5755_s15, %s4418_s28  ;;  %p4424_p6 = scmp.lt.u32.totalorder %s4418_s28, %s5755_s15 }
0x1b08   : > { %p4420_p2 = pnand %p4419_p0, %p5853_p3 }
0x1b0a   : > { %p4421_p5 = pneg %p4420_p2 }
0x1b0c   : > { %p4426_p9 = pnand %p4424_p6, %p4421_p5 }
0x1b0e   : > { %4429 = shalt.err (!%p4426_p9)
}
0x1b0f   : > { %p5854_p10 = pmov %p5853_p3  ;;  %s4430_s1 = scalar_lea.vmem %s3769_s23, 128 }
0x1b10   : > { %p4431_p11 = scmp.ne.s32.totalorder %s3769_s23, %s4430_s1  ;;  %p5855_p13 = pmov %p5853_p3 }
0x1b11   : > { %4127 = dma.vmem_to_hbm [thread:$0]  (%p5854_p10), %s3758_s21, 128, %s5755_s15, [#allocation13]  }
0x1b12   : > { %p4432_p1 = pnand %p4431_p11, %p5855_p13  ;;  %p4437_p7 = scmp.lt.s32.totalorder %s3769_s23, %s3769_s23 }
0x1b13   : > { %p4438_p8 = scmp.lt.s32.totalorder %s4430_s1, %s4430_s1 }
0x1b14   : > { %p4433_p4 = pneg %p4432_p1 }
0x1b15   : > { %p4439_p12 = por %p4438_p8, %p4437_p7 }
0x1b17   : > { %p4440_p0 = pnand %p4439_p12, %p4433_p4 }
0x1b19   : > { %4443 = shalt.err (!%p4440_p0)
}
0x1b1a   : > { %s4444_s30 = scalar_lea.hbm %s5756_s16, 128  ;;  %p5856_p2 = pmov %p5854_p10 }
0x1b1b   : > { %p4445_p3 = scmp.ne.s32.totalorder %s5756_s16, %s4444_s30  ;;  %p4450_p9 = scmp.lt.u32.totalorder %s4444_s30, %s5756_s16 }
0x1b1d   : > { %p4446_p5 = pnand %p4445_p3, %p5856_p2 }
0x1b1f   : > { %p4447_p6 = pneg %p4446_p5 }
0x1b21   : > { %p4452_p10 = pnand %p4450_p9, %p4447_p6 }
0x1b23   : > { %4455 = shalt.err (!%p4452_p10)
}
0x1b24   : > { %p5857_p11 = pmov %p5856_p2  ;;  %s3934_s1 = sshll.u32 %s4657_s25, 9 }
0x1b25   : > { %s3727_s18 = sshll.u32 %s4731_s27, 4  ;;  %s5681_s17 = scalar_lea.hbm %s5752_s12, %s3934_s1  ;;  %s5683_s18 = int_to_ptr.vmem [resolvable:$true] %s3727_s18 }
0x1b26   : > { %4129 = dma.vmem_to_hbm [thread:$0]  (%p5857_p11), %s3769_s23, 128, %s5756_s16, [#allocation16]  }
0x1b27   : > { %s5858_s23 = sand.u32 1, %s4522_s22   ;;  %s4456_s21 = scalar_lea.vmem %s5683_s18, 512 }
0x1b28   : > { %s5688_s29 = scalar_lea.sflag [#allocation10], %s5858_s23  ;;  %p4457_p13 = scmp.ne.s32.totalorder %s5683_s18, %s4456_s21 }
0x1b29   : > { %p5859_p1 = scmp.ne.s32.totalorder %s5804_s0, 0  ;;  %s4550_s26 = smov [#allocation11]  }
0x1b2a   : > { %s4460_s20 = sshll.u32 %s4550_s26, 4  ;;  %s4461_s20 = int_to_ptr.vmem [resolvable:$false] %s4460_s20 }
0x1b2b   : > { %p4458_p4 = pnand %p4457_p13, %p5859_p1  ;;  %s4462_s19 = scalar_lea.vmem %s4461_s20, 1024 }
0x1b2c   : > { %p4463_p8 = scmp.lt.s32.totalorder %s5683_s18, %s4461_s20  ;;  %p4464_p12 = scmp.lt.s32.totalorder %s4462_s19, %s4456_s21 }
0x1b2d   : > { %p4459_p7 = pneg %p4458_p4 }
0x1b2e   : > { %p4465_p0 = por %p4464_p12, %p4463_p8 }
0x1b30   : > { %p4466_p3 = pnand %p4465_p0, %p4459_p7 }
0x1bbe   : > { %v3693_v36 = vpop.f32.mrb[20].mxu0 }
0x1bbf   : > { %v3694_v63 = vadd.f32 %v5525_v40, %v3693_v36  ;;  %v3695_v31 = vpop.f32.mrb[21].mxu0 }
0x1bc0   : > { %v3696_v19 = vpop.f32.mrb[22].mxu0 }
0x1bc1   : > { %3702 = vst [vmem:[%s4731_s27 + $0x10] sm:$0xff] %v3694_v63  ;;  %v3697_v20 = vadd.f32 %v5525_v40, %v3696_v19  ;;  %v3698_v62 = vpop.f32.mrb[23].mxu0 }
0x1bc3   : > { %3703 = vst [vmem:[%s4731_s27 + $0x18] sm:$0xff] %v3697_v20 }
0x1bc4   : > { %4469 = shalt.err (!%p4466_p3)
}
0x1bc5   : > { %s4470_s27 = scalar_lea.hbm %s5681_s17, 512  ;;  %s4474_s30 = scalar_lea.hbm %s5752_s12, 1024 }
0x1bc6   : > { %p4471_p2 = scmp.ne.s32.totalorder %s5681_s17, %s4470_s27  ;;  %p4475_p9 = scmp.lt.u32.totalorder %s5681_s17, %s5752_s12 }
0x1bc7   : > { %p4476_p10 = scmp.lt.u32.totalorder %s4474_s30, %s4470_s27  ;;  %p4478_p13 = scmp.lt.u32.totalorder %s4470_s27, %s5681_s17 }
0x1bc8   : > { %p4472_p5 = pnand %p4471_p2, %p5859_p1 }
0x1bc9   : > { %p4477_p11 = por %p4476_p10, %p4475_p9 }
0x1bca   : > { %p4473_p6 = pneg %p4472_p5 }
0x1bcb   : > { %p4479_p4 = por %p4478_p13, %p4477_p11 }
0x1bcd   : > { %p4480_p7 = pnand %p4479_p4, %p4473_p6 }
0x1bcf   : > { %4483 = shalt.err (!%p4480_p7)
}
0x1bd0   : > { %s5860_s21 = smov 128   ;;  %p5861_p8 = scmp.eq.s32.totalorder %s4657_s25, 1 }
0x1bd1   : > { %4123 = dma.vmem_to_hbm [thread:$0]  (%p5859_p1), %s5683_s18, 512, %s5681_s17, %s5688_s29, %s5860_s21, %s5860_s21, %s4547_s10  }
0x1bd2   : > { %4505 = dma.done.wait (%p5861_p8), [#allocation13], 384   ;;  %p5862_p12 = pmov %p5861_p8 }
0x1bd3   : > { %p5863_p0 = pmov %p5861_p8 }
0x1bd4   : > { %4507 = vsyncadd (%p5862_p12), [#allocation13], 4294966912 }
0x1bd5   : > { %4509 = dma.done.wait (%p5863_p0), [#allocation16], 128   ;;  %p5864_p3 = pmov %p5863_p0 }
0x1bd7   : > { %4511 = vsyncadd (%p5864_p3), [#allocation16], 4294967168 }
0x1bd8 PF: > { %s5865_s0 = sld [smem:[#allocation21_spill]]  ;;  %s5866_s20 = sld [smem:[#allocation25_spill]] }
0x1bd9   : > { %p4153_p2 = scmp.ge.s32.totalorder %s4530_s24, 2 }
0x1bde   : > { %s3795_s19 = sand.u32 1, %s5865_s0   ;;  %p5867_p5 = scmp.ne.s32.totalorder %s5866_s20, 0 }
0x1bdf   : > { %s3796_s10 = scalar_lea.sflag [#allocation10], %s3795_s19 }
0x1be0   : > { %p4142_p6 = pnand %p4153_p2, %p5867_p5 }
0x1be2   : > { %4513 = dma.done.wait (!%p4142_p6), %s3796_s10, 512  }
0x1be3   : > { %4515 = vsyncadd (!%p4142_p6), %s3796_s10, 4294966784  ;;  %s5868_s24 = sld [smem:[#allocation23_spill]]  ;;  %s5869_s18 = sld [smem:[#allocation22_spill]] }
0x1be4   : > { %s5870_s23 = sld [smem:[#allocation24_spill]]  ;;  %s5871_s21 = smov %s4522_s22 }
0x1be9   : > { %p30_p1 = scmp.ge.s32.totalorder %s5868_s24, 4   ;;  %s5872_s22 = smov %s5869_s18 }
0x1beb   :  { %32 = sbr.rel (!%p30_p1) target bundleno = 10 (0xa), region = 145 }
0x1bf2   :  { %3801 = vsyncpa [#allocation9], 1 }
0x1bf3   :  { %3803 = vsyncpa [#allocation9 + $0x1], 1 }
0x1bf4   :  { %3804 = vsyncpa [#allocation10], 1 }
0x1bf5   :  { %3806 = vsyncpa [#allocation10 + $0x1], 1 }
0x1bf6   :  { %3807 = vsyncpa [#allocation13], 1 }
0x1bf7   :  { %3808 = vsyncpa [#allocation16], 1 }

</bundles_post_ra>
